<compile_context>
chip_gen: v7x
topology: tpu7x:2x2x1
jax: 0.10.0
libtpu: 0.0.40
codegen_flags: <defaults>
</compile_context>

<pallas_src>
import numpy as np
import jax
import jax.numpy as jnp
from jax import lax
from jax.experimental import pallas as pl
from jax.experimental.pallas import tpu as pltpu


# ---- module hyper-parameters (from the PyTorch __init__) --------------------
CIN, C1, K1, S1, P1 = 2, 4, 3, 2, 0    # ConvTranspose2d(2, 4, 3, stride=2)
C2, K2, S2, P2 = 4, 2, 2, 1            # ConvTranspose2d(4, 4, 2, stride=2, padding=1)
H_IN = W_IN = 8
H1 = (H_IN - 1) * S1 - 2 * P1 + K1     # 17 (v1 / v7 spatial size)
W1O = (W_IN - 1) * S1 - 2 * P1 + K1    # 17
NB = (H1 + 1) // 2                     # 9  : polyphase block size
LW = C1 * NB                           # 36 : lane-packed width (4 channels x 9)


# ------------------------------ fused kernel ---------------------------------

def _fused_kernel(x_ref, w1p_ref, b1p_ref, w2p_ref, b2p_ref, o_ref):
    """Refs (all VMEM):
       x_ref  : (1, 2, 8, 8)
       w1p_ref: (18, 36)  row = ci*9 + kh*3 + kw, col = co*9 + j (scalar repeated)
       b1p_ref: (1, 36)   col = co*9 + j
       w2p_ref: (16, 36)  row = ci*4 + kh*2 + kw
       b2p_ref: (1, 36)
       o_ref  : (4, 17, 17)  v7, one (17,17) plane per output channel
    """
    f32 = jnp.float32

    def tile_lanes(a):                 # (9, 9) -> (9, 36): one copy per channel block
        return jnp.concatenate([a] * C1, axis=1)

    # ===== stage 1: v1 = ConvTranspose2d(2,4,3,stride=2)(x), polyphase ======
    # p_{rp}{cp}[q, co*9 + r] = v1[co, 2q+rp, 2r+cp]  (tail rows/cols = unused garbage)
    bias1 = jnp.broadcast_to(b1p_ref[...], (NB, LW))
    p_ee = bias1
    p_eo = bias1
    p_oe = bias1
    p_oo = bias1

    zr = jnp.zeros((1, H_IN + 2), f32)
    zc = jnp.zeros((H_IN, 1), f32)
    for ci in range(CIN):
        xc = x_ref[0, ci]                                       # (8, 8)
        xp = jnp.concatenate([zc, xc, zc], axis=1)              # (8, 10)
        xp = jnp.concatenate([zr, xp, zr], axis=0)              # (10, 10), zero border
        # Shifted 9x9 windows T[dh][dw][q, r] = x[q-dh, r-dw] (0 when OOB),
        # lane-replicated once per input channel and reused for all taps/phases.
        t00 = tile_lanes(xp[1:1 + NB, 1:1 + NB])
        t10 = tile_lanes(xp[0:NB,     1:1 + NB])
        t01 = tile_lanes(xp[1:1 + NB, 0:NB])
        t11 = tile_lanes(xp[0:NB,     0:NB])

        def w1(kh, kw, _ci=ci):                                 # (1, 36) weight row
            r = _ci * K1 * K1 + kh * K1 + kw
            return w1p_ref[r:r + 1, :]

        p_ee = p_ee + t00 * w1(0, 0) + t10 * w1(2, 0) + t01 * w1(0, 2) + t11 * w1(2, 2)
        p_eo = p_eo + t00 * w1(0, 1) + t10 * w1(2, 1)
        p_oe = p_oe + t00 * w1(1, 0) + t01 * w1(1, 2)
        p_oo = p_oo + t00 * w1(1, 1)

    # ===== spatial top-left 9x9 of v1 per channel (stage-2 input) ===========
    # Row interleave once for all lane-packed channels, then a per-channel
    # column interleave (only concats of static single-row/column slices).
    re_rows, ro_rows = [], []
    for i in range(NB):
        q = i // 2
        if i % 2 == 0:
            re_rows.append(p_ee[q:q + 1]); ro_rows.append(p_eo[q:q + 1])
        else:
            re_rows.append(p_oe[q:q + 1]); ro_rows.append(p_oo[q:q + 1])
    row_e = jnp.concatenate(re_rows, axis=0)        # (9, 36): v1[co, i, 2r]
    row_o = jnp.concatenate(ro_rows, axis=0)        # (9, 36): v1[co, i, 2r+1]

    v1s = []
    for c in range(C1):
        cols = []
        for j in range(NB):
            r = j // 2
            src = row_e if j % 2 == 0 else row_o
            cols.append(src[:, c * NB + r:c * NB + r + 1])
        v1s.append(jnp.concatenate(cols, axis=1))   # (9, 9) = v1[c, :9, :9]

    # ===== gate phases: v6 = 0.5*v1 + 1  (erf branch v4/v5 is dead code) ====
    g_ee = p_ee * 0.5 + 1.0
    g_eo = p_eo * 0.5 + 1.0
    g_oe = p_oe * 0.5 + 1.0
    g_oo = p_oo * 0.5 + 1.0

    # ===== stage 2: ConvTranspose2d(4,4,2,stride=2,padding=1), k==s==2 ======
    # Exactly one weight tap per output pixel -> four 1x1 channel mixes:
    #   v2[co, 2q,   2r  ] = b2 + sum_ci v1[ci, q,   r  ] * W2[ci, co, 1, 1]
    #   v2[co, 2q,   2r+1] = b2 + sum_ci v1[ci, q,   r+1] * W2[ci, co, 1, 0]
    #   v2[co, 2q+1, 2r  ] = b2 + sum_ci v1[ci, q+1, r  ] * W2[ci, co, 0, 1]
    #   v2[co, 2q+1, 2r+1] = b2 + sum_ci v1[ci, q+1, r+1] * W2[ci, co, 0, 0]
    bias2 = jnp.broadcast_to(b2p_ref[...], (NB, LW))
    q_ee = bias2
    q_eo = bias2
    q_oe = bias2
    q_oo = bias2
    zr9 = jnp.zeros((1, NB + 1), f32)
    zc9 = jnp.zeros((NB, 1), f32)
    for ci in range(C1):
        vp = jnp.concatenate([v1s[ci], zc9], axis=1)            # (9, 10)
        vp = jnp.concatenate([vp, zr9], axis=0)                 # (10, 10)
        s_ee = tile_lanes(vp[0:NB,     0:NB])
        s_eo = tile_lanes(vp[0:NB,     1:1 + NB])
        s_oe = tile_lanes(vp[1:1 + NB, 0:NB])
        s_oo = tile_lanes(vp[1:1 + NB, 1:1 + NB])

        def w2(kh, kw, _ci=ci):
            r = _ci * K2 * K2 + kh * K2 + kw
            return w2p_ref[r:r + 1, :]

        q_ee = q_ee + s_ee * w2(1, 1)
        q_eo = q_eo + s_eo * w2(1, 0)
        q_oe = q_oe + s_oe * w2(0, 1)
        q_oo = q_oo + s_oo * w2(0, 0)

    # ===== gate + interleave + 3-D per-channel stores ========================
    f_ee = q_ee * g_ee
    f_eo = q_eo * g_eo
    f_oe = q_oe * g_oe
    f_oo = q_oo * g_oo

    oute_rows, outo_rows = [], []
    for oh in range(H1):
        q = oh // 2
        if oh % 2 == 0:
            oute_rows.append(f_ee[q:q + 1]); outo_rows.append(f_eo[q:q + 1])
        else:
            oute_rows.append(f_oe[q:q + 1]); outo_rows.append(f_oo[q:q + 1])
    out_e = jnp.concatenate(oute_rows, axis=0)      # (17, 36): v7[co, oh, 2r]
    out_o = jnp.concatenate(outo_rows, axis=0)      # (17, 36): v7[co, oh, 2r+1]

    for co in range(C2):
        cols = []
        for ow in range(W1O):
            r = ow // 2
            src = out_e if ow % 2 == 0 else out_o
            cols.append(src[:, co * NB + r:co * NB + r + 1])
        o_ref[co] = jnp.concatenate(cols, axis=1)   # (17, 17)


# -------------------------------- wrapper ------------------------------------

@jax.jit
def model_forward(x_nchw, w1p, b1p, w2p, b2p):
    out = pl.pallas_call(
        _fused_kernel,
        out_shape=jax.ShapeDtypeStruct((C2, H1, W1O), jnp.float32),
        in_specs=[pl.BlockSpec(memory_space=pltpu.MemorySpace.VMEM)] * 5,
        out_specs=pl.BlockSpec(memory_space=pltpu.MemorySpace.VMEM),
    )(x_nchw, w1p, b1p, w2p, b2p)
    return out[None]                                  # (1, 4, 17, 17): metadata-only


# ------------------ one-time parameter setup (outside jit) -------------------

def pack_convt_params(w1, b1, w2, b2):
    """Lane-pack the ConvTranspose weights once at setup: each (ci, kh, kw) tap
    becomes a 36-wide row with W[ci, co, kh, kw] repeated over output channel
    co's 9-lane block; biases are packed the same way."""
    w1 = np.asarray(w1, np.float32)
    w2 = np.asarray(w2, np.float32)
    w1p = np.repeat(np.transpose(w1, (0, 2, 3, 1)).reshape(CIN * K1 * K1, C1), NB, axis=1)
    w2p = np.repeat(np.transpose(w2, (0, 2, 3, 1)).reshape(C1 * K2 * K2, C2), NB, axis=1)
    b1p = np.repeat(np.asarray(b1, np.float32), NB)[None, :]
    b2p = np.repeat(np.asarray(b2, np.float32), NB)[None, :]
    return (jnp.asarray(w1p), jnp.asarray(b1p), jnp.asarray(w2p), jnp.asarray(b2p))


# --------------------------- pure-JAX reference ------------------------------

def _convt_weight_to_conv(w_t):
    """ConvTranspose weight (Cin, Cout, KH, KW) -> direct-conv (Cout, Cin, KH, KW), flipped."""
    return jnp.flip(jnp.transpose(w_t, (1, 0, 2, 3)), axis=(2, 3))


def reference_forward(x, w1, b1, w2, b2):
    w1c = _convt_weight_to_conv(w1)
    v1 = lax.conv_general_dilated(
        x, w1c, window_strides=(1, 1), padding=[(2, 2), (2, 2)],
        lhs_dilation=(2, 2), dimension_numbers=('NCHW', 'OIHW', 'NCHW'))
    v1 = v1 + b1[None, :, None, None]
    w2c = _convt_weight_to_conv(w2)
    v2 = lax.conv_general_dilated(
        v1, w2c, window_strides=(1, 1), padding=[(0, 0), (0, 0)],
        lhs_dilation=(2, 2), dimension_numbers=('NCHW', 'OIHW', 'NCHW'))
    v2 = v2 + b2[None, :, None, None]
    v6 = v1 * 0.5 + 1.0
    # same overlapping-region convention as the kernel (see TODO(synk) above)
    return v2[:, :, :v1.shape[2], :v1.shape[3]] * v6


# ----------------------------------- main -------------------------------------

if __name__ == "__main__":
    key = jax.random.PRNGKey(0)
    kx, kw1, kb1, kw2, kb2 = jax.random.split(key, 5)

    x = jax.random.normal(kx, (1, 2, 8, 8), jnp.float32)
    # Deterministic parameter init (shapes per the module's __init__):
    # ConvTranspose2d(2, 4, 3): weight (2, 4, 3, 3), bias (4,)
    # ConvTranspose2d(4, 4, 2): weight (4, 4, 2, 2), bias (4,)
    bnd1 = 1.0 / np.sqrt(2 * 3 * 3)
    bnd2 = 1.0 / np.sqrt(4 * 2 * 2)
    w1 = jax.random.uniform(kw1, (2, 4, 3, 3), jnp.float32, -bnd1, bnd1)
    b1 = jax.random.uniform(kb1, (4,), jnp.float32, -bnd1, bnd1)
    w2 = jax.random.uniform(kw2, (4, 4, 2, 2), jnp.float32, -bnd2, bnd2)
    b2 = jax.random.uniform(kb2, (4,), jnp.float32, -bnd2, bnd2)

    # One-time parameter prep, kept out of the per-forward path.
    w1p, b1p, w2p, b2p = pack_convt_params(w1, b1, w2, b2)

    out = jax.block_until_ready(model_forward(x, w1p, b1p, w2p, b2p))
    ref = jax.block_until_ready(reference_forward(x, w1, b1, w2, b2))

    assert out.shape == (1, 4, 17, 17), out.shape
    np.testing.assert_allclose(np.asarray(out), np.asarray(ref), rtol=1e-5, atol=1e-5)
    print("KERNEL_OK")
</pallas_src>

<mosaic_0001>
module attributes {stable_mosaic.version = 11 : i64} {
  func.func @_fused_kernel(%arg0: memref<1x2x8x8xf32, #tpu.memory_space<vmem>>, %arg1: memref<18x36xf32, #tpu.memory_space<vmem>>, %arg2: memref<1x36xf32, #tpu.memory_space<vmem>>, %arg3: memref<16x36xf32, #tpu.memory_space<vmem>>, %arg4: memref<1x36xf32, #tpu.memory_space<vmem>>, %arg5: memref<4x17x17xf32, #tpu.memory_space<vmem>>) attributes {dimension_semantics = [], scalar_prefetch = 0 : i64, scratch_operands = 0 : i64, tpu.core_type = #tpu.core_type<tc>} {
    %c0 = arith.constant 0 : index
    %c0_0 = arith.constant 0 : index
    %0 = vector.load %arg2[%c0, %c0_0] : memref<1x36xf32, #tpu.memory_space<vmem>>, vector<1x36xf32>
    %1 = vector.shape_cast %0 : vector<1x36xf32> to vector<1x36xf32>
    %2 = vector.broadcast %1 : vector<1x36xf32> to vector<9x36xf32>
    %cst = arith.constant 0.000000e+00 : f32
    %3 = vector.broadcast %cst : f32 to vector<1x10xf32>
    %cst_1 = arith.constant 0.000000e+00 : f32
    %4 = vector.broadcast %cst_1 : f32 to vector<8x1xf32>
    %c0_2 = arith.constant 0 : index
    %c0_3 = arith.constant 0 : index
    %c0_4 = arith.constant 0 : index
    %c0_5 = arith.constant 0 : index
    %5 = vector.load %arg0[%c0_2, %c0_3, %c0_4, %c0_5] : memref<1x2x8x8xf32, #tpu.memory_space<vmem>>, vector<1x1x8x8xf32>
    %6 = vector.shape_cast %5 : vector<1x1x8x8xf32> to vector<8x8xf32>
    %7 = tpu.concatenate %4, %6, %4 in 1 : vector<8x1xf32>, vector<8x8xf32>, vector<8x1xf32> -> vector<8x10xf32>
    %8 = tpu.concatenate %3, %7, %3 in 0 : vector<1x10xf32>, vector<8x10xf32>, vector<1x10xf32> -> vector<10x10xf32>
    %9 = vector.extract_strided_slice %8 {offsets = [1, 1], sizes = [9, 9], strides = [1, 1]} : vector<10x10xf32> to vector<9x9xf32>
    %10 = tpu.concatenate %9, %9, %9, %9 in 1 : vector<9x9xf32>, vector<9x9xf32>, vector<9x9xf32>, vector<9x9xf32> -> vector<9x36xf32>
    %11 = vector.extract_strided_slice %8 {offsets = [0, 1], sizes = [9, 9], strides = [1, 1]} : vector<10x10xf32> to vector<9x9xf32>
    %12 = tpu.concatenate %11, %11, %11, %11 in 1 : vector<9x9xf32>, vector<9x9xf32>, vector<9x9xf32>, vector<9x9xf32> -> vector<9x36xf32>
    %13 = vector.extract_strided_slice %8 {offsets = [1, 0], sizes = [9, 9], strides = [1, 1]} : vector<10x10xf32> to vector<9x9xf32>
    %14 = tpu.concatenate %13, %13, %13, %13 in 1 : vector<9x9xf32>, vector<9x9xf32>, vector<9x9xf32>, vector<9x9xf32> -> vector<9x36xf32>
    %15 = vector.extract_strided_slice %8 {offsets = [0, 0], sizes = [9, 9], strides = [1, 1]} : vector<10x10xf32> to vector<9x9xf32>
    %16 = tpu.concatenate %15, %15, %15, %15 in 1 : vector<9x9xf32>, vector<9x9xf32>, vector<9x9xf32>, vector<9x9xf32> -> vector<9x36xf32>
    %c0_6 = arith.constant 0 : index
    %c0_7 = arith.constant 0 : index
    %17 = vector.load %arg1[%c0_6, %c0_7] : memref<18x36xf32, #tpu.memory_space<vmem>>, vector<1x36xf32>
    %18 = vector.broadcast %17 : vector<1x36xf32> to vector<9x36xf32>
    %19 = arith.mulf %10, %18 : vector<9x36xf32>
    %20 = arith.addf %2, %19 : vector<9x36xf32>
    %c6 = arith.constant 6 : index
    %c0_8 = arith.constant 0 : index
    %21 = vector.load %arg1[%c6, %c0_8] : memref<18x36xf32, #tpu.memory_space<vmem>>, vector<1x36xf32>
    %22 = vector.broadcast %21 : vector<1x36xf32> to vector<9x36xf32>
    %23 = arith.mulf %12, %22 : vector<9x36xf32>
    %24 = arith.addf %20, %23 : vector<9x36xf32>
    %c2 = arith.constant 2 : index
    %c0_9 = arith.constant 0 : index
    %25 = vector.load %arg1[%c2, %c0_9] : memref<18x36xf32, #tpu.memory_space<vmem>>, vector<1x36xf32>
    %26 = vector.broadcast %25 : vector<1x36xf32> to vector<9x36xf32>
    %27 = arith.mulf %14, %26 : vector<9x36xf32>
    %28 = arith.addf %24, %27 : vector<9x36xf32>
    %c8 = arith.constant 8 : index
    %c0_10 = arith.constant 0 : index
    %29 = vector.load %arg1[%c8, %c0_10] : memref<18x36xf32, #tpu.memory_space<vmem>>, vector<1x36xf32>
    %30 = vector.broadcast %29 : vector<1x36xf32> to vector<9x36xf32>
    %31 = arith.mulf %16, %30 : vector<9x36xf32>
    %32 = arith.addf %28, %31 : vector<9x36xf32>
    %c1 = arith.constant 1 : index
    %c0_11 = arith.constant 0 : index
    %33 = vector.load %arg1[%c1, %c0_11] : memref<18x36xf32, #tpu.memory_space<vmem>>, vector<1x36xf32>
    %34 = vector.broadcast %33 : vector<1x36xf32> to vector<9x36xf32>
    %35 = arith.mulf %10, %34 : vector<9x36xf32>
    %36 = arith.addf %2, %35 : vector<9x36xf32>
    %c7 = arith.constant 7 : index
    %c0_12 = arith.constant 0 : index
    %37 = vector.load %arg1[%c7, %c0_12] : memref<18x36xf32, #tpu.memory_space<vmem>>, vector<1x36xf32>
    %38 = vector.broadcast %37 : vector<1x36xf32> to vector<9x36xf32>
    %39 = arith.mulf %12, %38 : vector<9x36xf32>
    %40 = arith.addf %36, %39 : vector<9x36xf32>
    %c3 = arith.constant 3 : index
    %c0_13 = arith.constant 0 : index
    %41 = vector.load %arg1[%c3, %c0_13] : memref<18x36xf32, #tpu.memory_space<vmem>>, vector<1x36xf32>
    %42 = vector.broadcast %41 : vector<1x36xf32> to vector<9x36xf32>
    %43 = arith.mulf %10, %42 : vector<9x36xf32>
    %44 = arith.addf %2, %43 : vector<9x36xf32>
    %c5 = arith.constant 5 : index
    %c0_14 = arith.constant 0 : index
    %45 = vector.load %arg1[%c5, %c0_14] : memref<18x36xf32, #tpu.memory_space<vmem>>, vector<1x36xf32>
    %46 = vector.broadcast %45 : vector<1x36xf32> to vector<9x36xf32>
    %47 = arith.mulf %14, %46 : vector<9x36xf32>
    %48 = arith.addf %44, %47 : vector<9x36xf32>
    %c4 = arith.constant 4 : index
    %c0_15 = arith.constant 0 : index
    %49 = vector.load %arg1[%c4, %c0_15] : memref<18x36xf32, #tpu.memory_space<vmem>>, vector<1x36xf32>
    %50 = vector.broadcast %49 : vector<1x36xf32> to vector<9x36xf32>
    %51 = arith.mulf %10, %50 : vector<9x36xf32>
    %52 = arith.addf %2, %51 : vector<9x36xf32>
    %c0_16 = arith.constant 0 : index
    %c1_17 = arith.constant 1 : index
    %c0_18 = arith.constant 0 : index
    %c0_19 = arith.constant 0 : index
    %53 = vector.load %arg0[%c0_16, %c1_17, %c0_18, %c0_19] : memref<1x2x8x8xf32, #tpu.memory_space<vmem>>, vector<1x1x8x8xf32>
    %54 = vector.shape_cast %53 : vector<1x1x8x8xf32> to vector<8x8xf32>
    %55 = tpu.concatenate %4, %54, %4 in 1 : vector<8x1xf32>, vector<8x8xf32>, vector<8x1xf32> -> vector<8x10xf32>
    %56 = tpu.concatenate %3, %55, %3 in 0 : vector<1x10xf32>, vector<8x10xf32>, vector<1x10xf32> -> vector<10x10xf32>
    %57 = vector.extract_strided_slice %56 {offsets = [1, 1], sizes = [9, 9], strides = [1, 1]} : vector<10x10xf32> to vector<9x9xf32>
    %58 = tpu.concatenate %57, %57, %57, %57 in 1 : vector<9x9xf32>, vector<9x9xf32>, vector<9x9xf32>, vector<9x9xf32> -> vector<9x36xf32>
    %59 = vector.extract_strided_slice %56 {offsets = [0, 1], sizes = [9, 9], strides = [1, 1]} : vector<10x10xf32> to vector<9x9xf32>
    %60 = tpu.concatenate %59, %59, %59, %59 in 1 : vector<9x9xf32>, vector<9x9xf32>, vector<9x9xf32>, vector<9x9xf32> -> vector<9x36xf32>
    %61 = vector.extract_strided_slice %56 {offsets = [1, 0], sizes = [9, 9], strides = [1, 1]} : vector<10x10xf32> to vector<9x9xf32>
    %62 = tpu.concatenate %61, %61, %61, %61 in 1 : vector<9x9xf32>, vector<9x9xf32>, vector<9x9xf32>, vector<9x9xf32> -> vector<9x36xf32>
    %63 = vector.extract_strided_slice %56 {offsets = [0, 0], sizes = [9, 9], strides = [1, 1]} : vector<10x10xf32> to vector<9x9xf32>
    %64 = tpu.concatenate %63, %63, %63, %63 in 1 : vector<9x9xf32>, vector<9x9xf32>, vector<9x9xf32>, vector<9x9xf32> -> vector<9x36xf32>
    %c9 = arith.constant 9 : index
    %c0_20 = arith.constant 0 : index
    %65 = vector.load %arg1[%c9, %c0_20] : memref<18x36xf32, #tpu.memory_space<vmem>>, vector<1x36xf32>
    %66 = vector.broadcast %65 : vector<1x36xf32> to vector<9x36xf32>
    %67 = arith.mulf %58, %66 : vector<9x36xf32>
    %68 = arith.addf %32, %67 : vector<9x36xf32>
    %c15 = arith.constant 15 : index
    %c0_21 = arith.constant 0 : index
    %69 = vector.load %arg1[%c15, %c0_21] : memref<18x36xf32, #tpu.memory_space<vmem>>, vector<1x36xf32>
    %70 = vector.broadcast %69 : vector<1x36xf32> to vector<9x36xf32>
    %71 = arith.mulf %60, %70 : vector<9x36xf32>
    %72 = arith.addf %68, %71 : vector<9x36xf32>
    %c11 = arith.constant 11 : index
    %c0_22 = arith.constant 0 : index
    %73 = vector.load %arg1[%c11, %c0_22] : memref<18x36xf32, #tpu.memory_space<vmem>>, vector<1x36xf32>
    %74 = vector.broadcast %73 : vector<1x36xf32> to vector<9x36xf32>
    %75 = arith.mulf %62, %74 : vector<9x36xf32>
    %76 = arith.addf %72, %75 : vector<9x36xf32>
    %c17 = arith.constant 17 : index
    %c0_23 = arith.constant 0 : index
    %77 = vector.load %arg1[%c17, %c0_23] : memref<18x36xf32, #tpu.memory_space<vmem>>, vector<1x36xf32>
    %78 = vector.broadcast %77 : vector<1x36xf32> to vector<9x36xf32>
    %79 = arith.mulf %64, %78 : vector<9x36xf32>
    %80 = arith.addf %76, %79 : vector<9x36xf32>
    %c10 = arith.constant 10 : index
    %c0_24 = arith.constant 0 : index
    %81 = vector.load %arg1[%c10, %c0_24] : memref<18x36xf32, #tpu.memory_space<vmem>>, vector<1x36xf32>
    %82 = vector.broadcast %81 : vector<1x36xf32> to vector<9x36xf32>
    %83 = arith.mulf %58, %82 : vector<9x36xf32>
    %84 = arith.addf %40, %83 : vector<9x36xf32>
    %c16 = arith.constant 16 : index
    %c0_25 = arith.constant 0 : index
    %85 = vector.load %arg1[%c16, %c0_25] : memref<18x36xf32, #tpu.memory_space<vmem>>, vector<1x36xf32>
    %86 = vector.broadcast %85 : vector<1x36xf32> to vector<9x36xf32>
    %87 = arith.mulf %60, %86 : vector<9x36xf32>
    %88 = arith.addf %84, %87 : vector<9x36xf32>
    %c12 = arith.constant 12 : index
    %c0_26 = arith.constant 0 : index
    %89 = vector.load %arg1[%c12, %c0_26] : memref<18x36xf32, #tpu.memory_space<vmem>>, vector<1x36xf32>
    %90 = vector.broadcast %89 : vector<1x36xf32> to vector<9x36xf32>
    %91 = arith.mulf %58, %90 : vector<9x36xf32>
    %92 = arith.addf %48, %91 : vector<9x36xf32>
    %c14 = arith.constant 14 : index
    %c0_27 = arith.constant 0 : index
    %93 = vector.load %arg1[%c14, %c0_27] : memref<18x36xf32, #tpu.memory_space<vmem>>, vector<1x36xf32>
    %94 = vector.broadcast %93 : vector<1x36xf32> to vector<9x36xf32>
    %95 = arith.mulf %62, %94 : vector<9x36xf32>
    %96 = arith.addf %92, %95 : vector<9x36xf32>
    %c13 = arith.constant 13 : index
    %c0_28 = arith.constant 0 : index
    %97 = vector.load %arg1[%c13, %c0_28] : memref<18x36xf32, #tpu.memory_space<vmem>>, vector<1x36xf32>
    %98 = vector.broadcast %97 : vector<1x36xf32> to vector<9x36xf32>
    %99 = arith.mulf %58, %98 : vector<9x36xf32>
    %100 = arith.addf %52, %99 : vector<9x36xf32>
    %101 = vector.extract_strided_slice %80 {offsets = [0, 0], sizes = [1, 36], strides = [1, 1]} : vector<9x36xf32> to vector<1x36xf32>
    %102 = vector.extract_strided_slice %88 {offsets = [0, 0], sizes = [1, 36], strides = [1, 1]} : vector<9x36xf32> to vector<1x36xf32>
    %103 = vector.extract_strided_slice %96 {offsets = [0, 0], sizes = [1, 36], strides = [1, 1]} : vector<9x36xf32> to vector<1x36xf32>
    %104 = vector.extract_strided_slice %100 {offsets = [0, 0], sizes = [1, 36], strides = [1, 1]} : vector<9x36xf32> to vector<1x36xf32>
    %105 = vector.extract_strided_slice %80 {offsets = [1, 0], sizes = [1, 36], strides = [1, 1]} : vector<9x36xf32> to vector<1x36xf32>
    %106 = vector.extract_strided_slice %88 {offsets = [1, 0], sizes = [1, 36], strides = [1, 1]} : vector<9x36xf32> to vector<1x36xf32>
    %107 = vector.extract_strided_slice %96 {offsets = [1, 0], sizes = [1, 36], strides = [1, 1]} : vector<9x36xf32> to vector<1x36xf32>
    %108 = vector.extract_strided_slice %100 {offsets = [1, 0], sizes = [1, 36], strides = [1, 1]} : vector<9x36xf32> to vector<1x36xf32>
    %109 = vector.extract_strided_slice %80 {offsets = [2, 0], sizes = [1, 36], strides = [1, 1]} : vector<9x36xf32> to vector<1x36xf32>
    %110 = vector.extract_strided_slice %88 {offsets = [2, 0], sizes = [1, 36], strides = [1, 1]} : vector<9x36xf32> to vector<1x36xf32>
    %111 = vector.extract_strided_slice %96 {offsets = [2, 0], sizes = [1, 36], strides = [1, 1]} : vector<9x36xf32> to vector<1x36xf32>
    %112 = vector.extract_strided_slice %100 {offsets = [2, 0], sizes = [1, 36], strides = [1, 1]} : vector<9x36xf32> to vector<1x36xf32>
    %113 = vector.extract_strided_slice %80 {offsets = [3, 0], sizes = [1, 36], strides = [1, 1]} : vector<9x36xf32> to vector<1x36xf32>
    %114 = vector.extract_strided_slice %88 {offsets = [3, 0], sizes = [1, 36], strides = [1, 1]} : vector<9x36xf32> to vector<1x36xf32>
    %115 = vector.extract_strided_slice %96 {offsets = [3, 0], sizes = [1, 36], strides = [1, 1]} : vector<9x36xf32> to vector<1x36xf32>
    %116 = vector.extract_strided_slice %100 {offsets = [3, 0], sizes = [1, 36], strides = [1, 1]} : vector<9x36xf32> to vector<1x36xf32>
    %117 = vector.extract_strided_slice %80 {offsets = [4, 0], sizes = [1, 36], strides = [1, 1]} : vector<9x36xf32> to vector<1x36xf32>
    %118 = vector.extract_strided_slice %88 {offsets = [4, 0], sizes = [1, 36], strides = [1, 1]} : vector<9x36xf32> to vector<1x36xf32>
    %119 = tpu.concatenate %101, %103, %105, %107, %109, %111, %113, %115, %117 in 0 : vector<1x36xf32>, vector<1x36xf32>, vector<1x36xf32>, vector<1x36xf32>, vector<1x36xf32>, vector<1x36xf32>, vector<1x36xf32>, vector<1x36xf32>, vector<1x36xf32> -> vector<9x36xf32>
    %120 = tpu.concatenate %102, %104, %106, %108, %110, %112, %114, %116, %118 in 0 : vector<1x36xf32>, vector<1x36xf32>, vector<1x36xf32>, vector<1x36xf32>, vector<1x36xf32>, vector<1x36xf32>, vector<1x36xf32>, vector<1x36xf32>, vector<1x36xf32> -> vector<9x36xf32>
    %121 = vector.extract_strided_slice %119 {offsets = [0, 0], sizes = [9, 1], strides = [1, 1]} : vector<9x36xf32> to vector<9x1xf32>
    %122 = vector.extract_strided_slice %120 {offsets = [0, 0], sizes = [9, 1], strides = [1, 1]} : vector<9x36xf32> to vector<9x1xf32>
    %123 = vector.extract_strided_slice %119 {offsets = [0, 1], sizes = [9, 1], strides = [1, 1]} : vector<9x36xf32> to vector<9x1xf32>
    %124 = vector.extract_strided_slice %120 {offsets = [0, 1], sizes = [9, 1], strides = [1, 1]} : vector<9x36xf32> to vector<9x1xf32>
    %125 = vector.extract_strided_slice %119 {offsets = [0, 2], sizes = [9, 1], strides = [1, 1]} : vector<9x36xf32> to vector<9x1xf32>
    %126 = vector.extract_strided_slice %120 {offsets = [0, 2], sizes = [9, 1], strides = [1, 1]} : vector<9x36xf32> to vector<9x1xf32>
    %127 = vector.extract_strided_slice %119 {offsets = [0, 3], sizes = [9, 1], strides = [1, 1]} : vector<9x36xf32> to vector<9x1xf32>
    %128 = vector.extract_strided_slice %120 {offsets = [0, 3], sizes = [9, 1], strides = [1, 1]} : vector<9x36xf32> to vector<9x1xf32>
    %129 = vector.extract_strided_slice %119 {offsets = [0, 4], sizes = [9, 1], strides = [1, 1]} : vector<9x36xf32> to vector<9x1xf32>
    %130 = tpu.concatenate %121, %122, %123, %124, %125, %126, %127, %128, %129 in 1 : vector<9x1xf32>, vector<9x1xf32>, vector<9x1xf32>, vector<9x1xf32>, vector<9x1xf32>, vector<9x1xf32>, vector<9x1xf32>, vector<9x1xf32>, vector<9x1xf32> -> vector<9x9xf32>
    %131 = vector.extract_strided_slice %119 {offsets = [0, 9], sizes = [9, 1], strides = [1, 1]} : vector<9x36xf32> to vector<9x1xf32>
    %132 = vector.extract_strided_slice %120 {offsets = [0, 9], sizes = [9, 1], strides = [1, 1]} : vector<9x36xf32> to vector<9x1xf32>
    %133 = vector.extract_strided_slice %119 {offsets = [0, 10], sizes = [9, 1], strides = [1, 1]} : vector<9x36xf32> to vector<9x1xf32>
    %134 = vector.extract_strided_slice %120 {offsets = [0, 10], sizes = [9, 1], strides = [1, 1]} : vector<9x36xf32> to vector<9x1xf32>
    %135 = vector.extract_strided_slice %119 {offsets = [0, 11], sizes = [9, 1], strides = [1, 1]} : vector<9x36xf32> to vector<9x1xf32>
    %136 = vector.extract_strided_slice %120 {offsets = [0, 11], sizes = [9, 1], strides = [1, 1]} : vector<9x36xf32> to vector<9x1xf32>
    %137 = vector.extract_strided_slice %119 {offsets = [0, 12], sizes = [9, 1], strides = [1, 1]} : vector<9x36xf32> to vector<9x1xf32>
    %138 = vector.extract_strided_slice %120 {offsets = [0, 12], sizes = [9, 1], strides = [1, 1]} : vector<9x36xf32> to vector<9x1xf32>
    %139 = vector.extract_strided_slice %119 {offsets = [0, 13], sizes = [9, 1], strides = [1, 1]} : vector<9x36xf32> to vector<9x1xf32>
    %140 = tpu.concatenate %131, %132, %133, %134, %135, %136, %137, %138, %139 in 1 : vector<9x1xf32>, vector<9x1xf32>, vector<9x1xf32>, vector<9x1xf32>, vector<9x1xf32>, vector<9x1xf32>, vector<9x1xf32>, vector<9x1xf32>, vector<9x1xf32> -> vector<9x9xf32>
    %141 = vector.extract_strided_slice %119 {offsets = [0, 18], sizes = [9, 1], strides = [1, 1]} : vector<9x36xf32> to vector<9x1xf32>
    %142 = vector.extract_strided_slice %120 {offsets = [0, 18], sizes = [9, 1], strides = [1, 1]} : vector<9x36xf32> to vector<9x1xf32>
    %143 = vector.extract_strided_slice %119 {offsets = [0, 19], sizes = [9, 1], strides = [1, 1]} : vector<9x36xf32> to vector<9x1xf32>
    %144 = vector.extract_strided_slice %120 {offsets = [0, 19], sizes = [9, 1], strides = [1, 1]} : vector<9x36xf32> to vector<9x1xf32>
    %145 = vector.extract_strided_slice %119 {offsets = [0, 20], sizes = [9, 1], strides = [1, 1]} : vector<9x36xf32> to vector<9x1xf32>
    %146 = vector.extract_strided_slice %120 {offsets = [0, 20], sizes = [9, 1], strides = [1, 1]} : vector<9x36xf32> to vector<9x1xf32>
    %147 = vector.extract_strided_slice %119 {offsets = [0, 21], sizes = [9, 1], strides = [1, 1]} : vector<9x36xf32> to vector<9x1xf32>
    %148 = vector.extract_strided_slice %120 {offsets = [0, 21], sizes = [9, 1], strides = [1, 1]} : vector<9x36xf32> to vector<9x1xf32>
    %149 = vector.extract_strided_slice %119 {offsets = [0, 22], sizes = [9, 1], strides = [1, 1]} : vector<9x36xf32> to vector<9x1xf32>
    %150 = tpu.concatenate %141, %142, %143, %144, %145, %146, %147, %148, %149 in 1 : vector<9x1xf32>, vector<9x1xf32>, vector<9x1xf32>, vector<9x1xf32>, vector<9x1xf32>, vector<9x1xf32>, vector<9x1xf32>, vector<9x1xf32>, vector<9x1xf32> -> vector<9x9xf32>
    %151 = vector.extract_strided_slice %119 {offsets = [0, 27], sizes = [9, 1], strides = [1, 1]} : vector<9x36xf32> to vector<9x1xf32>
    %152 = vector.extract_strided_slice %120 {offsets = [0, 27], sizes = [9, 1], strides = [1, 1]} : vector<9x36xf32> to vector<9x1xf32>
    %153 = vector.extract_strided_slice %119 {offsets = [0, 28], sizes = [9, 1], strides = [1, 1]} : vector<9x36xf32> to vector<9x1xf32>
    %154 = vector.extract_strided_slice %120 {offsets = [0, 28], sizes = [9, 1], strides = [1, 1]} : vector<9x36xf32> to vector<9x1xf32>
    %155 = vector.extract_strided_slice %119 {offsets = [0, 29], sizes = [9, 1], strides = [1, 1]} : vector<9x36xf32> to vector<9x1xf32>
    %156 = vector.extract_strided_slice %120 {offsets = [0, 29], sizes = [9, 1], strides = [1, 1]} : vector<9x36xf32> to vector<9x1xf32>
    %157 = vector.extract_strided_slice %119 {offsets = [0, 30], sizes = [9, 1], strides = [1, 1]} : vector<9x36xf32> to vector<9x1xf32>
    %158 = vector.extract_strided_slice %120 {offsets = [0, 30], sizes = [9, 1], strides = [1, 1]} : vector<9x36xf32> to vector<9x1xf32>
    %159 = vector.extract_strided_slice %119 {offsets = [0, 31], sizes = [9, 1], strides = [1, 1]} : vector<9x36xf32> to vector<9x1xf32>
    %160 = tpu.concatenate %151, %152, %153, %154, %155, %156, %157, %158, %159 in 1 : vector<9x1xf32>, vector<9x1xf32>, vector<9x1xf32>, vector<9x1xf32>, vector<9x1xf32>, vector<9x1xf32>, vector<9x1xf32>, vector<9x1xf32>, vector<9x1xf32> -> vector<9x9xf32>
    %cst_29 = arith.constant 5.000000e-01 : f32
    %161 = vector.broadcast %cst_29 : f32 to vector<9x36xf32>
    %162 = arith.mulf %80, %161 : vector<9x36xf32>
    %cst_30 = arith.constant 1.000000e+00 : f32
    %163 = vector.broadcast %cst_30 : f32 to vector<9x36xf32>
    %164 = arith.addf %162, %163 : vector<9x36xf32>
    %cst_31 = arith.constant 5.000000e-01 : f32
    %165 = vector.broadcast %cst_31 : f32 to vector<9x36xf32>
    %166 = arith.mulf %88, %165 : vector<9x36xf32>
    %cst_32 = arith.constant 1.000000e+00 : f32
    %167 = vector.broadcast %cst_32 : f32 to vector<9x36xf32>
    %168 = arith.addf %166, %167 : vector<9x36xf32>
    %cst_33 = arith.constant 5.000000e-01 : f32
    %169 = vector.broadcast %cst_33 : f32 to vector<9x36xf32>
    %170 = arith.mulf %96, %169 : vector<9x36xf32>
    %cst_34 = arith.constant 1.000000e+00 : f32
    %171 = vector.broadcast %cst_34 : f32 to vector<9x36xf32>
    %172 = arith.addf %170, %171 : vector<9x36xf32>
    %cst_35 = arith.constant 5.000000e-01 : f32
    %173 = vector.broadcast %cst_35 : f32 to vector<9x36xf32>
    %174 = arith.mulf %100, %173 : vector<9x36xf32>
    %cst_36 = arith.constant 1.000000e+00 : f32
    %175 = vector.broadcast %cst_36 : f32 to vector<9x36xf32>
    %176 = arith.addf %174, %175 : vector<9x36xf32>
    %c0_37 = arith.constant 0 : index
    %c0_38 = arith.constant 0 : index
    %177 = vector.load %arg4[%c0_37, %c0_38] : memref<1x36xf32, #tpu.memory_space<vmem>>, vector<1x36xf32>
    %178 = vector.shape_cast %177 : vector<1x36xf32> to vector<1x36xf32>
    %179 = vector.broadcast %178 : vector<1x36xf32> to vector<9x36xf32>
    %cst_39 = arith.constant 0.000000e+00 : f32
    %180 = vector.broadcast %cst_39 : f32 to vector<1x10xf32>
    %cst_40 = arith.constant 0.000000e+00 : f32
    %181 = vector.broadcast %cst_40 : f32 to vector<9x1xf32>
    %182 = tpu.concatenate %130, %181 in 1 : vector<9x9xf32>, vector<9x1xf32> -> vector<9x10xf32>
    %183 = tpu.concatenate %182, %180 in 0 : vector<9x10xf32>, vector<1x10xf32> -> vector<10x10xf32>
    %184 = vector.extract_strided_slice %183 {offsets = [0, 0], sizes = [9, 9], strides = [1, 1]} : vector<10x10xf32> to vector<9x9xf32>
    %185 = tpu.concatenate %184, %184, %184, %184 in 1 : vector<9x9xf32>, vector<9x9xf32>, vector<9x9xf32>, vector<9x9xf32> -> vector<9x36xf32>
    %186 = vector.extract_strided_slice %183 {offsets = [0, 1], sizes = [9, 9], strides = [1, 1]} : vector<10x10xf32> to vector<9x9xf32>
    %187 = tpu.concatenate %186, %186, %186, %186 in 1 : vector<9x9xf32>, vector<9x9xf32>, vector<9x9xf32>, vector<9x9xf32> -> vector<9x36xf32>
    %188 = vector.extract_strided_slice %183 {offsets = [1, 0], sizes = [9, 9], strides = [1, 1]} : vector<10x10xf32> to vector<9x9xf32>
    %189 = tpu.concatenate %188, %188, %188, %188 in 1 : vector<9x9xf32>, vector<9x9xf32>, vector<9x9xf32>, vector<9x9xf32> -> vector<9x36xf32>
    %190 = vector.extract_strided_slice %183 {offsets = [1, 1], sizes = [9, 9], strides = [1, 1]} : vector<10x10xf32> to vector<9x9xf32>
    %191 = tpu.concatenate %190, %190, %190, %190 in 1 : vector<9x9xf32>, vector<9x9xf32>, vector<9x9xf32>, vector<9x9xf32> -> vector<9x36xf32>
    %c3_41 = arith.constant 3 : index
    %c0_42 = arith.constant 0 : index
    %192 = vector.load %arg3[%c3_41, %c0_42] : memref<16x36xf32, #tpu.memory_space<vmem>>, vector<1x36xf32>
    %193 = vector.broadcast %192 : vector<1x36xf32> to vector<9x36xf32>
    %194 = arith.mulf %185, %193 : vector<9x36xf32>
    %195 = arith.addf %179, %194 : vector<9x36xf32>
    %c2_43 = arith.constant 2 : index
    %c0_44 = arith.constant 0 : index
    %196 = vector.load %arg3[%c2_43, %c0_44] : memref<16x36xf32, #tpu.memory_space<vmem>>, vector<1x36xf32>
    %197 = vector.broadcast %196 : vector<1x36xf32> to vector<9x36xf32>
    %198 = arith.mulf %187, %197 : vector<9x36xf32>
    %199 = arith.addf %179, %198 : vector<9x36xf32>
    %c1_45 = arith.constant 1 : index
    %c0_46 = arith.constant 0 : index
    %200 = vector.load %arg3[%c1_45, %c0_46] : memref<16x36xf32, #tpu.memory_space<vmem>>, vector<1x36xf32>
    %201 = vector.broadcast %200 : vector<1x36xf32> to vector<9x36xf32>
    %202 = arith.mulf %189, %201 : vector<9x36xf32>
    %203 = arith.addf %179, %202 : vector<9x36xf32>
    %c0_47 = arith.constant 0 : index
    %c0_48 = arith.constant 0 : index
    %204 = vector.load %arg3[%c0_47, %c0_48] : memref<16x36xf32, #tpu.memory_space<vmem>>, vector<1x36xf32>
    %205 = vector.broadcast %204 : vector<1x36xf32> to vector<9x36xf32>
    %206 = arith.mulf %191, %205 : vector<9x36xf32>
    %207 = arith.addf %179, %206 : vector<9x36xf32>
    %208 = tpu.concatenate %140, %181 in 1 : vector<9x9xf32>, vector<9x1xf32> -> vector<9x10xf32>
    %209 = tpu.concatenate %208, %180 in 0 : vector<9x10xf32>, vector<1x10xf32> -> vector<10x10xf32>
    %210 = vector.extract_strided_slice %209 {offsets = [0, 0], sizes = [9, 9], strides = [1, 1]} : vector<10x10xf32> to vector<9x9xf32>
    %211 = tpu.concatenate %210, %210, %210, %210 in 1 : vector<9x9xf32>, vector<9x9xf32>, vector<9x9xf32>, vector<9x9xf32> -> vector<9x36xf32>
    %212 = vector.extract_strided_slice %209 {offsets = [0, 1], sizes = [9, 9], strides = [1, 1]} : vector<10x10xf32> to vector<9x9xf32>
    %213 = tpu.concatenate %212, %212, %212, %212 in 1 : vector<9x9xf32>, vector<9x9xf32>, vector<9x9xf32>, vector<9x9xf32> -> vector<9x36xf32>
    %214 = vector.extract_strided_slice %209 {offsets = [1, 0], sizes = [9, 9], strides = [1, 1]} : vector<10x10xf32> to vector<9x9xf32>
    %215 = tpu.concatenate %214, %214, %214, %214 in 1 : vector<9x9xf32>, vector<9x9xf32>, vector<9x9xf32>, vector<9x9xf32> -> vector<9x36xf32>
    %216 = vector.extract_strided_slice %209 {offsets = [1, 1], sizes = [9, 9], strides = [1, 1]} : vector<10x10xf32> to vector<9x9xf32>
    %217 = tpu.concatenate %216, %216, %216, %216 in 1 : vector<9x9xf32>, vector<9x9xf32>, vector<9x9xf32>, vector<9x9xf32> -> vector<9x36xf32>
    %c7_49 = arith.constant 7 : index
    %c0_50 = arith.constant 0 : index
    %218 = vector.load %arg3[%c7_49, %c0_50] : memref<16x36xf32, #tpu.memory_space<vmem>>, vector<1x36xf32>
    %219 = vector.broadcast %218 : vector<1x36xf32> to vector<9x36xf32>
    %220 = arith.mulf %211, %219 : vector<9x36xf32>
    %221 = arith.addf %195, %220 : vector<9x36xf32>
    %c6_51 = arith.constant 6 : index
    %c0_52 = arith.constant 0 : index
    %222 = vector.load %arg3[%c6_51, %c0_52] : memref<16x36xf32, #tpu.memory_space<vmem>>, vector<1x36xf32>
    %223 = vector.broadcast %222 : vector<1x36xf32> to vector<9x36xf32>
    %224 = arith.mulf %213, %223 : vector<9x36xf32>
    %225 = arith.addf %199, %224 : vector<9x36xf32>
    %c5_53 = arith.constant 5 : index
    %c0_54 = arith.constant 0 : index
    %226 = vector.load %arg3[%c5_53, %c0_54] : memref<16x36xf32, #tpu.memory_space<vmem>>, vector<1x36xf32>
    %227 = vector.broadcast %226 : vector<1x36xf32> to vector<9x36xf32>
    %228 = arith.mulf %215, %227 : vector<9x36xf32>
    %229 = arith.addf %203, %228 : vector<9x36xf32>
    %c4_55 = arith.constant 4 : index
    %c0_56 = arith.constant 0 : index
    %230 = vector.load %arg3[%c4_55, %c0_56] : memref<16x36xf32, #tpu.memory_space<vmem>>, vector<1x36xf32>
    %231 = vector.broadcast %230 : vector<1x36xf32> to vector<9x36xf32>
    %232 = arith.mulf %217, %231 : vector<9x36xf32>
    %233 = arith.addf %207, %232 : vector<9x36xf32>
    %234 = tpu.concatenate %150, %181 in 1 : vector<9x9xf32>, vector<9x1xf32> -> vector<9x10xf32>
    %235 = tpu.concatenate %234, %180 in 0 : vector<9x10xf32>, vector<1x10xf32> -> vector<10x10xf32>
    %236 = vector.extract_strided_slice %235 {offsets = [0, 0], sizes = [9, 9], strides = [1, 1]} : vector<10x10xf32> to vector<9x9xf32>
    %237 = tpu.concatenate %236, %236, %236, %236 in 1 : vector<9x9xf32>, vector<9x9xf32>, vector<9x9xf32>, vector<9x9xf32> -> vector<9x36xf32>
    %238 = vector.extract_strided_slice %235 {offsets = [0, 1], sizes = [9, 9], strides = [1, 1]} : vector<10x10xf32> to vector<9x9xf32>
    %239 = tpu.concatenate %238, %238, %238, %238 in 1 : vector<9x9xf32>, vector<9x9xf32>, vector<9x9xf32>, vector<9x9xf32> -> vector<9x36xf32>
    %240 = vector.extract_strided_slice %235 {offsets = [1, 0], sizes = [9, 9], strides = [1, 1]} : vector<10x10xf32> to vector<9x9xf32>
    %241 = tpu.concatenate %240, %240, %240, %240 in 1 : vector<9x9xf32>, vector<9x9xf32>, vector<9x9xf32>, vector<9x9xf32> -> vector<9x36xf32>
    %242 = vector.extract_strided_slice %235 {offsets = [1, 1], sizes = [9, 9], strides = [1, 1]} : vector<10x10xf32> to vector<9x9xf32>
    %243 = tpu.concatenate %242, %242, %242, %242 in 1 : vector<9x9xf32>, vector<9x9xf32>, vector<9x9xf32>, vector<9x9xf32> -> vector<9x36xf32>
    %c11_57 = arith.constant 11 : index
    %c0_58 = arith.constant 0 : index
    %244 = vector.load %arg3[%c11_57, %c0_58] : memref<16x36xf32, #tpu.memory_space<vmem>>, vector<1x36xf32>
    %245 = vector.broadcast %244 : vector<1x36xf32> to vector<9x36xf32>
    %246 = arith.mulf %237, %245 : vector<9x36xf32>
    %247 = arith.addf %221, %246 : vector<9x36xf32>
    %c10_59 = arith.constant 10 : index
    %c0_60 = arith.constant 0 : index
    %248 = vector.load %arg3[%c10_59, %c0_60] : memref<16x36xf32, #tpu.memory_space<vmem>>, vector<1x36xf32>
    %249 = vector.broadcast %248 : vector<1x36xf32> to vector<9x36xf32>
    %250 = arith.mulf %239, %249 : vector<9x36xf32>
    %251 = arith.addf %225, %250 : vector<9x36xf32>
    %c9_61 = arith.constant 9 : index
    %c0_62 = arith.constant 0 : index
    %252 = vector.load %arg3[%c9_61, %c0_62] : memref<16x36xf32, #tpu.memory_space<vmem>>, vector<1x36xf32>
    %253 = vector.broadcast %252 : vector<1x36xf32> to vector<9x36xf32>
    %254 = arith.mulf %241, %253 : vector<9x36xf32>
    %255 = arith.addf %229, %254 : vector<9x36xf32>
    %c8_63 = arith.constant 8 : index
    %c0_64 = arith.constant 0 : index
    %256 = vector.load %arg3[%c8_63, %c0_64] : memref<16x36xf32, #tpu.memory_space<vmem>>, vector<1x36xf32>
    %257 = vector.broadcast %256 : vector<1x36xf32> to vector<9x36xf32>
    %258 = arith.mulf %243, %257 : vector<9x36xf32>
    %259 = arith.addf %233, %258 : vector<9x36xf32>
    %260 = tpu.concatenate %160, %181 in 1 : vector<9x9xf32>, vector<9x1xf32> -> vector<9x10xf32>
    %261 = tpu.concatenate %260, %180 in 0 : vector<9x10xf32>, vector<1x10xf32> -> vector<10x10xf32>
    %262 = vector.extract_strided_slice %261 {offsets = [0, 0], sizes = [9, 9], strides = [1, 1]} : vector<10x10xf32> to vector<9x9xf32>
    %263 = tpu.concatenate %262, %262, %262, %262 in 1 : vector<9x9xf32>, vector<9x9xf32>, vector<9x9xf32>, vector<9x9xf32> -> vector<9x36xf32>
    %264 = vector.extract_strided_slice %261 {offsets = [0, 1], sizes = [9, 9], strides = [1, 1]} : vector<10x10xf32> to vector<9x9xf32>
    %265 = tpu.concatenate %264, %264, %264, %264 in 1 : vector<9x9xf32>, vector<9x9xf32>, vector<9x9xf32>, vector<9x9xf32> -> vector<9x36xf32>
    %266 = vector.extract_strided_slice %261 {offsets = [1, 0], sizes = [9, 9], strides = [1, 1]} : vector<10x10xf32> to vector<9x9xf32>
    %267 = tpu.concatenate %266, %266, %266, %266 in 1 : vector<9x9xf32>, vector<9x9xf32>, vector<9x9xf32>, vector<9x9xf32> -> vector<9x36xf32>
    %268 = vector.extract_strided_slice %261 {offsets = [1, 1], sizes = [9, 9], strides = [1, 1]} : vector<10x10xf32> to vector<9x9xf32>
    %269 = tpu.concatenate %268, %268, %268, %268 in 1 : vector<9x9xf32>, vector<9x9xf32>, vector<9x9xf32>, vector<9x9xf32> -> vector<9x36xf32>
    %c15_65 = arith.constant 15 : index
    %c0_66 = arith.constant 0 : index
    %270 = vector.load %arg3[%c15_65, %c0_66] : memref<16x36xf32, #tpu.memory_space<vmem>>, vector<1x36xf32>
    %271 = vector.broadcast %270 : vector<1x36xf32> to vector<9x36xf32>
    %272 = arith.mulf %263, %271 : vector<9x36xf32>
    %273 = arith.addf %247, %272 : vector<9x36xf32>
    %c14_67 = arith.constant 14 : index
    %c0_68 = arith.constant 0 : index
    %274 = vector.load %arg3[%c14_67, %c0_68] : memref<16x36xf32, #tpu.memory_space<vmem>>, vector<1x36xf32>
    %275 = vector.broadcast %274 : vector<1x36xf32> to vector<9x36xf32>
    %276 = arith.mulf %265, %275 : vector<9x36xf32>
    %277 = arith.addf %251, %276 : vector<9x36xf32>
    %c13_69 = arith.constant 13 : index
    %c0_70 = arith.constant 0 : index
    %278 = vector.load %arg3[%c13_69, %c0_70] : memref<16x36xf32, #tpu.memory_space<vmem>>, vector<1x36xf32>
    %279 = vector.broadcast %278 : vector<1x36xf32> to vector<9x36xf32>
    %280 = arith.mulf %267, %279 : vector<9x36xf32>
    %281 = arith.addf %255, %280 : vector<9x36xf32>
    %c12_71 = arith.constant 12 : index
    %c0_72 = arith.constant 0 : index
    %282 = vector.load %arg3[%c12_71, %c0_72] : memref<16x36xf32, #tpu.memory_space<vmem>>, vector<1x36xf32>
    %283 = vector.broadcast %282 : vector<1x36xf32> to vector<9x36xf32>
    %284 = arith.mulf %269, %283 : vector<9x36xf32>
    %285 = arith.addf %259, %284 : vector<9x36xf32>
    %286 = arith.mulf %273, %164 : vector<9x36xf32>
    %287 = arith.mulf %277, %168 : vector<9x36xf32>
    %288 = arith.mulf %281, %172 : vector<9x36xf32>
    %289 = arith.mulf %285, %176 : vector<9x36xf32>
    %290 = vector.extract_strided_slice %286 {offsets = [0, 0], sizes = [1, 36], strides = [1, 1]} : vector<9x36xf32> to vector<1x36xf32>
    %291 = vector.extract_strided_slice %287 {offsets = [0, 0], sizes = [1, 36], strides = [1, 1]} : vector<9x36xf32> to vector<1x36xf32>
    %292 = vector.extract_strided_slice %288 {offsets = [0, 0], sizes = [1, 36], strides = [1, 1]} : vector<9x36xf32> to vector<1x36xf32>
    %293 = vector.extract_strided_slice %289 {offsets = [0, 0], sizes = [1, 36], strides = [1, 1]} : vector<9x36xf32> to vector<1x36xf32>
    %294 = vector.extract_strided_slice %286 {offsets = [1, 0], sizes = [1, 36], strides = [1, 1]} : vector<9x36xf32> to vector<1x36xf32>
    %295 = vector.extract_strided_slice %287 {offsets = [1, 0], sizes = [1, 36], strides = [1, 1]} : vector<9x36xf32> to vector<1x36xf32>
    %296 = vector.extract_strided_slice %288 {offsets = [1, 0], sizes = [1, 36], strides = [1, 1]} : vector<9x36xf32> to vector<1x36xf32>
    %297 = vector.extract_strided_slice %289 {offsets = [1, 0], sizes = [1, 36], strides = [1, 1]} : vector<9x36xf32> to vector<1x36xf32>
    %298 = vector.extract_strided_slice %286 {offsets = [2, 0], sizes = [1, 36], strides = [1, 1]} : vector<9x36xf32> to vector<1x36xf32>
    %299 = vector.extract_strided_slice %287 {offsets = [2, 0], sizes = [1, 36], strides = [1, 1]} : vector<9x36xf32> to vector<1x36xf32>
    %300 = vector.extract_strided_slice %288 {offsets = [2, 0], sizes = [1, 36], strides = [1, 1]} : vector<9x36xf32> to vector<1x36xf32>
    %301 = vector.extract_strided_slice %289 {offsets = [2, 0], sizes = [1, 36], strides = [1, 1]} : vector<9x36xf32> to vector<1x36xf32>
    %302 = vector.extract_strided_slice %286 {offsets = [3, 0], sizes = [1, 36], strides = [1, 1]} : vector<9x36xf32> to vector<1x36xf32>
    %303 = vector.extract_strided_slice %287 {offsets = [3, 0], sizes = [1, 36], strides = [1, 1]} : vector<9x36xf32> to vector<1x36xf32>
    %304 = vector.extract_strided_slice %288 {offsets = [3, 0], sizes = [1, 36], strides = [1, 1]} : vector<9x36xf32> to vector<1x36xf32>
    %305 = vector.extract_strided_slice %289 {offsets = [3, 0], sizes = [1, 36], strides = [1, 1]} : vector<9x36xf32> to vector<1x36xf32>
    %306 = vector.extract_strided_slice %286 {offsets = [4, 0], sizes = [1, 36], strides = [1, 1]} : vector<9x36xf32> to vector<1x36xf32>
    %307 = vector.extract_strided_slice %287 {offsets = [4, 0], sizes = [1, 36], strides = [1, 1]} : vector<9x36xf32> to vector<1x36xf32>
    %308 = vector.extract_strided_slice %288 {offsets = [4, 0], sizes = [1, 36], strides = [1, 1]} : vector<9x36xf32> to vector<1x36xf32>
    %309 = vector.extract_strided_slice %289 {offsets = [4, 0], sizes = [1, 36], strides = [1, 1]} : vector<9x36xf32> to vector<1x36xf32>
    %310 = vector.extract_strided_slice %286 {offsets = [5, 0], sizes = [1, 36], strides = [1, 1]} : vector<9x36xf32> to vector<1x36xf32>
    %311 = vector.extract_strided_slice %287 {offsets = [5, 0], sizes = [1, 36], strides = [1, 1]} : vector<9x36xf32> to vector<1x36xf32>
    %312 = vector.extract_strided_slice %288 {offsets = [5, 0], sizes = [1, 36], strides = [1, 1]} : vector<9x36xf32> to vector<1x36xf32>
    %313 = vector.extract_strided_slice %289 {offsets = [5, 0], sizes = [1, 36], strides = [1, 1]} : vector<9x36xf32> to vector<1x36xf32>
    %314 = vector.extract_strided_slice %286 {offsets = [6, 0], sizes = [1, 36], strides = [1, 1]} : vector<9x36xf32> to vector<1x36xf32>
    %315 = vector.extract_strided_slice %287 {offsets = [6, 0], sizes = [1, 36], strides = [1, 1]} : vector<9x36xf32> to vector<1x36xf32>
    %316 = vector.extract_strided_slice %288 {offsets = [6, 0], sizes = [1, 36], strides = [1, 1]} : vector<9x36xf32> to vector<1x36xf32>
    %317 = vector.extract_strided_slice %289 {offsets = [6, 0], sizes = [1, 36], strides = [1, 1]} : vector<9x36xf32> to vector<1x36xf32>
    %318 = vector.extract_strided_slice %286 {offsets = [7, 0], sizes = [1, 36], strides = [1, 1]} : vector<9x36xf32> to vector<1x36xf32>
    %319 = vector.extract_strided_slice %287 {offsets = [7, 0], sizes = [1, 36], strides = [1, 1]} : vector<9x36xf32> to vector<1x36xf32>
    %320 = vector.extract_strided_slice %288 {offsets = [7, 0], sizes = [1, 36], strides = [1, 1]} : vector<9x36xf32> to vector<1x36xf32>
    %321 = vector.extract_strided_slice %289 {offsets = [7, 0], sizes = [1, 36], strides = [1, 1]} : vector<9x36xf32> to vector<1x36xf32>
    %322 = vector.extract_strided_slice %286 {offsets = [8, 0], sizes = [1, 36], strides = [1, 1]} : vector<9x36xf32> to vector<1x36xf32>
    %323 = vector.extract_strided_slice %287 {offsets = [8, 0], sizes = [1, 36], strides = [1, 1]} : vector<9x36xf32> to vector<1x36xf32>
    %324 = tpu.concatenate %290, %292, %294, %296, %298, %300, %302, %304, %306, %308, %310, %312, %314, %316, %318, %320 in 0 : vector<1x36xf32>, vector<1x36xf32>, vector<1x36xf32>, vector<1x36xf32>, vector<1x36xf32>, vector<1x36xf32>, vector<1x36xf32>, vector<1x36xf32>, vector<1x36xf32>, vector<1x36xf32>, vector<1x36xf32>, vector<1x36xf32>, vector<1x36xf32>, vector<1x36xf32>, vector<1x36xf32>, vector<1x36xf32> -> vector<16x36xf32>
    %325 = tpu.concatenate %324, %322 in 0 : vector<16x36xf32>, vector<1x36xf32> -> vector<17x36xf32>
    %326 = tpu.concatenate %291, %293, %295, %297, %299, %301, %303, %305, %307, %309, %311, %313, %315, %317, %319, %321 in 0 : vector<1x36xf32>, vector<1x36xf32>, vector<1x36xf32>, vector<1x36xf32>, vector<1x36xf32>, vector<1x36xf32>, vector<1x36xf32>, vector<1x36xf32>, vector<1x36xf32>, vector<1x36xf32>, vector<1x36xf32>, vector<1x36xf32>, vector<1x36xf32>, vector<1x36xf32>, vector<1x36xf32>, vector<1x36xf32> -> vector<16x36xf32>
    %327 = tpu.concatenate %326, %323 in 0 : vector<16x36xf32>, vector<1x36xf32> -> vector<17x36xf32>
    %328 = vector.extract_strided_slice %325 {offsets = [0, 0], sizes = [17, 1], strides = [1, 1]} : vector<17x36xf32> to vector<17x1xf32>
    %329 = vector.extract_strided_slice %327 {offsets = [0, 0], sizes = [17, 1], strides = [1, 1]} : vector<17x36xf32> to vector<17x1xf32>
    %330 = vector.extract_strided_slice %325 {offsets = [0, 1], sizes = [17, 1], strides = [1, 1]} : vector<17x36xf32> to vector<17x1xf32>
    %331 = vector.extract_strided_slice %327 {offsets = [0, 1], sizes = [17, 1], strides = [1, 1]} : vector<17x36xf32> to vector<17x1xf32>
    %332 = vector.extract_strided_slice %325 {offsets = [0, 2], sizes = [17, 1], strides = [1, 1]} : vector<17x36xf32> to vector<17x1xf32>
    %333 = vector.extract_strided_slice %327 {offsets = [0, 2], sizes = [17, 1], strides = [1, 1]} : vector<17x36xf32> to vector<17x1xf32>
    %334 = vector.extract_strided_slice %325 {offsets = [0, 3], sizes = [17, 1], strides = [1, 1]} : vector<17x36xf32> to vector<17x1xf32>
    %335 = vector.extract_strided_slice %327 {offsets = [0, 3], sizes = [17, 1], strides = [1, 1]} : vector<17x36xf32> to vector<17x1xf32>
    %336 = vector.extract_strided_slice %325 {offsets = [0, 4], sizes = [17, 1], strides = [1, 1]} : vector<17x36xf32> to vector<17x1xf32>
    %337 = vector.extract_strided_slice %327 {offsets = [0, 4], sizes = [17, 1], strides = [1, 1]} : vector<17x36xf32> to vector<17x1xf32>
    %338 = vector.extract_strided_slice %325 {offsets = [0, 5], sizes = [17, 1], strides = [1, 1]} : vector<17x36xf32> to vector<17x1xf32>
    %339 = vector.extract_strided_slice %327 {offsets = [0, 5], sizes = [17, 1], strides = [1, 1]} : vector<17x36xf32> to vector<17x1xf32>
    %340 = vector.extract_strided_slice %325 {offsets = [0, 6], sizes = [17, 1], strides = [1, 1]} : vector<17x36xf32> to vector<17x1xf32>
    %341 = vector.extract_strided_slice %327 {offsets = [0, 6], sizes = [17, 1], strides = [1, 1]} : vector<17x36xf32> to vector<17x1xf32>
    %342 = vector.extract_strided_slice %325 {offsets = [0, 7], sizes = [17, 1], strides = [1, 1]} : vector<17x36xf32> to vector<17x1xf32>
    %343 = vector.extract_strided_slice %327 {offsets = [0, 7], sizes = [17, 1], strides = [1, 1]} : vector<17x36xf32> to vector<17x1xf32>
    %344 = vector.extract_strided_slice %325 {offsets = [0, 8], sizes = [17, 1], strides = [1, 1]} : vector<17x36xf32> to vector<17x1xf32>
    %345 = tpu.concatenate %328, %329, %330, %331, %332, %333, %334, %335, %336, %337, %338, %339, %340, %341, %342, %343 in 1 : vector<17x1xf32>, vector<17x1xf32>, vector<17x1xf32>, vector<17x1xf32>, vector<17x1xf32>, vector<17x1xf32>, vector<17x1xf32>, vector<17x1xf32>, vector<17x1xf32>, vector<17x1xf32>, vector<17x1xf32>, vector<17x1xf32>, vector<17x1xf32>, vector<17x1xf32>, vector<17x1xf32>, vector<17x1xf32> -> vector<17x16xf32>
    %346 = tpu.concatenate %345, %344 in 1 : vector<17x16xf32>, vector<17x1xf32> -> vector<17x17xf32>
    %c0_73 = arith.constant 0 : index
    %c0_74 = arith.constant 0 : index
    %c0_75 = arith.constant 0 : index
    %347 = vector.load %arg5[%c0_73, %c0_74, %c0_75] : memref<4x17x17xf32, #tpu.memory_space<vmem>>, vector<1x17x17xf32>
    %348 = vector.shape_cast %347 : vector<1x17x17xf32> to vector<17x17xf32>
    %349 = vector.shape_cast %346 : vector<17x17xf32> to vector<1x17x17xf32>
    tpu.vector_store %arg5[%c0_73, %c0_74, %c0_75], %349 {strides = array<i32>} : memref<4x17x17xf32, #tpu.memory_space<vmem>>, vector<1x17x17xf32>,
    %350 = vector.extract_strided_slice %325 {offsets = [0, 9], sizes = [17, 1], strides = [1, 1]} : vector<17x36xf32> to vector<17x1xf32>
    %351 = vector.extract_strided_slice %327 {offsets = [0, 9], sizes = [17, 1], strides = [1, 1]} : vector<17x36xf32> to vector<17x1xf32>
    %352 = vector.extract_strided_slice %325 {offsets = [0, 10], sizes = [17, 1], strides = [1, 1]} : vector<17x36xf32> to vector<17x1xf32>
    %353 = vector.extract_strided_slice %327 {offsets = [0, 10], sizes = [17, 1], strides = [1, 1]} : vector<17x36xf32> to vector<17x1xf32>
    %354 = vector.extract_strided_slice %325 {offsets = [0, 11], sizes = [17, 1], strides = [1, 1]} : vector<17x36xf32> to vector<17x1xf32>
    %355 = vector.extract_strided_slice %327 {offsets = [0, 11], sizes = [17, 1], strides = [1, 1]} : vector<17x36xf32> to vector<17x1xf32>
    %356 = vector.extract_strided_slice %325 {offsets = [0, 12], sizes = [17, 1], strides = [1, 1]} : vector<17x36xf32> to vector<17x1xf32>
    %357 = vector.extract_strided_slice %327 {offsets = [0, 12], sizes = [17, 1], strides = [1, 1]} : vector<17x36xf32> to vector<17x1xf32>
    %358 = vector.extract_strided_slice %325 {offsets = [0, 13], sizes = [17, 1], strides = [1, 1]} : vector<17x36xf32> to vector<17x1xf32>
    %359 = vector.extract_strided_slice %327 {offsets = [0, 13], sizes = [17, 1], strides = [1, 1]} : vector<17x36xf32> to vector<17x1xf32>
    %360 = vector.extract_strided_slice %325 {offsets = [0, 14], sizes = [17, 1], strides = [1, 1]} : vector<17x36xf32> to vector<17x1xf32>
    %361 = vector.extract_strided_slice %327 {offsets = [0, 14], sizes = [17, 1], strides = [1, 1]} : vector<17x36xf32> to vector<17x1xf32>
    %362 = vector.extract_strided_slice %325 {offsets = [0, 15], sizes = [17, 1], strides = [1, 1]} : vector<17x36xf32> to vector<17x1xf32>
    %363 = vector.extract_strided_slice %327 {offsets = [0, 15], sizes = [17, 1], strides = [1, 1]} : vector<17x36xf32> to vector<17x1xf32>
    %364 = vector.extract_strided_slice %325 {offsets = [0, 16], sizes = [17, 1], strides = [1, 1]} : vector<17x36xf32> to vector<17x1xf32>
    %365 = vector.extract_strided_slice %327 {offsets = [0, 16], sizes = [17, 1], strides = [1, 1]} : vector<17x36xf32> to vector<17x1xf32>
    %366 = vector.extract_strided_slice %325 {offsets = [0, 17], sizes = [17, 1], strides = [1, 1]} : vector<17x36xf32> to vector<17x1xf32>
    %367 = tpu.concatenate %350, %351, %352, %353, %354, %355, %356, %357, %358, %359, %360, %361, %362, %363, %364, %365 in 1 : vector<17x1xf32>, vector<17x1xf32>, vector<17x1xf32>, vector<17x1xf32>, vector<17x1xf32>, vector<17x1xf32>, vector<17x1xf32>, vector<17x1xf32>, vector<17x1xf32>, vector<17x1xf32>, vector<17x1xf32>, vector<17x1xf32>, vector<17x1xf32>, vector<17x1xf32>, vector<17x1xf32>, vector<17x1xf32> -> vector<17x16xf32>
    %368 = tpu.concatenate %367, %366 in 1 : vector<17x16xf32>, vector<17x1xf32> -> vector<17x17xf32>
    %c1_76 = arith.constant 1 : index
    %c0_77 = arith.constant 0 : index
    %c0_78 = arith.constant 0 : index
    %369 = vector.load %arg5[%c1_76, %c0_77, %c0_78] : memref<4x17x17xf32, #tpu.memory_space<vmem>>, vector<1x17x17xf32>
    %370 = vector.shape_cast %369 : vector<1x17x17xf32> to vector<17x17xf32>
    %371 = vector.shape_cast %368 : vector<17x17xf32> to vector<1x17x17xf32>
    tpu.vector_store %arg5[%c1_76, %c0_77, %c0_78], %371 {strides = array<i32>} : memref<4x17x17xf32, #tpu.memory_space<vmem>>, vector<1x17x17xf32>,
    %372 = vector.extract_strided_slice %325 {offsets = [0, 18], sizes = [17, 1], strides = [1, 1]} : vector<17x36xf32> to vector<17x1xf32>
    %373 = vector.extract_strided_slice %327 {offsets = [0, 18], sizes = [17, 1], strides = [1, 1]} : vector<17x36xf32> to vector<17x1xf32>
    %374 = vector.extract_strided_slice %325 {offsets = [0, 19], sizes = [17, 1], strides = [1, 1]} : vector<17x36xf32> to vector<17x1xf32>
    %375 = vector.extract_strided_slice %327 {offsets = [0, 19], sizes = [17, 1], strides = [1, 1]} : vector<17x36xf32> to vector<17x1xf32>
    %376 = vector.extract_strided_slice %325 {offsets = [0, 20], sizes = [17, 1], strides = [1, 1]} : vector<17x36xf32> to vector<17x1xf32>
    %377 = vector.extract_strided_slice %327 {offsets = [0, 20], sizes = [17, 1], strides = [1, 1]} : vector<17x36xf32> to vector<17x1xf32>
    %378 = vector.extract_strided_slice %325 {offsets = [0, 21], sizes = [17, 1], strides = [1, 1]} : vector<17x36xf32> to vector<17x1xf32>
    %379 = vector.extract_strided_slice %327 {offsets = [0, 21], sizes = [17, 1], strides = [1, 1]} : vector<17x36xf32> to vector<17x1xf32>
    %380 = vector.extract_strided_slice %325 {offsets = [0, 22], sizes = [17, 1], strides = [1, 1]} : vector<17x36xf32> to vector<17x1xf32>
    %381 = vector.extract_strided_slice %327 {offsets = [0, 22], sizes = [17, 1], strides = [1, 1]} : vector<17x36xf32> to vector<17x1xf32>
    %382 = vector.extract_strided_slice %325 {offsets = [0, 23], sizes = [17, 1], strides = [1, 1]} : vector<17x36xf32> to vector<17x1xf32>
    %383 = vector.extract_strided_slice %327 {offsets = [0, 23], sizes = [17, 1], strides = [1, 1]} : vector<17x36xf32> to vector<17x1xf32>
    %384 = vector.extract_strided_slice %325 {offsets = [0, 24], sizes = [17, 1], strides = [1, 1]} : vector<17x36xf32> to vector<17x1xf32>
    %385 = vector.extract_strided_slice %327 {offsets = [0, 24], sizes = [17, 1], strides = [1, 1]} : vector<17x36xf32> to vector<17x1xf32>
    %386 = vector.extract_strided_slice %325 {offsets = [0, 25], sizes = [17, 1], strides = [1, 1]} : vector<17x36xf32> to vector<17x1xf32>
    %387 = vector.extract_strided_slice %327 {offsets = [0, 25], sizes = [17, 1], strides = [1, 1]} : vector<17x36xf32> to vector<17x1xf32>
    %388 = vector.extract_strided_slice %325 {offsets = [0, 26], sizes = [17, 1], strides = [1, 1]} : vector<17x36xf32> to vector<17x1xf32>
    %389 = tpu.concatenate %372, %373, %374, %375, %376, %377, %378, %379, %380, %381, %382, %383, %384, %385, %386, %387 in 1 : vector<17x1xf32>, vector<17x1xf32>, vector<17x1xf32>, vector<17x1xf32>, vector<17x1xf32>, vector<17x1xf32>, vector<17x1xf32>, vector<17x1xf32>, vector<17x1xf32>, vector<17x1xf32>, vector<17x1xf32>, vector<17x1xf32>, vector<17x1xf32>, vector<17x1xf32>, vector<17x1xf32>, vector<17x1xf32> -> vector<17x16xf32>
    %390 = tpu.concatenate %389, %388 in 1 : vector<17x16xf32>, vector<17x1xf32> -> vector<17x17xf32>
    %c2_79 = arith.constant 2 : index
    %c0_80 = arith.constant 0 : index
    %c0_81 = arith.constant 0 : index
    %391 = vector.load %arg5[%c2_79, %c0_80, %c0_81] : memref<4x17x17xf32, #tpu.memory_space<vmem>>, vector<1x17x17xf32>
    %392 = vector.shape_cast %391 : vector<1x17x17xf32> to vector<17x17xf32>
    %393 = vector.shape_cast %390 : vector<17x17xf32> to vector<1x17x17xf32>
    tpu.vector_store %arg5[%c2_79, %c0_80, %c0_81], %393 {strides = array<i32>} : memref<4x17x17xf32, #tpu.memory_space<vmem>>, vector<1x17x17xf32>,
    %394 = vector.extract_strided_slice %325 {offsets = [0, 27], sizes = [17, 1], strides = [1, 1]} : vector<17x36xf32> to vector<17x1xf32>
    %395 = vector.extract_strided_slice %327 {offsets = [0, 27], sizes = [17, 1], strides = [1, 1]} : vector<17x36xf32> to vector<17x1xf32>
    %396 = vector.extract_strided_slice %325 {offsets = [0, 28], sizes = [17, 1], strides = [1, 1]} : vector<17x36xf32> to vector<17x1xf32>
    %397 = vector.extract_strided_slice %327 {offsets = [0, 28], sizes = [17, 1], strides = [1, 1]} : vector<17x36xf32> to vector<17x1xf32>
    %398 = vector.extract_strided_slice %325 {offsets = [0, 29], sizes = [17, 1], strides = [1, 1]} : vector<17x36xf32> to vector<17x1xf32>
    %399 = vector.extract_strided_slice %327 {offsets = [0, 29], sizes = [17, 1], strides = [1, 1]} : vector<17x36xf32> to vector<17x1xf32>
    %400 = vector.extract_strided_slice %325 {offsets = [0, 30], sizes = [17, 1], strides = [1, 1]} : vector<17x36xf32> to vector<17x1xf32>
    %401 = vector.extract_strided_slice %327 {offsets = [0, 30], sizes = [17, 1], strides = [1, 1]} : vector<17x36xf32> to vector<17x1xf32>
    %402 = vector.extract_strided_slice %325 {offsets = [0, 31], sizes = [17, 1], strides = [1, 1]} : vector<17x36xf32> to vector<17x1xf32>
    %403 = vector.extract_strided_slice %327 {offsets = [0, 31], sizes = [17, 1], strides = [1, 1]} : vector<17x36xf32> to vector<17x1xf32>
    %404 = vector.extract_strided_slice %325 {offsets = [0, 32], sizes = [17, 1], strides = [1, 1]} : vector<17x36xf32> to vector<17x1xf32>
    %405 = vector.extract_strided_slice %327 {offsets = [0, 32], sizes = [17, 1], strides = [1, 1]} : vector<17x36xf32> to vector<17x1xf32>
    %406 = vector.extract_strided_slice %325 {offsets = [0, 33], sizes = [17, 1], strides = [1, 1]} : vector<17x36xf32> to vector<17x1xf32>
    %407 = vector.extract_strided_slice %327 {offsets = [0, 33], sizes = [17, 1], strides = [1, 1]} : vector<17x36xf32> to vector<17x1xf32>
    %408 = vector.extract_strided_slice %325 {offsets = [0, 34], sizes = [17, 1], strides = [1, 1]} : vector<17x36xf32> to vector<17x1xf32>
    %409 = vector.extract_strided_slice %327 {offsets = [0, 34], sizes = [17, 1], strides = [1, 1]} : vector<17x36xf32> to vector<17x1xf32>
    %410 = vector.extract_strided_slice %325 {offsets = [0, 35], sizes = [17, 1], strides = [1, 1]} : vector<17x36xf32> to vector<17x1xf32>
    %411 = tpu.concatenate %394, %395, %396, %397, %398, %399, %400, %401, %402, %403, %404, %405, %406, %407, %408, %409 in 1 : vector<17x1xf32>, vector<17x1xf32>, vector<17x1xf32>, vector<17x1xf32>, vector<17x1xf32>, vector<17x1xf32>, vector<17x1xf32>, vector<17x1xf32>, vector<17x1xf32>, vector<17x1xf32>, vector<17x1xf32>, vector<17x1xf32>, vector<17x1xf32>, vector<17x1xf32>, vector<17x1xf32>, vector<17x1xf32> -> vector<17x16xf32>
    %412 = tpu.concatenate %411, %410 in 1 : vector<17x16xf32>, vector<17x1xf32> -> vector<17x17xf32>
    %c3_82 = arith.constant 3 : index
    %c0_83 = arith.constant 0 : index
    %c0_84 = arith.constant 0 : index
    %413 = vector.load %arg5[%c3_82, %c0_83, %c0_84] : memref<4x17x17xf32, #tpu.memory_space<vmem>>, vector<1x17x17xf32>
    %414 = vector.shape_cast %413 : vector<1x17x17xf32> to vector<17x17xf32>
    %415 = vector.shape_cast %412 : vector<17x17xf32> to vector<1x17x17xf32>
    tpu.vector_store %arg5[%c3_82, %c0_83, %c0_84], %415 {strides = array<i32>} : memref<4x17x17xf32, #tpu.memory_space<vmem>>, vector<1x17x17xf32>,
    return
  }
}

</mosaic_0001>

<bundles_post_ra>
// kernel: model_forward.1
= control target key start
LH: loop header
LB: loop body
LE: loop exit
PB: predicated region body
PF: predicated region fallthrough
CT: control target
= control target key end

     0   :  { %10 = vsyncpa [#allocation3], 0  ;;  %s3926_s0 = inlined_call_operand.hbm [shape: f32[1,2,8,8], index: 0, kind: input, shape index: {}]   ;;  %s3927_s1 = inlined_call_operand.hbm [shape: f32[18,36], index: 1, kind: input, shape index: {}]   ;;  %s3928_s2 = inlined_call_operand.vmem [shape: f32[1,36], index: 2, kind: input, shape index: {}]   ;;  %s3929_s3 = inlined_call_operand.hbm [shape: f32[16,36], index: 3, kind: input, shape index: {}]   ;;  %s3930_s4 = inlined_call_operand.vmem [shape: f32[1,36], index: 4, kind: input, shape index: {}]   ;;  %s3931_s5 = inlined_call_operand.vmem [shape: f32[4,17,17], index: 5, kind: output, shape index: {}]  }
   0x1   :  { %11 = vsyncpa [#allocation5], 0  ;;  %s2253_s18 = smov [#allocation4]   ;;  %s2254_s20 = smov [#allocation2]  }
   0x2   :  { %s29_s19 = sshll.u32 %s2253_s18, 4  ;;  %s17_s21 = sshll.u32 %s2254_s20, 4  ;;  %s30_s19 = int_to_ptr.vmem [resolvable:$true] %s29_s19  ;;  %s2327_s21 = int_to_ptr.vmem [resolvable:$true] %s17_s21 }
   0x3   :  { %s2183_s24 = scalar_lea.hbm %s3927_s1, 384 }
   0x4   :  { %p2184_p0 = scmp.ne.s32.totalorder %s3927_s1, %s2183_s24  ;;  %p2187_p1 = scmp.lt.u32.totalorder %s2183_s24, %s3927_s1 }
   0x6   :  { %p2189_p2 = pnand %p2187_p1, %p2184_p0 }
   0x8   :  { %2192 = shalt.err (!%p2189_p2)
}
   0x9   :  { %s2193_s29 = scalar_lea.vmem %s30_s19, 384  ;;  %p2198_p4 = scmp.lt.s32.totalorder %s30_s19, %s30_s19 }
   0xa   :  { %p2194_p3 = scmp.ne.s32.totalorder %s30_s19, %s2193_s29  ;;  %p2199_p5 = scmp.lt.s32.totalorder %s2193_s29, %s2193_s29 }
   0xc   :  { %p2200_p6 = por %p2199_p5, %p2198_p4 }
   0xe   :  { %p2201_p7 = pnand %p2200_p6, %p2194_p3 }
  0x10   :  { %2204 = shalt.err (!%p2201_p7)
}
  0x11   :  { %s2255_s30 = smov 128   ;;  %s2256_s6 = smov 8  }
  0x12   :  { %35 = dma.hbm_to_vmem [thread:$0]  %s3927_s1, 384, %s30_s19, [#allocation5], %s2255_s30, %s2255_s30, %s2256_s6  }
  0x13   :  { %s2205_s11 = scalar_lea.hbm %s3926_s0, 256 }
  0x14   :  { %p2206_p8 = scmp.ne.s32.totalorder %s3926_s0, %s2205_s11  ;;  %p2209_p9 = scmp.lt.u32.totalorder %s2205_s11, %s3926_s0 }
  0x16   :  { %p2211_p10 = pnand %p2209_p9, %p2206_p8 }
  0x18   :  { %2214 = shalt.err (!%p2211_p10)
}
  0x19   :  { %s2215_s16 = scalar_lea.vmem %s2327_s21, 256  ;;  %p2220_p12 = scmp.lt.s32.totalorder %s2327_s21, %s2327_s21 }
  0x1a   :  { %p2216_p11 = scmp.ne.s32.totalorder %s2327_s21, %s2215_s16  ;;  %p2221_p13 = scmp.lt.s32.totalorder %s2215_s16, %s2215_s16 }
  0x1c   :  { %p2222_p0 = por %p2221_p13, %p2220_p12 }
  0x1e   :  { %p2223_p1 = pnand %p2222_p0, %p2216_p11 }
  0x20   :  { %2226 = shalt.err (!%p2223_p1)
}
  0x21   :  { %23 = dma.hbm_to_vmem [thread:$0]  %s3926_s0, 256, %s2327_s21, [#allocation3], %s2255_s30, %s2255_s30, %s2256_s6  }
  0x22   :  { %s2257_s18 = smov [#allocation6]   ;;  %s2227_s23 = scalar_lea.hbm %s3929_s3, 256 }
  0x23   :  { %s43_s19 = sshll.u32 %s2257_s18, 4  ;;  %p2228_p2 = scmp.ne.s32.totalorder %s3929_s3, %s2227_s23  ;;  %s44_s19 = int_to_ptr.vmem [resolvable:$true] %s43_s19 }
  0x24   :  { %p2231_p3 = scmp.lt.u32.totalorder %s2227_s23, %s3929_s3 }
  0x26   :  { %p2233_p4 = pnand %p2231_p3, %p2228_p2 }
  0x28   :  { %2236 = shalt.err (!%p2233_p4)
}
  0x29   :  { %s2237_s28 = scalar_lea.vmem %s44_s19, 256  ;;  %p2242_p6 = scmp.lt.s32.totalorder %s44_s19, %s44_s19 }
  0x2a   :  { %p2238_p5 = scmp.ne.s32.totalorder %s44_s19, %s2237_s28  ;;  %p2243_p7 = scmp.lt.s32.totalorder %s2237_s28, %s2237_s28 }
  0x2c   :  { %p2244_p8 = por %p2243_p7, %p2242_p6 }
  0x2e   :  { %p2245_p9 = pnand %p2244_p8, %p2238_p5 }
  0x30   :  { %2248 = shalt.err (!%p2245_p9)
}
  0x31   :  { %49 = dma.hbm_to_vmem [thread:$0]  %s3929_s3, 256, %s44_s19, [#allocation5], %s2255_s30, %s2255_s30, %s2256_s6  }
  0x32   :  { %2249 = dma.done.wait [#allocation3], 256  }
  0x33   :  { %2250 = vsyncadd [#allocation3], 4294967040 }
  0x34   :  { %2251 = dma.done.wait [#allocation5], 640  }
  0x35   :  { %2252 = vsyncadd [#allocation5], 4294966656  ;;  %v68_v0 = vld [vmem:[#allocation2] sm:$0xff]  ;;  %v244_v1 = vld [vmem:[#allocation2 + $0x8] sm:$0xff]  ;;  %s2258_s29 = smov 1   ;;  %vm73_vm0 = vcmask 7168  }
  0x36   :  { %70 = vrot.lane.b32.xlu0 %v68_v0, %s2258_s29  ;;  %246 = vrot.lane.b32.xlu1 %v244_v1, %s2258_s29  ;;  %vm3937_vm1 = vcmask 72704   ;;  %vm80_vm2 = vcmask 1040384   ;;  %s2259_s3 = smov 127   ;;  %s2260_s30 = smov 17   ;;  %vm111_vm3 = vcmask 146432   ;;  %vm114_vm4 = vcmask 220160  }
  0x37   :  { %s2261_s7 = smov 26   ;;  %s2262_s8 = smov 9   ;;  %v2100_v22 = vld [vmem:[#allocation4 + $0x7] ss:$0 sm:$0xff]  ;;  %v2095_v25 = vld [vmem:[#allocation4] ss:$0 sm:$0xff] }
  0x38   :  { %s2263_s9 = smov 18   ;;  %s2264_s10 = smov 27   ;;  %v2099_v26 = vld [vmem:[#allocation4 + $0x1] ss:$0 sm:$0xff]  ;;  %v2096_v28 = vld [vmem:[#allocation4 + $0x6] ss:$0 sm:$0xff] }
  0x39   :  { %v2103_v30 = vld [vmem:[#allocation4 + $0x4] ss:$0 sm:$0xff]  ;;  %v2462_v33 = vld [vmem:[%s3928_s2] ss:$0 sm:$0xff]  ;;  %v2101_v43 = vld [vmem:[#allocation4 + $0x3] ss:$0 sm:$0xff] }
  0x3a   :  { %v2097_v62 = vld [vmem:[#allocation4 + $0x2] ss:$0 sm:$0xff]  ;;  %v2098_v63 = vld [vmem:[#allocation4 + $0x8] ss:$0 sm:$0xff]  ;;  %vm431_vm5 = vcmask 1041408   ;;  %vm433_vm6 = vcmask 1042432  }
  0x3b   :  { %vm435_vm7 = vcmask 1043456   ;;  %vm437_vm8 = vcmask 1044480   ;;  %vm3933_vm9 = vcmask 1045504   ;;  %vm3932_vm10 = vcmask 1046528   ;;  %s2265_s2 = smov 2   ;;  %s2266_s13 = smov 3  }
  0x3c   :  { %s2267_s14 = smov 4   ;;  %s2268_s15 = smov 120   ;;  %vm3941_vm11 = vcmask 15360   ;;  %vm3940_vm12 = vcmask 23552   ;;  %vm3942_vm13 = vcmask 31744   ;;  %vm3939_vm14 = vcmask 39936  }
  0x3d   :  { %s2269_s16 = smov 121   ;;  %s2270_s1 = smov 122   ;;  %vm3936_vm15 = vcmask 48128  }
  0x3e   :  { %s2271_s17 = smov 123   ;;  %s2272_s18 = smov 111  }
  0x3f   :  { %s2273_s19 = smov 112   ;;  %s2274_s20 = smov 113  }
  0x40   :  { %s2275_s22 = smov 114   ;;  %s2276_s23 = smov 102  }
  0x41   :  { %s2277_s24 = smov 103   ;;  %s2278_s25 = smov 104  }
  0x42   :  { %s2279_s26 = smov 105   ;;  %s2280_s27 = smov 119  }
  0x43   :  { %s2281_s28 = smov 110   ;;  %s2282_s0 = smov 101  }
  0x44   :  { %s2288_s11 = smov 126  }
  0xa8   :  { %v71_v2 = vpop.permute.xlu0 %70  ;;  %v247_v8 = vpop.permute.xlu1 %246 }
  0xa9   :  { %v74_v3 = vsel %vm73_vm0, 0.0, %v71_v2  ;;  %v249_v9 = vsel %vm73_vm0, 0.0, %v247_v8 }
  0xaa   :  { %v76_v4 = vsel %vm3937_vm1, %v74_v3, 0.0  ;;  %v250_v10 = vsel %vm3937_vm1, %v249_v9, 0.0  ;;  %v2102_v3 = vld [vmem:[#allocation4 + $0x5] ss:$0 sm:$0xff] }
  0xab   :  { %v78_v5 = vrot.slane %v76_v4, 7  ;;  %v252_v11 = vrot.slane %v250_v10, 7 }
  0xad   :  { %v2384_v6 = vsel %vm80_vm2, 0.0, %v78_v5  ;;  %v2387_v7 = vsel %vm80_vm2, %v78_v5, 0.0  ;;  %v2420_v12 = vsel %vm80_vm2, 0.0, %v252_v11  ;;  %v2423_v13 = vsel %vm80_vm2, %v252_v11, 0.0 }
  0xae   :  { %87 = vrot.lane.b32.xlu1 %v2387_v7, %s2259_s3  ;;  %85 = vrot.lane.b32.xlu0 %v2384_v6, %s2259_s3 }
  0xb2   :  { %91 = vrot.lane.b32.xlu1 %v2384_v6, %s2256_s6  ;;  %93 = vrot.lane.b32.xlu0 %v2387_v7, %s2256_s6 }
  0xb6   :  { %97 = vrot.lane.b32.xlu1 %v2384_v6, %s2260_s30  ;;  %99 = vrot.lane.b32.xlu0 %v2387_v7, %s2260_s30 }
  0xba   :  { %103 = vrot.lane.b32.xlu1 %v2384_v6, %s2261_s7  ;;  %105 = vrot.lane.b32.xlu0 %v2387_v7, %s2261_s7 }
  0xbe   :  { %117 = vrot.lane.b32.xlu1 %v2384_v6, %s2262_s8  ;;  %119 = vrot.lane.b32.xlu0 %v2387_v7, %s2262_s8 }
  0xc2   :  { %123 = vrot.lane.b32.xlu1 %v2384_v6, %s2263_s9  ;;  %125 = vrot.lane.b32.xlu0 %v2387_v7, %s2263_s9 }
  0xc6   :  { %129 = vrot.lane.b32.xlu1 %v2384_v6, %s2264_s10  ;;  %131 = vrot.lane.b32.xlu0 %v2387_v7, %s2264_s10 }
  0xca   :  { %260 = vrot.lane.b32.xlu1 %v2423_v13, %s2259_s3  ;;  %258 = vrot.lane.b32.xlu0 %v2420_v12, %s2259_s3 }
  0xce   :  { %266 = vrot.lane.b32.xlu1 %v2423_v13, %s2256_s6  ;;  %264 = vrot.lane.b32.xlu0 %v2420_v12, %s2256_s6 }
  0xd2   :  { %272 = vrot.lane.b32.xlu1 %v2423_v13, %s2260_s30  ;;  %270 = vrot.lane.b32.xlu0 %v2420_v12, %s2260_s30 }
  0xd6   :  { %278 = vrot.lane.b32.xlu1 %v2423_v13, %s2261_s7  ;;  %276 = vrot.lane.b32.xlu0 %v2420_v12, %s2261_s7 }
  0xda   :  { %290 = vrot.lane.b32.xlu1 %v2423_v13, %s2262_s8  ;;  %288 = vrot.lane.b32.xlu0 %v2420_v12, %s2262_s8 }
  0xde   :  { %296 = vrot.lane.b32.xlu1 %v2423_v13, %s2263_s9  ;;  %294 = vrot.lane.b32.xlu0 %v2420_v12, %s2263_s9 }
  0xe2   :  { %302 = vrot.lane.b32.xlu1 %v2423_v13, %s2264_s10  ;;  %300 = vrot.lane.b32.xlu0 %v2420_v12, %s2264_s10 }
 0x120   :  { %v88_v14 = vpop.permute.xlu1 %87  ;;  %v86_v15 = vpop.permute.xlu0 %85 }
 0x124   :  { %v92_v16 = vpop.permute.xlu1 %91  ;;  %v94_v17 = vpop.permute.xlu0 %93 }
 0x125   :  { %v109_v20 = vsel %vm3937_vm1, %v86_v15, %v92_v16  ;;  %v110_v21 = vsel %vm3937_vm1, %v88_v14, %v94_v17 }
 0x128   :  { %v98_v18 = vpop.permute.xlu1 %97  ;;  %v100_v19 = vpop.permute.xlu0 %99 }
 0x129   :  { %v112_v23 = vsel %vm111_vm3, %v109_v20, %v98_v18  ;;  %v113_v24 = vsel %vm111_vm3, %v110_v21, %v100_v19 }
 0x12c   :  { %v104_v27 = vpop.permute.xlu1 %103  ;;  %v106_v29 = vpop.permute.xlu0 %105 }
 0x12d   :  { %v115_v31 = vsel %vm114_vm4, %v112_v23, %v104_v27  ;;  %v116_v32 = vsel %vm114_vm4, %v113_v24, %v106_v29 }
 0x12e   :  { %v2464_v34 = vmul.f32 %v2100_v22, %v115_v31  ;;  %v147_v35 = vmul.f32 %v2095_v25, %v116_v32  ;;  %v156_v36 = vmul.f32 %v2096_v28, %v116_v32  ;;  %v197_v37 = vmul.f32 %v2099_v26, %v116_v32 }
 0x12f   :  { %v206_v38 = vmul.f32 %v2100_v22, %v116_v32  ;;  %v240_v40 = vmul.f32 %v2103_v30, %v116_v32  ;;  %v155_v47 = vmul.f32 %v2096_v28, %v115_v31  ;;  %v221_v48 = vmul.f32 %v2101_v43, %v115_v31 }
 0x130   :  { %v209_v39 = vrot.slane %v2464_v34, 7  ;;  %v118_v41 = vpop.permute.xlu1 %117  ;;  %v120_v42 = vpop.permute.xlu0 %119  ;;  %v199_v44 = vadd.f32 %v2462_v33, %v197_v37  ;;  %v160_v46 = vrot.slane %v156_v36, 7  ;;  %v222_v49 = vmul.f32 %v2101_v43, %v116_v32  ;;  %v2104_v36 = vld [vmem:[#allocation4 + $0x9] ss:$0 sm:$0xff] }
 0x131   :  { %v210_v45 = vrot.slane %v206_v38, 7  ;;  %v149_v50 = vadd.f32 %v2462_v33, %v147_v35  ;;  %v159_v54 = vrot.slane %v155_v47, 7  ;;  %v2473_v56 = vadd.f32 %v2462_v33, %v240_v40 }
 0x132   :  { %v2476_v57 = vadd.f32 %v2462_v33, %v221_v48  ;;  %v224_v58 = vadd.f32 %v2462_v33, %v222_v49  ;;  %v135_v60 = vsel %vm3937_vm1, %v2384_v6, %v118_v41  ;;  %v136_v61 = vsel %vm3937_vm1, %v2387_v7, %v120_v42  ;;  %v2105_v41 = vld [vmem:[#allocation4 + $0xf] ss:$0 sm:$0xff]  ;;  %v2108_v42 = vld [vmem:[#allocation4 + $0xa] ss:$0 sm:$0xff] }
 0x133   :  { %v211_v51 = vsel %vm80_vm2, %v209_v39, %v210_v45  ;;  %v161_v59 = vsel %vm80_vm2, %v159_v54, %v160_v46  ;;  %v196_v21 = vmul.f32 %v2099_v26, %v115_v31  ;;  %v146_v27 = vmul.f32 %v2095_v25, %v115_v31  ;;  %v2109_v26 = vld [vmem:[#allocation4 + $0x10] ss:$0 sm:$0xff] }
 0x134   :  { %v124_v52 = vpop.permute.xlu1 %123  ;;  %v126_v53 = vpop.permute.xlu0 %125  ;;  %v2470_v55 = vadd.f32 %v211_v51, %v199_v44  ;;  %v165_v0 = vadd.f32 %v161_v59, %v149_v50  ;;  %v239_v29 = vmul.f32 %v2103_v30, %v115_v31  ;;  %v2112_v31 = vld [vmem:[#allocation4 + $0xd] ss:$0 sm:$0xff] }
 0x135   :  { %v137_v1 = vsel %vm111_vm3, %v135_v60, %v124_v52  ;;  %v138_v2 = vsel %vm111_vm3, %v136_v61, %v126_v53  ;;  %v198_v28 = vadd.f32 %v2462_v33, %v196_v21  ;;  %v148_v35 = vadd.f32 %v2462_v33, %v146_v27  ;;  %v2110_v61 = vld [vmem:[#allocation4 + $0xc] ss:$0 sm:$0xff] }
 0x136   :  { %v241_v44 = vadd.f32 %v2462_v33, %v239_v29 }
 0x137   :  { %v214_v43 = vadd.f32 %v209_v39, %v198_v28  ;;  %v164_v47 = vadd.f32 %v159_v54, %v148_v35 }
 0x138   :  { %v130_v4 = vpop.permute.xlu1 %129  ;;  %v132_v5 = vpop.permute.xlu0 %131 }
 0x139   :  { %v139_v8 = vsel %vm114_vm4, %v137_v1, %v130_v4  ;;  %v140_v9 = vsel %vm114_vm4, %v138_v2, %v132_v5 }
 0x13a   :  { %v2488_v10 = vmul.f32 %v2098_v63, %v139_v8  ;;  %v172_v6 = vmul.f32 %v2097_v62, %v140_v9  ;;  %v181_v11 = vmul.f32 %v2098_v63, %v140_v9  ;;  %v231_v14 = vmul.f32 %v2102_v3, %v140_v9 }
 0x13b   :  { %v171_v37 = vmul.f32 %v2097_v62, %v139_v8  ;;  %v230_v48 = vmul.f32 %v2102_v3, %v139_v8 }
 0x13c   :  { %v184_v7 = vrot.slane %v2488_v10, 7  ;;  %v174_v15 = vadd.f32 %v172_v6, %v165_v0  ;;  %v261_v16 = vpop.permute.xlu1 %260  ;;  %v259_v17 = vpop.permute.xlu0 %258  ;;  %v185_v18 = vrot.slane %v181_v11, 7  ;;  %v2491_v19 = vadd.f32 %v231_v14, %v224_v58 }
 0x13d   :  { %v173_v39 = vadd.f32 %v171_v37, %v164_v47 }
 0x13e   :  { %v186_v20 = vsel %vm80_vm2, %v184_v7, %v185_v18 }
 0x13f   :  { %v190_v22 = vadd.f32 %v186_v20, %v174_v15  ;;  %v189_v11 = vadd.f32 %v184_v7, %v173_v39 }
 0x140   :  { %v267_v23 = vpop.permute.xlu1 %266  ;;  %v265_v24 = vpop.permute.xlu0 %264 }
 0x141   :  { %v283_v38 = vsel %vm3937_vm1, %v261_v16, %v267_v23  ;;  %v282_v40 = vsel %vm3937_vm1, %v259_v17, %v265_v24  ;;  %v232_v24 = vadd.f32 %v230_v48, %v2476_v57 }
 0x144   :  { %v273_v32 = vpop.permute.xlu1 %272  ;;  %v271_v34 = vpop.permute.xlu0 %270 }
 0x145   :  { %v285_v25 = vsel %vm111_vm3, %v283_v38, %v273_v32  ;;  %v284_v30 = vsel %vm111_vm3, %v282_v40, %v271_v34 }
 0x148   :  { %v279_v45 = vpop.permute.xlu1 %278  ;;  %v277_v46 = vpop.permute.xlu0 %276 }
 0x149   :  { %v287_v49 = vsel %vm114_vm4, %v285_v25, %v279_v45  ;;  %v286_v50 = vsel %vm114_vm4, %v284_v30, %v277_v46 }
 0x14a   :  { %v318_v51 = vmul.f32 %v2104_v36, %v287_v49  ;;  %v327_v52 = vmul.f32 %v2105_v41, %v287_v49  ;;  %v368_v53 = vmul.f32 %v2108_v42, %v287_v49  ;;  %v377_v58 = vmul.f32 %v2109_v26, %v287_v49 }
 0x14b   :  { %v411_v33 = vmul.f32 %v2112_v31, %v287_v49  ;;  %v326_v59 = vmul.f32 %v2105_v41, %v286_v50  ;;  %v367_v60 = vmul.f32 %v2108_v42, %v286_v50  ;;  %v376_v0 = vmul.f32 %v2109_v26, %v286_v50 }
 0x14c   :  { %v331_v62 = vrot.slane %v327_v52, 7  ;;  %v370_v63 = vadd.f32 %v368_v53, %v2470_v55  ;;  %v381_v54 = vrot.slane %v377_v58, 7  ;;  %v291_v1 = vpop.permute.xlu1 %290  ;;  %v289_v2 = vpop.permute.xlu0 %288  ;;  %v317_v3 = vmul.f32 %v2104_v36, %v286_v50  ;;  %v2107_v36 = vld [vmem:[#allocation4 + $0x11] ss:$0 sm:$0xff] }
 0x14d   :  { %v330_v4 = vrot.slane %v326_v59, 7  ;;  %v369_v5 = vadd.f32 %v367_v60, %v214_v43  ;;  %v410_v8 = vmul.f32 %v2112_v31, %v286_v50  ;;  %v380_v9 = vrot.slane %v376_v0, 7 }
 0x14e   :  { %v393_v10 = vmul.f32 %v2110_v61, %v287_v49  ;;  %v320_v6 = vadd.f32 %v318_v51, %v190_v22  ;;  %v392_v15 = vmul.f32 %v2110_v61, %v286_v50  ;;  %v307_v7 = vsel %vm3937_vm1, %v2423_v13, %v291_v1  ;;  %v2524_v13 = vld [vmem:[#allocation4 + $0xe] ss:$0 sm:$0xff] }
 0x14f   :  { %v2504_v14 = vadd.f32 %v410_v8, %v241_v44  ;;  %v332_v55 = vsel %vm80_vm2, %v330_v4, %v331_v62  ;;  %v2507_v16 = vadd.f32 %v380_v9, %v369_v5  ;;  %v382_v23 = vsel %vm80_vm2, %v380_v9, %v381_v54 }
 0x150   :  { %v297_v17 = vpop.permute.xlu1 %296  ;;  %v295_v18 = vpop.permute.xlu0 %294  ;;  %v336_v20 = vadd.f32 %v332_v55, %v320_v6  ;;  %v395_v21 = vadd.f32 %v393_v10, %v2491_v19  ;;  %v306_v22 = vsel %vm3937_vm1, %v2420_v12, %v289_v2  ;;  %v319_v27 = vadd.f32 %v317_v3, %v189_v11  ;;  %v2106_v19 = vld [vmem:[#allocation4 + $0xb] ss:$0 sm:$0xff] }
 0x151   :  { %v444_v28 = vrot.slane %v2507_v16, 1  ;;  %v447_v29 = vrot.slane %v2504_v14, 7  ;;  %v451_v32 = vrot.slane %v2504_v14, 6  ;;  %v2520_v34 = vrot.slane %v2507_v16, 5 }
 0x152   :  { %v455_v35 = vrot.slane %v2504_v14, 5  ;;  %v309_v57 = vsel %vm111_vm3, %v307_v7, %v297_v17  ;;  %v2526_v37 = vadd.f32 %v392_v15, %v232_v24  ;;  %v2528_v12 = vadd.f32 %v382_v23, %v370_v63 }
 0x153   :  { %v449_v38 = vrot.slane %v2507_v16, 7  ;;  %v458_v40 = vsel %vm80_vm2, %v444_v28, %v2504_v14  ;;  %v308_v41 = vsel %vm111_vm3, %v306_v22, %v295_v18  ;;  %468 = vrot.lane.b32.xlu1 %v2520_v34, %s2258_s29  ;;  %v2537_v43 = vadd.f32 %v411_v33, %v2473_v56 }
 0x154   :  { %v303_v42 = vpop.permute.xlu1 %302  ;;  %v301_v26 = vpop.permute.xlu0 %300  ;;  %v453_v44 = vrot.slane %v2507_v16, 6  ;;  %v459_v25 = vsel %vm431_vm5, %v458_v40, %v2507_v16  ;;  %v335_v50 = vadd.f32 %v330_v4, %v319_v27 }
 0x155   :  { %v311_v30 = vsel %vm114_vm4, %v309_v57, %v303_v42  ;;  %v310_v31 = vsel %vm114_vm4, %v308_v41, %v301_v26  ;;  %v460_v45 = vsel %vm433_vm6, %v459_v25, %v447_v29 }
 0x156   :  { %v343_v46 = vmul.f32 %v2106_v19, %v311_v30  ;;  %v352_v47 = vmul.f32 %v2107_v36, %v311_v30  ;;  %v402_v48 = vmul.f32 %v2524_v13, %v311_v30  ;;  %v461_v49 = vsel %vm435_vm7, %v460_v45, %v449_v38 }
 0x157   :  { %v342_v56 = vmul.f32 %v2106_v19, %v310_v31  ;;  %v351_v51 = vmul.f32 %v2107_v36, %v310_v31  ;;  %v462_v52 = vsel %vm437_vm8, %v461_v49, %v451_v32  ;;  %481 = vrot.lane.b32.xlu1 %v2520_v34, %s2265_s2  ;;  %v401_v9 = vmul.f32 %v2524_v13, %v310_v31 }
 0x158   :  { %v345_v53 = vadd.f32 %v343_v46, %v336_v20  ;;  %v356_v58 = vrot.slane %v352_v47, 7  ;;  %v2548_v39 = vadd.f32 %v402_v48, %v395_v21  ;;  %v463_v33 = vsel %vm3933_vm9, %v462_v52, %v453_v44 }
 0x159   :  { %v344_v59 = vadd.f32 %v342_v56, %v335_v50  ;;  %v355_v60 = vrot.slane %v351_v51, 7  ;;  %v2554_v61 = vsel %vm3932_vm10, %v463_v33, %v455_v35  ;;  %v2615_v6 = vadd.f32 %v401_v9, %v2526_v37 }
 0x15a   :  { %466 = vrot.lane.b32.xlu0 %v2554_v61, %s2258_s29 }
 0x15b   :  { %v357_v62 = vsel %vm80_vm2, %v355_v60, %v356_v58  ;;  %v2557_v63 = vadd.f32 %v355_v60, %v344_v59  ;;  %493 = vrot.lane.b32.xlu1 %v2520_v34, %s2266_s13  ;;  %v418_v15 = vrot.slane %v2615_v6, 7  ;;  %v422_v21 = vrot.slane %v2615_v6, 6 }
 0x15c   :  { %v361_v54 = vadd.f32 %v357_v62, %v345_v53  ;;  %v426_v27 = vrot.slane %v2615_v6, 5 }
 0x15d   :  { %v748_v1 = vmul.f32 0.5, %v2557_v63  ;;  %v415_v10 = vrot.slane %v2557_v63, 1  ;;  %v420_v18 = vrot.slane %v2557_v63, 7  ;;  %v2639_v23 = vrot.slane %v2557_v63, 5 }
 0x15e   :  { %v749_v0 = vmul.f32 0.5, %v361_v54  ;;  %479 = vrot.lane.b32.xlu0 %v2554_v61, %s2265_s2  ;;  %v424_v7 = vrot.slane %v2557_v63, 6 }
 0x15f   :  { %505 = vrot.lane.b32.xlu1 %v2520_v34, %s2267_s14  ;;  %v750_v3 = vadd.f32 1.0, %v748_v1  ;;  %v430_v11 = vsel %vm80_vm2, %v415_v10, %v2615_v6 }
 0x160   :  { %v2566_v2 = vadd.f32 1.0, %v749_v0  ;;  %v432_v55 = vsel %vm431_vm5, %v430_v11, %v2557_v63 }
 0x161   :  { %v1153_v5 = vrot.slane %v750_v3, 1  ;;  %v434_v17 = vsel %vm433_vm6, %v432_v55, %v418_v15 }
 0x162   :  { %v1154_v4 = vrot.slane %v2566_v2, 1  ;;  %491 = vrot.lane.b32.xlu0 %v2554_v61, %s2266_s13  ;;  %v436_v20 = vsel %vm435_vm7, %v434_v17, %v420_v18 }
 0x163   :  { %546 = vrot.lane.b32.xlu1 %v2520_v34, %s2268_s15  ;;  %v438_v24 = vsel %vm437_vm8, %v436_v20, %v422_v21 }
 0x164   :  { %v2578_v8 = vsel %vm3932_vm10, %v1153_v5, %v1154_v4  ;;  %v440_v22 = vsel %vm3933_vm9, %v438_v24, %v424_v7  ;;  %vm3934_vm9 = vcmask 64512  }
 0x165   :  { %v2654_v28 = vsel %vm3932_vm10, %v440_v22, %v426_v27  ;;  %vm3935_vm10 = vcmask 56320  }
 0x166   :  { %503 = vrot.lane.b32.xlu0 %v2554_v61, %s2267_s14 }
 0x167   :  { %558 = vrot.lane.b32.xlu1 %v2520_v34, %s2269_s16 }
 0x16a   :  { %544 = vrot.lane.b32.xlu0 %v2554_v61, %s2268_s15 }
 0x16b   :  { %570 = vrot.lane.b32.xlu1 %v2520_v34, %s2270_s1 }
 0x16e   :  { %556 = vrot.lane.b32.xlu0 %v2554_v61, %s2269_s16 }
 0x16f   :  { %582 = vrot.lane.b32.xlu1 %v2520_v34, %s2271_s17 }
 0x172   :  { %568 = vrot.lane.b32.xlu0 %v2554_v61, %s2270_s1 }
 0x173   :  { %616 = vrot.lane.b32.xlu1 %v2520_v34, %s2272_s18 }
 0x176   :  { %580 = vrot.lane.b32.xlu0 %v2554_v61, %s2271_s17 }
 0x177   :  { %628 = vrot.lane.b32.xlu1 %v2520_v34, %s2273_s19 }
 0x17a   :  { %614 = vrot.lane.b32.xlu0 %v2554_v61, %s2272_s18 }
 0x17b   :  { %640 = vrot.lane.b32.xlu1 %v2520_v34, %s2274_s20 }
 0x17e   :  { %626 = vrot.lane.b32.xlu0 %v2554_v61, %s2273_s19 }
 0x17f   :  { %652 = vrot.lane.b32.xlu1 %v2520_v34, %s2275_s22 }
 0x182   :  { %638 = vrot.lane.b32.xlu0 %v2554_v61, %s2274_s20 }
 0x183   :  { %686 = vrot.lane.b32.xlu1 %v2520_v34, %s2276_s23 }
 0x186   :  { %650 = vrot.lane.b32.xlu0 %v2554_v61, %s2275_s22 }
 0x187   :  { %698 = vrot.lane.b32.xlu1 %v2520_v34, %s2277_s24 }
 0x18a   :  { %684 = vrot.lane.b32.xlu0 %v2554_v61, %s2276_s23 }
 0x18b   :  { %710 = vrot.lane.b32.xlu1 %v2520_v34, %s2278_s25 }
 0x18e   :  { %696 = vrot.lane.b32.xlu0 %v2554_v61, %s2277_s24 }
 0x18f   :  { %722 = vrot.lane.b32.xlu1 %v2520_v34, %s2279_s26 }
 0x192   :  { %708 = vrot.lane.b32.xlu0 %v2554_v61, %s2278_s25 }
 0x193   :  { %475 = vrot.lane.b32.xlu1 %v2639_v23, %s2258_s29 }
 0x196   :  { %720 = vrot.lane.b32.xlu0 %v2554_v61, %s2279_s26 }
 0x197   :  { %487 = vrot.lane.b32.xlu1 %v2639_v23, %s2265_s2 }
 0x19a   :  { %473 = vrot.lane.b32.xlu0 %v2654_v28, %s2258_s29 }
 0x19b   :  { %499 = vrot.lane.b32.xlu1 %v2639_v23, %s2266_s13 }
 0x19e   :  { %485 = vrot.lane.b32.xlu0 %v2654_v28, %s2265_s2 }
 0x19f   :  { %511 = vrot.lane.b32.xlu1 %v2639_v23, %s2267_s14 }
 0x1a2   :  { %497 = vrot.lane.b32.xlu0 %v2654_v28, %s2266_s13 }
 0x1a3   :  { %540 = vrot.lane.b32.xlu1 %v2639_v23, %s2280_s27 }
 0x1a6   :  { %509 = vrot.lane.b32.xlu0 %v2654_v28, %s2267_s14 }
 0x1a7   :  { %552 = vrot.lane.b32.xlu1 %v2639_v23, %s2268_s15 }
 0x1aa   :  { %538 = vrot.lane.b32.xlu0 %v2654_v28, %s2280_s27 }
 0x1ab   :  { %564 = vrot.lane.b32.xlu1 %v2639_v23, %s2269_s16 }
 0x1ae   :  { %550 = vrot.lane.b32.xlu0 %v2654_v28, %s2268_s15 }
 0x1af   :  { %576 = vrot.lane.b32.xlu1 %v2639_v23, %s2270_s1 }
 0x1b2   :  { %562 = vrot.lane.b32.xlu0 %v2654_v28, %s2269_s16 }
 0x1b3   :  { %588 = vrot.lane.b32.xlu1 %v2639_v23, %s2271_s17 }
 0x1b6   :  { %574 = vrot.lane.b32.xlu0 %v2654_v28, %s2270_s1 }
 0x1b7   :  { %610 = vrot.lane.b32.xlu1 %v2639_v23, %s2281_s28 }
 0x1ba   :  { %586 = vrot.lane.b32.xlu0 %v2654_v28, %s2271_s17 }
 0x1bb   :  { %622 = vrot.lane.b32.xlu1 %v2639_v23, %s2272_s18 }
 0x1be   :  { %608 = vrot.lane.b32.xlu0 %v2654_v28, %s2281_s28 }
 0x1bf   :  { %634 = vrot.lane.b32.xlu1 %v2639_v23, %s2273_s19 }
 0x1c2   :  { %620 = vrot.lane.b32.xlu0 %v2654_v28, %s2272_s18 }
 0x1c3   :  { %646 = vrot.lane.b32.xlu1 %v2639_v23, %s2274_s20 }
 0x1c5   :  { %v469_v29 = vpop.permute.xlu1 %468 }
 0x1c6   :  { %632 = vrot.lane.b32.xlu0 %v2654_v28, %s2273_s19  ;;  %v516_v60 = vsel %vm73_vm0, %v2639_v23, %v469_v29 }
 0x1c7   :  { %658 = vrot.lane.b32.xlu1 %v2639_v23, %s2275_s22 }
 0x1c9   :  { %v482_v32 = vpop.permute.xlu1 %481 }
 0x1ca   :  { %644 = vrot.lane.b32.xlu0 %v2654_v28, %s2274_s20 }
 0x1cb   :  { %680 = vrot.lane.b32.xlu1 %v2639_v23, %s2282_s0 }
 0x1cc   :  { %v467_v34 = vpop.permute.xlu0 %466 }
 0x1cd   :  { %v494_v19 = vpop.permute.xlu1 %493  ;;  %v515_v3 = vsel %vm73_vm0, %v2654_v28, %v467_v34 }
 0x1ce   :  { %656 = vrot.lane.b32.xlu0 %v2654_v28, %s2275_s22 }
 0x1cf   :  { %692 = vrot.lane.b32.xlu1 %v2639_v23, %s2276_s23 }
 0x1d0   :  { %v480_v35 = vpop.permute.xlu0 %479 }
 0x1d1   :  { %v506_v57 = vpop.permute.xlu1 %505 }
 0x1d2   :  { %678 = vrot.lane.b32.xlu0 %v2654_v28, %s2282_s0 }
 0x1d3   :  { %704 = vrot.lane.b32.xlu1 %v2639_v23, %s2277_s24 }
 0x1d4   :  { %v492_v36 = vpop.permute.xlu0 %491 }
 0x1d5   :  { %v2716_v13 = vpop.permute.xlu1 %546 }
 0x1d6   :  { %690 = vrot.lane.b32.xlu0 %v2654_v28, %s2276_s23 }
 0x1d7   :  { %716 = vrot.lane.b32.xlu1 %v2639_v23, %s2278_s25 }
 0x1d8   :  { %v504_v37 = vpop.permute.xlu0 %503 }
 0x1d9   :  { %v2722_v38 = vpop.permute.xlu1 %558 }
 0x1da   :  { %702 = vrot.lane.b32.xlu0 %v2654_v28, %s2277_s24 }
 0x1db   :  { %728 = vrot.lane.b32.xlu1 %v2639_v23, %s2279_s26 }
 0x1dc   :  { %v2728_v40 = vpop.permute.xlu0 %544 }
 0x1dd   :  { %v2730_v41 = vpop.permute.xlu1 %570 }
 0x1de   :  { %714 = vrot.lane.b32.xlu0 %v2654_v28, %s2278_s25 }
 0x1e0   :  { %v2734_v42 = vpop.permute.xlu0 %556 }
 0x1e1   :  { %v2736_v26 = vpop.permute.xlu1 %582 }
 0x1e2   :  { %726 = vrot.lane.b32.xlu0 %v2654_v28, %s2279_s26 }
 0x1e4   :  { %v2740_v44 = vpop.permute.xlu0 %568 }
 0x1e5   :  { %v2742_v25 = vpop.permute.xlu1 %616 }
 0x1e8   :  { %v2744_v30 = vpop.permute.xlu0 %580 }
 0x1e9   :  { %v2746_v31 = vpop.permute.xlu1 %628 }
 0x1ec   :  { %v2748_v45 = vpop.permute.xlu0 %614 }
 0x1ed   :  { %v2750_v46 = vpop.permute.xlu1 %640 }
 0x1f0   :  { %v2752_v47 = vpop.permute.xlu0 %626 }
 0x1f1   :  { %v2754_v48 = vpop.permute.xlu1 %652 }
 0x1f4   :  { %v2756_v49 = vpop.permute.xlu0 %638 }
 0x1f5   :  { %v2758_v50 = vpop.permute.xlu1 %686 }
 0x1f8   :  { %v2760_v56 = vpop.permute.xlu0 %650 }
 0x1f9   :  { %v2762_v51 = vpop.permute.xlu1 %698 }
 0x1fc   :  { %v2764_v52 = vpop.permute.xlu0 %684 }
 0x1fd   :  { %v2766_v53 = vpop.permute.xlu1 %710 }
 0x200   :  { %v2768_v58 = vpop.permute.xlu0 %696 }
 0x201   :  { %v2770_v33 = vpop.permute.xlu1 %722 }
 0x204   :  { %v2772_v59 = vpop.permute.xlu0 %708 }
 0x205   :  { %v476_v61 = vpop.permute.xlu1 %475 }
 0x206   :  { %v519_v62 = vsel %vm3941_vm11, %v516_v60, %v476_v61 }
 0x207   :  { %v522_v0 = vsel %vm3940_vm12, %v519_v62, %v482_v32 }
 0x208   :  { %v2777_v63 = vpop.permute.xlu0 %720 }
 0x209   :  { %v488_v54 = vpop.permute.xlu1 %487 }
 0x20a   :  { %v525_v1 = vsel %vm3942_vm13, %v522_v0, %v488_v54 }
 0x20b   :  { %v528_v11 = vsel %vm3939_vm14, %v525_v1, %v494_v19 }
 0x20c   :  { %v474_v5 = vpop.permute.xlu0 %473 }
 0x20d   :  { %v518_v9 = vsel %vm3941_vm11, %v515_v3, %v474_v5  ;;  %v500_v10 = vpop.permute.xlu1 %499 }
 0x20e   :  { %v531_v55 = vsel %vm3936_vm15, %v528_v11, %v500_v10  ;;  %v521_v17 = vsel %vm3940_vm12, %v518_v9, %v480_v35 }
 0x20f   :  { %v534_v21 = vsel %vm3935_vm10, %v531_v55, %v506_v57 }
 0x210   :  { %v486_v15 = vpop.permute.xlu0 %485 }
 0x211   :  { %v524_v18 = vsel %vm3942_vm13, %v521_v17, %v486_v15  ;;  %v512_v20 = vpop.permute.xlu1 %511 }
 0x212   :  { %v537_v23 = vsel %vm3934_vm9, %v534_v21, %v512_v20  ;;  %v527_v27 = vsel %vm3939_vm14, %v524_v18, %v492_v36 }
 0x213   :  { %v772_v24 = vsel %vm3937_vm1, %v537_v23, 0.0 }
 0x214   :  { %v2792_v7 = vsel %vm80_vm2, %v772_v24, 0.0  ;;  %v498_v22 = vpop.permute.xlu0 %497 }
 0x215   :  { %v530_v28 = vsel %vm3936_vm15, %v527_v27, %v498_v22  ;;  %v541_v29 = vpop.permute.xlu1 %540  ;;  %778 = vrot.lane.b32.xlu1 %v2792_v7, %s2262_s8 }
 0x216   :  { %v533_v34 = vsel %vm3935_vm10, %v530_v28, %v504_v37  ;;  %v593_v60 = vsel %vm73_vm0, %v541_v29, %v2716_v13 }
 0x218   :  { %v510_v32 = vpop.permute.xlu0 %509 }
 0x219   :  { %v536_v19 = vsel %vm3934_vm9, %v533_v34, %v510_v32  ;;  %v553_v35 = vpop.permute.xlu1 %552  ;;  %784 = vrot.lane.b32.xlu1 %v2792_v7, %s2263_s9 }
 0x21a   :  { %v2803_v57 = vsel %vm3937_vm1, %v536_v19, 0.0  ;;  %v595_v37 = vsel %vm3941_vm11, %v593_v60, %v553_v35 }
 0x21b   :  { %776 = vrot.lane.b32.xlu0 %v2803_v57, %s2262_s8  ;;  %v597_v54 = vsel %vm3940_vm12, %v595_v37, %v2722_v38 }
 0x21c   :  { %v539_v36 = vpop.permute.xlu0 %538 }
 0x21d   :  { %v565_v61 = vpop.permute.xlu1 %564  ;;  %790 = vrot.lane.b32.xlu1 %v2792_v7, %s2264_s10  ;;  %v592_v38 = vsel %vm73_vm0, %v539_v36, %v2728_v40 }
 0x21e   :  { %v599_v1 = vsel %vm3942_vm13, %v597_v54, %v565_v61 }
 0x21f   :  { %782 = vrot.lane.b32.xlu0 %v2803_v57, %s2263_s9  ;;  %v601_v3 = vsel %vm3939_vm14, %v599_v1, %v2730_v41 }
 0x220   :  { %v551_v62 = vpop.permute.xlu0 %550 }
 0x221   :  { %v577_v0 = vpop.permute.xlu1 %576  ;;  %802 = vrot.lane.b32.xlu1 %v2792_v7, %s2259_s3  ;;  %v594_v10 = vsel %vm3941_vm11, %v592_v38, %v551_v62 }
 0x222   :  { %v603_v9 = vsel %vm3936_vm15, %v601_v3, %v577_v0  ;;  %v596_v41 = vsel %vm3940_vm12, %v594_v10, %v2734_v42 }
 0x223   :  { %788 = vrot.lane.b32.xlu0 %v2803_v57, %s2264_s10  ;;  %v605_v55 = vsel %vm3935_vm10, %v603_v9, %v2736_v26 }
 0x224   :  { %v563_v13 = vpop.permute.xlu0 %562 }
 0x225   :  { %v589_v5 = vpop.permute.xlu1 %588  ;;  %808 = vrot.lane.b32.xlu1 %v2792_v7, %s2256_s6  ;;  %v598_v17 = vsel %vm3942_vm13, %v596_v41, %v563_v13 }
 0x226   :  { %v607_v40 = vsel %vm3934_vm9, %v605_v55, %v589_v5  ;;  %v600_v26 = vsel %vm3939_vm14, %v598_v17, %v2740_v44 }
 0x227   :  { %800 = vrot.lane.b32.xlu0 %v2803_v57, %s2259_s3  ;;  %v867_v20 = vsel %vm3937_vm1, %v607_v40, 0.0 }
 0x228   :  { %v575_v11 = vpop.permute.xlu0 %574  ;;  %v2850_v42 = vsel %vm80_vm2, %v867_v20, 0.0 }
 0x229   :  { %v611_v15 = vpop.permute.xlu1 %610  ;;  %814 = vrot.lane.b32.xlu1 %v2792_v7, %s2260_s30  ;;  %v602_v21 = vsel %vm3936_vm15, %v600_v26, %v575_v11 }
 0x22a   :  { %v604_v24 = vsel %vm3935_vm10, %v602_v21, %v2744_v30  ;;  %v663_v30 = vsel %vm73_vm0, %v611_v15, %v2742_v25 }
 0x22b   :  { %806 = vrot.lane.b32.xlu0 %v2803_v57, %s2256_s6 }
 0x22c   :  { %v587_v18 = vpop.permute.xlu0 %586 }
 0x22d   :  { %820 = vrot.lane.b32.xlu1 %v2792_v7, %s2261_s7  ;;  %v623_v23 = vpop.permute.xlu1 %622  ;;  %v606_v27 = vsel %vm3934_vm9, %v604_v24, %v587_v18 }
 0x22e   :  { %v2862_v28 = vsel %vm3937_vm1, %v606_v27, 0.0  ;;  %v665_v32 = vsel %vm3941_vm11, %v663_v30, %v623_v23 }
 0x22f   :  { %812 = vrot.lane.b32.xlu0 %v2803_v57, %s2260_s30  ;;  %v667_v19 = vsel %vm3940_vm12, %v665_v32, %v2746_v31 }
 0x230   :  { %v609_v22 = vpop.permute.xlu0 %608 }
 0x231   :  { %873 = vrot.lane.b32.xlu1 %v2850_v42, %s2262_s8  ;;  %v635_v44 = vpop.permute.xlu1 %634  ;;  %v662_v61 = vsel %vm73_vm0, %v609_v22, %v2748_v45 }
 0x232   :  { %v669_v35 = vsel %vm3942_vm13, %v667_v19, %v635_v44 }
 0x233   :  { %818 = vrot.lane.b32.xlu0 %v2803_v57, %s2261_s7  ;;  %v671_v25 = vsel %vm3939_vm14, %v669_v35, %v2750_v46 }
 0x234   :  { %v621_v29 = vpop.permute.xlu0 %620 }
 0x235   :  { %879 = vrot.lane.b32.xlu1 %v2850_v42, %s2263_s9  ;;  %v647_v34 = vpop.permute.xlu1 %646  ;;  %v664_v37 = vsel %vm3941_vm11, %v662_v61, %v621_v29 }
 0x236   :  { %v673_v31 = vsel %vm3936_vm15, %v671_v25, %v647_v34  ;;  %v666_v46 = vsel %vm3940_vm12, %v664_v37, %v2752_v47  ;;  %v3008_v25 = vld [vmem:[#allocation6 + $0x1] ss:$0 sm:$0xff] }
 0x237   :  { %871 = vrot.lane.b32.xlu0 %v2862_v28, %s2262_s8  ;;  %v675_v54 = vsel %vm3935_vm10, %v673_v31, %v2754_v48  ;;  %v3014_v31 = vld [vmem:[%s3930_s4] ss:$0 sm:$0xff]  ;;  %s2283_s4 = smov 5  }
 0x238   :  { %v633_v36 = vpop.permute.xlu0 %632 }
 0x239   :  { %885 = vrot.lane.b32.xlu1 %v2850_v42, %s2264_s10  ;;  %v659_v60 = vpop.permute.xlu1 %658  ;;  %v668_v45 = vsel %vm3942_vm13, %v666_v46, %v633_v36 }
 0x23a   :  { %v677_v0 = vsel %vm3934_vm9, %v675_v54, %v659_v60  ;;  %v670_v48 = vsel %vm3939_vm14, %v668_v45, %v2756_v49 }
 0x23b   :  { %877 = vrot.lane.b32.xlu0 %v2862_v28, %s2263_s9  ;;  %v962_v13 = vsel %vm3937_vm1, %v677_v0, 0.0 }
 0x23c   :  { %v645_v62 = vpop.permute.xlu0 %644  ;;  %v2909_v47 = vsel %vm80_vm2, %v962_v13, 0.0  ;;  %v3025_v13 = vld [vmem:[#allocation6 + $0x3] ss:$0 sm:$0xff] }
 0x23d   :  { %897 = vrot.lane.b32.xlu1 %v2850_v42, %s2259_s3  ;;  %v681_v1 = vpop.permute.xlu1 %680  ;;  %v672_v5 = vsel %vm3936_vm15, %v670_v48, %v645_v62 }
 0x23e   :  { %v674_v9 = vsel %vm3935_vm10, %v672_v5, %v2760_v56  ;;  %v733_v15 = vsel %vm73_vm0, %v681_v1, %v2758_v50 }
 0x23f   :  { %883 = vrot.lane.b32.xlu0 %v2862_v28, %s2264_s10 }
 0x240   :  { %v657_v3 = vpop.permute.xlu0 %656 }
 0x241   :  { %903 = vrot.lane.b32.xlu1 %v2850_v42, %s2256_s6  ;;  %v693_v38 = vpop.permute.xlu1 %692  ;;  %v676_v10 = vsel %vm3934_vm9, %v674_v9, %v657_v3 }
 0x242   :  { %v2921_v11 = vsel %vm3937_vm1, %v676_v10, 0.0  ;;  %v735_v56 = vsel %vm3941_vm11, %v733_v15, %v693_v38 }
 0x243   :  { %895 = vrot.lane.b32.xlu0 %v2862_v28, %s2259_s3  ;;  %v737_v40 = vsel %vm3940_vm12, %v735_v56, %v2762_v51 }
 0x244   :  { %v679_v49 = vpop.permute.xlu0 %678 }
 0x245   :  { %909 = vrot.lane.b32.xlu1 %v2850_v42, %s2260_s30  ;;  %v705_v55 = vpop.permute.xlu1 %704  ;;  %v732_v26 = vsel %vm73_vm0, %v679_v49, %v2764_v52 }
 0x246   :  { %v739_v18 = vsel %vm3942_vm13, %v737_v40, %v705_v55 }
 0x247   :  { %901 = vrot.lane.b32.xlu0 %v2862_v28, %s2256_s6  ;;  %v741_v20 = vsel %vm3939_vm14, %v739_v18, %v2766_v53 }
 0x248   :  { %v691_v41 = vpop.permute.xlu0 %690 }
 0x249   :  { %915 = vrot.lane.b32.xlu1 %v2850_v42, %s2261_s7  ;;  %v717_v17 = vpop.permute.xlu1 %716  ;;  %v734_v21 = vsel %vm3941_vm11, %v732_v26, %v691_v41 }
 0x24a   :  { %v743_v51 = vsel %vm3936_vm15, %v741_v20, %v717_v17  ;;  %v736_v53 = vsel %vm3940_vm12, %v734_v21, %v2768_v58  ;;  %v3045_v21 = vld [vmem:[#allocation6 + $0x2] ss:$0 sm:$0xff] }
 0x24b   :  { %907 = vrot.lane.b32.xlu0 %v2862_v28, %s2260_s30  ;;  %v745_v24 = vsel %vm3935_vm10, %v743_v51, %v2770_v33 }
 0x24c   :  { %v703_v50 = vpop.permute.xlu0 %702 }
 0x24d   :  { %968 = vrot.lane.b32.xlu1 %v2909_v47, %s2262_s8  ;;  %v729_v23 = vpop.permute.xlu1 %728  ;;  %v738_v27 = vsel %vm3942_vm13, %v736_v53, %v703_v50 }
 0x24e   :  { %v747_v22 = vsel %vm3934_vm9, %v745_v24, %v729_v23  ;;  %v740_v33 = vsel %vm3939_vm14, %v738_v27, %v2772_v59 }
 0x24f   :  { %913 = vrot.lane.b32.xlu0 %v2862_v28, %s2261_s7  ;;  %v1057_v44 = vsel %vm3937_vm1, %v747_v22, 0.0 }
 0x250   :  { %v715_v52 = vpop.permute.xlu0 %714  ;;  %v2968_v58 = vsel %vm80_vm2, %v1057_v44, 0.0  ;;  %v3055_v44 = vld [vmem:[#allocation6 + $0x5] ss:$0 sm:$0xff] }
 0x251   :  { %974 = vrot.lane.b32.xlu1 %v2909_v47, %s2263_s9  ;;  %v742_v29 = vsel %vm3936_vm15, %v740_v33, %v715_v52  ;;  %vm3947_vm15 = vcmask 1046528  }
 0x252   :  { %v744_v32 = vsel %vm3935_vm10, %v742_v29, %v2777_v63 }
 0x253   :  { %966 = vrot.lane.b32.xlu0 %v2921_v11, %s2262_s8 }
 0x254   :  { %v727_v30 = vpop.permute.xlu0 %726 }
 0x255   :  { %980 = vrot.lane.b32.xlu1 %v2909_v47, %s2264_s10  ;;  %v746_v34 = vsel %vm3934_vm9, %v744_v32, %v727_v30  ;;  %vm3945_vm9 = vcmask 1045504  }
 0x256   :  { %v2980_v59 = vsel %vm3937_vm1, %v746_v34, 0.0  ;;  %vm3946_vm10 = vmmov %vm3945_vm9 }
 0x257   :  { %972 = vrot.lane.b32.xlu0 %v2921_v11, %s2263_s9 }
 0x259   :  { %992 = vrot.lane.b32.xlu1 %v2909_v47, %s2259_s3 }
 0x25b   :  { %978 = vrot.lane.b32.xlu0 %v2921_v11, %s2264_s10 }
 0x25d   :  { %998 = vrot.lane.b32.xlu1 %v2909_v47, %s2256_s6 }
 0x25f   :  { %990 = vrot.lane.b32.xlu0 %v2921_v11, %s2259_s3 }
 0x261   :  { %1004 = vrot.lane.b32.xlu1 %v2909_v47, %s2260_s30 }
 0x263   :  { %996 = vrot.lane.b32.xlu0 %v2921_v11, %s2256_s6 }
 0x265   :  { %1010 = vrot.lane.b32.xlu1 %v2909_v47, %s2261_s7 }
 0x267   :  { %1002 = vrot.lane.b32.xlu0 %v2921_v11, %s2260_s30 }
 0x269   :  { %1063 = vrot.lane.b32.xlu1 %v2968_v58, %s2262_s8 }
 0x26b   :  { %1008 = vrot.lane.b32.xlu0 %v2921_v11, %s2261_s7 }
 0x26d   :  { %1069 = vrot.lane.b32.xlu1 %v2968_v58, %s2263_s9 }
 0x26f   :  { %1061 = vrot.lane.b32.xlu0 %v2980_v59, %s2262_s8 }
 0x271   :  { %1075 = vrot.lane.b32.xlu1 %v2968_v58, %s2264_s10 }
 0x273   :  { %1067 = vrot.lane.b32.xlu0 %v2980_v59, %s2263_s9  ;;  %s2286_s9 = smov 124  }
 0x275   :  { %1087 = vrot.lane.b32.xlu1 %v2968_v58, %s2259_s3 }
 0x277   :  { %1073 = vrot.lane.b32.xlu0 %v2980_v59, %s2264_s10  ;;  %s2287_s10 = smov 125  }
 0x279   :  { %1093 = vrot.lane.b32.xlu1 %v2968_v58, %s2256_s6 }
 0x27b   :  { %1085 = vrot.lane.b32.xlu0 %v2980_v59, %s2259_s3 }
 0x27d   :  { %1099 = vrot.lane.b32.xlu1 %v2968_v58, %s2260_s30 }
 0x27f   :  { %1091 = vrot.lane.b32.xlu0 %v2980_v59, %s2256_s6 }
 0x281   :  { %1105 = vrot.lane.b32.xlu1 %v2968_v58, %s2261_s7 }
 0x283   :  { %1097 = vrot.lane.b32.xlu0 %v2980_v59, %s2260_s30  ;;  %s2284_s30 = smov 6  }
 0x287   :  { %v779_v63 = vpop.permute.xlu1 %778  ;;  %1103 = vrot.lane.b32.xlu0 %v2980_v59, %s2261_s7  ;;  %s2285_s7 = smov 7  }
 0x288   :  { %v795_v36 = vsel %vm3937_vm1, %v2792_v7, %v779_v63 }
 0x28b   :  { %v785_v19 = vpop.permute.xlu1 %784 }
 0x28c   :  { %v797_v60 = vsel %vm111_vm3, %v795_v36, %v785_v19 }
 0x28d   :  { %v777_v35 = vpop.permute.xlu0 %776 }
 0x28e   :  { %v794_v0 = vsel %vm3937_vm1, %v2803_v57, %v777_v35  ;;  %v3034_v57 = vld [vmem:[#allocation6] ss:$0 sm:$0xff] }
 0x28f   :  { %v791_v61 = vpop.permute.xlu1 %790 }
 0x290   :  { %v3017_v37 = vsel %vm114_vm4, %v797_v60, %v791_v61  ;;  %v2118_v60 = vld [vmem:[#allocation6 + $0x7] ss:$0 sm:$0xff] }
 0x291   :  { %v854_v62 = vmul.f32 %v3008_v25, %v3017_v37  ;;  %v783_v54 = vpop.permute.xlu0 %782 }
 0x292   :  { %v796_v45 = vsel %vm111_vm3, %v794_v0, %v783_v54 }
 0x293   :  { %v856_v46 = vadd.f32 %v3014_v31, %v854_v62  ;;  %v803_v7 = vpop.permute.xlu1 %802 }
 0x295   :  { %v789_v1 = vpop.permute.xlu0 %788 }
 0x296   :  { %v3028_v48 = vsel %vm114_vm4, %v796_v45, %v789_v1 }
 0x297   :  { %v835_v3 = vmul.f32 %v3025_v13, %v3028_v48  ;;  %v809_v5 = vpop.permute.xlu1 %808 }
 0x298   :  { %v825_v55 = vsel %vm3937_vm1, %v803_v7, %v809_v5 }
 0x299   :  { %v837_v38 = vadd.f32 %v3014_v31, %v835_v3  ;;  %v801_v9 = vpop.permute.xlu0 %800  ;;  %v3071_v3 = vld [vmem:[#allocation6 + $0x4] ss:$0 sm:$0xff] }
 0x29b   :  { %v815_v10 = vpop.permute.xlu1 %814 }
 0x29c   :  { %v827_v15 = vsel %vm111_vm3, %v825_v55, %v815_v10 }
 0x29d   :  { %v807_v49 = vpop.permute.xlu0 %806 }
 0x29e   :  { %v824_v20 = vsel %vm3937_vm1, %v801_v9, %v807_v49 }
 0x29f   :  { %v821_v56 = vpop.permute.xlu1 %820 }
 0x2a0   :  { %v3038_v41 = vsel %vm114_vm4, %v827_v15, %v821_v56 }
 0x2a1   :  { %v863_v40 = vmul.f32 %v3034_v57, %v3038_v41  ;;  %v813_v17 = vpop.permute.xlu0 %812 }
 0x2a2   :  { %v826_v26 = vsel %vm111_vm3, %v824_v20, %v813_v17  ;;  %v3081_v17 = vld [vmem:[#allocation6 + $0x6] ss:$0 sm:$0xff] }
 0x2a3   :  { %v865_v18 = vadd.f32 %v3014_v31, %v863_v40  ;;  %v874_v50 = vpop.permute.xlu1 %873 }
 0x2a4   :  { %v890_v27 = vsel %vm3937_vm1, %v2850_v42, %v874_v50 }
 0x2a5   :  { %v819_v51 = vpop.permute.xlu0 %818 }
 0x2a6   :  { %v3048_v23 = vsel %vm114_vm4, %v826_v26, %v819_v51 }
 0x2a7   :  { %v844_v24 = vmul.f32 %v3045_v21, %v3048_v23  ;;  %v880_v53 = vpop.permute.xlu1 %879 }
 0x2a8   :  { %v892_v33 = vsel %vm111_vm3, %v890_v27, %v880_v53  ;;  %v2124_v53 = vld [vmem:[#allocation6 + $0x9] ss:$0 sm:$0xff] }
 0x2a9   :  { %v846_v22 = vadd.f32 %v3014_v31, %v844_v24  ;;  %v872_v52 = vpop.permute.xlu0 %871 }
 0x2aa   :  { %v889_v35 = vsel %vm3937_vm1, %v2862_v28, %v872_v52 }
 0x2ab   :  { %v886_v29 = vpop.permute.xlu1 %885 }
 0x2ac   :  { %v3059_v30 = vsel %vm114_vm4, %v892_v33, %v886_v29 }
 0x2ad   :  { %v949_v32 = vmul.f32 %v3055_v44, %v3059_v30  ;;  %v878_v34 = vpop.permute.xlu0 %877 }
 0x2ae   :  { %v891_v36 = vsel %vm111_vm3, %v889_v35, %v878_v34 }
 0x2af   :  { %v951_v63 = vadd.f32 %v949_v32, %v856_v46  ;;  %v898_v19 = vpop.permute.xlu1 %897 }
 0x2b1   :  { %v884_v42 = vpop.permute.xlu0 %883 }
 0x2b2   :  { %v3067_v61 = vsel %vm114_vm4, %v891_v36, %v884_v42  ;;  %v2122_v42 = vld [vmem:[#allocation6 + $0xb] ss:$0 sm:$0xff] }
 0x2b3   :  { %v930_v62 = vmul.f32 %v2118_v60, %v3067_v61  ;;  %v904_v54 = vpop.permute.xlu1 %903 }
 0x2b4   :  { %v920_v46 = vsel %vm3937_vm1, %v898_v19, %v904_v54 }
 0x2b5   :  { %v932_v7 = vadd.f32 %v930_v62, %v837_v38  ;;  %v896_v0 = vpop.permute.xlu0 %895 }
 0x2b7   :  { %v910_v45 = vpop.permute.xlu1 %909 }
 0x2b8   :  { %v922_v28 = vsel %vm111_vm3, %v920_v46, %v910_v45 }
 0x2b9   :  { %v902_v1 = vpop.permute.xlu0 %901 }
 0x2ba   :  { %v919_v38 = vsel %vm3937_vm1, %v896_v0, %v902_v1 }
 0x2bb   :  { %v916_v5 = vpop.permute.xlu1 %915 }
 0x2bc   :  { %v3075_v9 = vsel %vm114_vm4, %v922_v28, %v916_v5 }
 0x2bd   :  { %v958_v10 = vmul.f32 %v3071_v3, %v3075_v9  ;;  %v908_v49 = vpop.permute.xlu0 %907 }
 0x2be   :  { %v921_v56 = vsel %vm111_vm3, %v919_v38, %v908_v49 }
 0x2bf   :  { %v960_v55 = vadd.f32 %v958_v10, %v865_v18  ;;  %v969_v15 = vpop.permute.xlu1 %968 }
 0x2c0   :  { %v985_v18 = vsel %vm3937_vm1, %v2909_v47, %v969_v15 }
 0x2c1   :  { %v914_v40 = vpop.permute.xlu0 %913 }
 0x2c2   :  { %v3084_v50 = vsel %vm114_vm4, %v921_v56, %v914_v40  ;;  %v836_v40 = vmul.f32 %v3025_v13, %v3017_v37  ;;  %v757_v37 = vmul.f32 0.5, %v2548_v39 }
 0x2c3   :  { %v939_v20 = vmul.f32 %v3081_v17, %v3084_v50  ;;  %v975_v26 = vpop.permute.xlu1 %974 }
 0x2c4   :  { %v987_v52 = vsel %vm111_vm3, %v985_v18, %v975_v26 }
 0x2c5   :  { %v941_v51 = vadd.f32 %v939_v20, %v846_v22  ;;  %v967_v24 = vpop.permute.xlu0 %966 }
 0x2c6   :  { %v984_v35 = vsel %vm3937_vm1, %v2921_v11, %v967_v24  ;;  %v2123_v24 = vld [vmem:[#allocation6 + $0xa] ss:$0 sm:$0xff] }
 0x2c7   :  { %v981_v27 = vpop.permute.xlu1 %980 }
 0x2c8   :  { %v989_v33 = vsel %vm114_vm4, %v987_v52, %v981_v27  ;;  %v931_v52 = vmul.f32 %v2118_v60, %v3059_v30 }
 0x2c9   :  { %v1044_v29 = vmul.f32 %v2124_v53, %v989_v33  ;;  %v973_v32 = vpop.permute.xlu0 %972 }
 0x2ca   :  { %v986_v36 = vsel %vm111_vm3, %v984_v35, %v973_v32  ;;  %v1026_v32 = vmul.f32 %v2122_v42, %v989_v33 }
 0x2cb   :  { %v1046_v34 = vadd.f32 %v1044_v29, %v951_v63  ;;  %v993_v19 = vpop.permute.xlu1 %992  ;;  %v3099_v63 = vld [vmem:[#allocation6 + $0x8] ss:$0 sm:$0xff] }
 0x2cd   :  { %v979_v22 = vpop.permute.xlu0 %978 }
 0x2ce   :  { %v988_v62 = vsel %vm114_vm4, %v986_v36, %v979_v22  ;;  %v2126_v36 = vld [vmem:[#allocation6 + $0xf] ss:$0 sm:$0xff]  ;;  %v2128_v22 = vld [vmem:[#allocation6 + $0xd] ss:$0 sm:$0xff] }
 0x2cf   :  { %v1025_v47 = vmul.f32 %v2122_v42, %v988_v62  ;;  %v999_v54 = vpop.permute.xlu1 %998 }
 0x2d0   :  { %v1015_v28 = vsel %vm3937_vm1, %v993_v19, %v999_v54 }
 0x2d1   :  { %v3096_v0 = vadd.f32 %v1025_v47, %v932_v7  ;;  %v991_v45 = vpop.permute.xlu0 %990  ;;  %v853_v47 = vmul.f32 %v3008_v25, %v3028_v48 }
 0x2d3   :  { %v1005_v1 = vpop.permute.xlu1 %1004 }
 0x2d4   :  { %v1017_v5 = vsel %vm111_vm3, %v1015_v28, %v1005_v1  ;;  %v855_v28 = vadd.f32 %v3014_v31, %v853_v47 }
 0x2d5   :  { %v997_v46 = vpop.permute.xlu0 %996 }
 0x2d6   :  { %v1014_v7 = vsel %vm3937_vm1, %v991_v45, %v997_v46  ;;  %v759_v46 = vadd.f32 1.0, %v757_v37 }
 0x2d7   :  { %v1011_v11 = vpop.permute.xlu1 %1010 }
 0x2d8   :  { %v1019_v10 = vsel %vm114_vm4, %v1017_v5, %v1011_v11  ;;  %v1043_v5 = vmul.f32 %v2124_v53, %v988_v62 }
 0x2d9   :  { %v1053_v49 = vmul.f32 %v3099_v63, %v1019_v10  ;;  %v1003_v15 = vpop.permute.xlu0 %1002 }
 0x2da   :  { %v1016_v20 = vsel %vm111_vm3, %v1014_v7, %v1003_v15 }
 0x2db   :  { %v3104_v38 = vadd.f32 %v1053_v49, %v960_v55  ;;  %v1064_v56 = vpop.permute.xlu1 %1063  ;;  %v838_v55 = vadd.f32 %v3014_v31, %v836_v40  ;;  %v845_v49 = vmul.f32 %v3045_v21, %v3038_v41  ;;  %v761_v21 = vmul.f32 0.5, %v2537_v43 }
 0x2dc   :  { %v1080_v13 = vsel %vm3937_vm1, %v2968_v58, %v1064_v56  ;;  %v753_v58 = vmul.f32 0.5, %v2528_v12 }
 0x2dd   :  { %v1009_v26 = vpop.permute.xlu0 %1008  ;;  %v933_v30 = vadd.f32 %v931_v52, %v838_v55  ;;  %v3155_v55 = vmul.f32 0.5, %v2504_v14 }
 0x2de   :  { %v3111_v18 = vsel %vm114_vm4, %v1016_v20, %v1009_v26  ;;  %v847_v20 = vadd.f32 %v3014_v31, %v845_v49 }
 0x2df   :  { %v1034_v27 = vmul.f32 %v2123_v24, %v3111_v18  ;;  %v1070_v29 = vpop.permute.xlu1 %1069  ;;  %v1028_v33 = vadd.f32 %v1026_v32, %v933_v30 }
 0x2e0   :  { %v1082_v60 = vsel %vm111_vm3, %v1080_v13, %v1070_v29  ;;  %v763_v29 = vadd.f32 1.0, %v761_v21 }
 0x2e1   :  { %v3116_v19 = vadd.f32 %v1034_v27, %v941_v51  ;;  %v1062_v35 = vpop.permute.xlu0 %1061  ;;  %v948_v51 = vmul.f32 %v3055_v44, %v3067_v61  ;;  %v756_v44 = vmul.f32 0.5, %v2615_v6 }
 0x2e2   :  { %v1079_v15 = vsel %vm3937_vm1, %v2980_v59, %v1062_v35  ;;  %v752_v59 = vmul.f32 0.5, %v2507_v16 }
 0x2e3   :  { %v1076_v54 = vpop.permute.xlu1 %1075  ;;  %v950_v61 = vadd.f32 %v948_v51, %v855_v28  ;;  %v758_v26 = vadd.f32 1.0, %v756_v44 }
 0x2e4   :  { %v1084_v45 = vsel %vm114_vm4, %v1082_v60, %v1076_v54 }
 0x2e5   :  { %v1121_v42 = vmul.f32 %v2126_v36, %v1084_v45  ;;  %v1139_v39 = vmul.f32 %v2128_v22, %v1084_v45  ;;  %v1068_v1 = vpop.permute.xlu0 %1067  ;;  %v1045_v6 = vadd.f32 %v1043_v5, %v950_v61 }
 0x2e6   :  { %v1081_v53 = vsel %vm111_vm3, %v1079_v15, %v1068_v1 }
 0x2e7   :  { %v1123_v25 = vadd.f32 %v1121_v42, %v1028_v33  ;;  %v1141_v48 = vadd.f32 %v1139_v39, %v1046_v34  ;;  %v1088_v11 = vpop.permute.xlu1 %1087  ;;  %v940_v34 = vmul.f32 %v3081_v17, %v3075_v9  ;;  %v862_v9 = vmul.f32 %v3034_v57, %v3048_v23  ;;  %v2129_v42 = vld [vmem:[#allocation6 + $0xc] ss:$0 sm:$0xff] }
 0x2e8   :  { %v1035_v17 = vmul.f32 %v2123_v24, %v1019_v10  ;;  %v3161_v23 = vadd.f32 1.0, %v752_v59  ;;  %v957_v10 = vmul.f32 %v3071_v3, %v3084_v50 }
 0x2e9   :  { %v3136_v56 = vmul.f32 %v1154_v4, %v1123_v25  ;;  %v3138_v12 = vmul.f32 %v1141_v48, %v759_v46  ;;  %v1074_v62 = vpop.permute.xlu0 %1073  ;;  %v3148_v4 = vadd.f32 1.0, %v753_v58  ;;  %v942_v27 = vadd.f32 %v940_v34, %v847_v20 }
 0x2ea   :  { %v1083_v41 = vsel %vm114_vm4, %v1081_v53, %v1074_v62 }
 0x2eb   :  { %v1120_v7 = vmul.f32 %v2126_v36, %v1083_v41  ;;  %v1138_v40 = vmul.f32 %v2128_v22, %v1083_v41  ;;  %1282 = vrot.lane.b32.xlu1 %v3136_v56, %s2258_s29  ;;  %v1094_v2 = vpop.permute.xlu1 %1093  ;;  %v1163_v57 = vrot.slane %v3148_v4, 1  ;;  %v1037_v24 = vadd.f32 %v1035_v17, %v942_v27 }
 0x2ec   :  { %v1110_v14 = vsel %vm3937_vm1, %v1088_v11, %v1094_v2  ;;  %v1202_v13 = vrot.slane %v3138_v12, 1 }
 0x2ed   :  { %v1122_v43 = vadd.f32 %v1120_v7, %v3096_v0  ;;  %v1140_v52 = vadd.f32 %v1138_v40, %v1045_v6  ;;  %v1086_v16 = vpop.permute.xlu0 %1085  ;;  %v864_v0 = vadd.f32 %v3014_v31, %v862_v9  ;;  %v2127_v31 = vld [vmem:[#allocation6 + $0xe] ss:$0 sm:$0xff] }
 0x2ef   :  { %v1158_v32 = vmul.f32 %v2578_v8, %v1122_v43  ;;  %v1169_v35 = vmul.f32 %v1140_v52, %v758_v26  ;;  %1300 = vrot.lane.b32.xlu1 %v3136_v56, %s2265_s2  ;;  %v1100_v37 = vpop.permute.xlu1 %1099  ;;  %v1052_v8 = vmul.f32 %v3099_v63, %v3111_v18  ;;  %v959_v6 = vadd.f32 %v957_v10, %v864_v0 }
 0x2f0   :  { %v1112_v22 = vsel %vm111_vm3, %v1110_v14, %v1100_v37 }
 0x2f1   :  { %v1174_v36 = vrot.slane %v1158_v32, 7  ;;  %v1092_v47 = vpop.permute.xlu0 %1091  ;;  %v1177_v30 = vrot.slane %v1169_v35, 7  ;;  %v1179_v60 = vrot.slane %v1158_v32, 6  ;;  %v1187_v54 = vrot.slane %v1158_v32, 4 }
 0x2f2   :  { %v1189_v45 = vrot.slane %v1169_v35, 4  ;;  %v1181_v51 = vrot.slane %v1169_v35, 6  ;;  %v1183_v33 = vrot.slane %v1158_v32, 5  ;;  %v1185_v3 = vrot.slane %v1169_v35, 5 }
 0x2f3   :  { %v1191_v50 = vrot.slane %v1158_v32, 3  ;;  %1318 = vrot.lane.b32.xlu1 %v3136_v56, %s2266_s13  ;;  %v1106_v63 = vpop.permute.xlu1 %1105  ;;  %v1193_v18 = vrot.slane %v1169_v35, 3  ;;  %v1195_v39 = vrot.slane %v1158_v32, 2  ;;  %v1204_v1 = vsel %vm80_vm2, %v1158_v32, %v1169_v35 }
 0x2f4   :  { %v1211_v46 = vsel %vm80_vm2, %v1187_v54, %v1189_v45  ;;  %v1197_v58 = vrot.slane %v1169_v35, 2  ;;  %v1205_v28 = vsel %vm431_vm5, %v1204_v1, %v1174_v36  ;;  %v1114_v25 = vsel %vm114_vm4, %v1112_v22, %v1106_v63 }
 0x2f5   :  { %v1212_v5 = vsel %vm431_vm5, %v1211_v46, %v1191_v50  ;;  %v1098_v48 = vpop.permute.xlu0 %1097  ;;  %v1206_v11 = vsel %vm433_vm6, %v1205_v28, %v1177_v30  ;;  %v1130_v15 = vmul.f32 %v2127_v31, %v1114_v25  ;;  %v1148_v44 = vmul.f32 %v2129_v42, %v1114_v25 }
 0x2f6   :  { %v1213_v49 = vsel %vm433_vm6, %v1212_v5, %v1193_v18  ;;  %v1199_v61 = vrot.slane %v1158_v32, 1  ;;  %v1207_v12 = vsel %vm435_vm7, %v1206_v11, %v1179_v60  ;;  %v1109_v62 = vsel %vm3937_vm1, %v1086_v16, %v1092_v47  ;;  %vm3948_vm1 = vmmov %vm3947_vm15 }
 0x2f7   :  { %v1214_v53 = vsel %vm435_vm7, %v1213_v49, %v1195_v39  ;;  %1336 = vrot.lane.b32.xlu1 %v3136_v56, %s2267_s14  ;;  %v1208_v34 = vsel %vm437_vm8, %v1207_v12, %v1181_v51  ;;  %v1132_v21 = vadd.f32 %v1130_v15, %v1037_v24  ;;  %v1150_v59 = vadd.f32 %v1148_v44, %v3104_v38 }
 0x2f8   :  { %v1215_v41 = vsel %vm437_vm8, %v1214_v53, %v1197_v58  ;;  %v1209_v7 = vsel %vm3945_vm9, %v1208_v34, %v1183_v33  ;;  %v1111_v2 = vsel %vm111_vm3, %v1109_v62, %v1098_v48  ;;  %v1162_v38 = vrot.slane %v3161_v23, 1 }
 0x2f9   :  { %v1216_v40 = vsel %vm3946_vm10, %v1215_v41, %v1199_v61  ;;  %v1104_v20 = vpop.permute.xlu0 %1103  ;;  %v3192_v9 = vsel %vm3947_vm15, %v1209_v7, %v1185_v3  ;;  %v3199_v26 = vmul.f32 %v1163_v57, %v1132_v21  ;;  %v1172_v43 = vmul.f32 %v1150_v59, %v763_v29 }
 0x2fa   :  { %v3195_v17 = vsel %vm3948_vm1, %v1216_v40, %v1202_v13  ;;  %v1113_v52 = vsel %vm114_vm4, %v1111_v2, %v1104_v20  ;;  %v1054_v16 = vadd.f32 %v1052_v8, %v959_v6  ;;  %v762_v35 = vadd.f32 1.0, %v3155_v55  ;;  %vm3951_vm4 = vmmov %vm3948_vm1 }
 0x2fb   :  { %1354 = vrot.lane.b32.xlu1 %v3136_v56, %s2283_s4  ;;  %v1129_v27 = vmul.f32 %v2127_v31, %v1113_v52  ;;  %v1147_v32 = vmul.f32 %v2129_v42, %v1113_v52  ;;  %1270 = vrot.lane.b32.xlu0 %v3199_v26, %s2258_s29  ;;  %v1164_v29 = vsel %vm3948_vm1, %v1162_v38, %v1163_v57  ;;  %v1247_v42 = vrot.slane %v1172_v43, 1 }
 0x2fc   :  { %vm1431_vm10 = vcmask 80896   ;;  %vm1435_vm15 = vcmask 89088  }
 0x2fd   :  { %v1131_v37 = vadd.f32 %v1129_v27, %v3116_v19  ;;  %v1149_v0 = vadd.f32 %v1147_v32, %v1054_v16 }
 0x2ff   :  { %1372 = vrot.lane.b32.xlu1 %v3136_v56, %s2284_s30  ;;  %v1167_v23 = vmul.f32 %v1164_v29, %v1131_v37  ;;  %v1171_v10 = vmul.f32 %v1149_v0, %v762_v35  ;;  %1291 = vrot.lane.b32.xlu0 %v3199_v26, %s2265_s2 }
 0x301   :  { %v1219_v24 = vrot.slane %v1167_v23, 7  ;;  %v1222_v14 = vrot.slane %v1171_v10, 7  ;;  %v1232_v8 = vrot.slane %v1167_v23, 4  ;;  %v1234_v55 = vrot.slane %v1171_v10, 4 }
 0x302   :  { %v1236_v19 = vrot.slane %v1167_v23, 3  ;;  %v1238_v4 = vrot.slane %v1171_v10, 3  ;;  %v1249_v57 = vsel %vm80_vm2, %v1167_v23, %v1171_v10  ;;  %v1224_v36 = vrot.slane %v1167_v23, 6 }
 0x303   :  { %1390 = vrot.lane.b32.xlu1 %v3136_v56, %s2285_s7  ;;  %1309 = vrot.lane.b32.xlu0 %v3199_v26, %s2266_s13  ;;  %v1256_v13 = vsel %vm80_vm2, %v1232_v8, %v1234_v55  ;;  %v1240_v22 = vrot.slane %v1167_v23, 2  ;;  %v1250_v47 = vsel %vm431_vm5, %v1249_v57, %v1219_v24  ;;  %v1226_v60 = vrot.slane %v1171_v10, 6  ;;  %vm3949_vm2 = vmmov %vm3945_vm9 }
 0x304   :  { %v1257_v30 = vsel %vm431_vm5, %v1256_v13, %v1236_v19  ;;  %v1242_v54 = vrot.slane %v1171_v10, 2  ;;  %v1251_v45 = vsel %vm433_vm6, %v1250_v47, %v1222_v14  ;;  %v1228_v51 = vrot.slane %v1167_v23, 5  ;;  %vm3950_vm3 = vmmov %vm3949_vm2 }
 0x305   :  { %v1258_v31 = vsel %vm433_vm6, %v1257_v30, %v1238_v4  ;;  %v1244_v33 = vrot.slane %v1167_v23, 1  ;;  %v1252_v3 = vsel %vm435_vm7, %v1251_v45, %v1224_v36  ;;  %v1230_v63 = vrot.slane %v1171_v10, 5  ;;  %vm3952_vm5 = vmmov %vm3948_vm1 }
 0x306   :  { %v1259_v50 = vsel %vm435_vm7, %v1258_v31, %v1240_v22  ;;  %v1253_v18 = vsel %vm437_vm8, %v1252_v3, %v1226_v60  ;;  %vm3953_vm6 = vcmask 48128   ;;  %vm3954_vm7 = vcmask 56320  }
 0x307   :  { %1459 = vrot.lane.b32.xlu1 %v3136_v56, %s2256_s6  ;;  %1327 = vrot.lane.b32.xlu0 %v3199_v26, %s2267_s14  ;;  %v1260_v39 = vsel %vm437_vm8, %v1259_v50, %v1242_v54  ;;  %v1254_v1 = vsel %vm3949_vm2, %v1253_v18, %v1228_v51  ;;  %vm3955_vm8 = vcmask 64512   ;;  %vm3956_vm9 = vcmask 72704  }
 0x308   :  { %v1261_v46 = vsel %vm3950_vm3, %v1260_v39, %v1244_v33  ;;  %v3237_v58 = vsel %vm3951_vm4, %v1254_v1, %v1230_v63  ;;  %vm1439_vm1 = vcmask 97280   ;;  %vm1443_vm2 = vcmask 105472  }
 0x309   :  { %v3240_v28 = vsel %vm3952_vm5, %v1261_v46, %v1247_v42  ;;  %vm1447_vm3 = vcmask 113664   ;;  %vm1451_vm4 = vcmask 121856   ;;  %vm3944_vm5 = vcmask 130048  }
 0x30b   :  { %1486 = vrot.lane.b32.xlu1 %v3199_v26, %s2268_s15  ;;  %1345 = vrot.lane.b32.xlu0 %v3199_v26, %s2283_s4 }
 0x30f   :  { %1504 = vrot.lane.b32.xlu1 %v3199_v26, %s2269_s16  ;;  %1363 = vrot.lane.b32.xlu0 %v3199_v26, %s2284_s30 }
 0x313   :  { %1522 = vrot.lane.b32.xlu1 %v3199_v26, %s2270_s1  ;;  %1381 = vrot.lane.b32.xlu0 %v3199_v26, %s2285_s7 }
 0x317   :  { %1540 = vrot.lane.b32.xlu1 %v3199_v26, %s2271_s17  ;;  %1399 = vrot.lane.b32.xlu0 %v3199_v26, %s2256_s6 }
 0x31b   :  { %1558 = vrot.lane.b32.xlu1 %v3199_v26, %s2286_s9  ;;  %1477 = vrot.lane.b32.xlu0 %v3136_v56, %s2280_s27 }
 0x31f   :  { %1576 = vrot.lane.b32.xlu1 %v3199_v26, %s2287_s10  ;;  %1495 = vrot.lane.b32.xlu0 %v3136_v56, %s2268_s15 }
 0x323   :  { %1594 = vrot.lane.b32.xlu1 %v3199_v26, %s2288_s11  ;;  %1513 = vrot.lane.b32.xlu0 %v3136_v56, %s2269_s16 }
 0x327   :  { %1612 = vrot.lane.b32.xlu1 %v3199_v26, %s2259_s3  ;;  %1531 = vrot.lane.b32.xlu0 %v3136_v56, %s2270_s1 }
 0x32b   :  { %1682 = vrot.lane.b32.xlu1 %v3136_v56, %s2281_s28  ;;  %1549 = vrot.lane.b32.xlu0 %v3136_v56, %s2271_s17 }
 0x32f   :  { %1700 = vrot.lane.b32.xlu1 %v3136_v56, %s2272_s18  ;;  %1567 = vrot.lane.b32.xlu0 %v3136_v56, %s2286_s9 }
 0x333   :  { %1278 = vrot.lane.b32.xlu1 %v3192_v9, %s2258_s29  ;;  %1585 = vrot.lane.b32.xlu0 %v3136_v56, %s2287_s10 }
 0x337   :  { %1296 = vrot.lane.b32.xlu1 %v3192_v9, %s2265_s2  ;;  %1603 = vrot.lane.b32.xlu0 %v3136_v56, %s2288_s11 }
 0x33b   :  { %1314 = vrot.lane.b32.xlu1 %v3192_v9, %s2266_s13  ;;  %1666 = vrot.lane.b32.xlu0 %v3136_v56, %s2259_s3 }
 0x33f   :  { %1332 = vrot.lane.b32.xlu1 %v3192_v9, %s2267_s14  ;;  %1691 = vrot.lane.b32.xlu0 %v3199_v26, %s2272_s18 }
 0x343   :  { %1350 = vrot.lane.b32.xlu1 %v3192_v9, %s2283_s4  ;;  %1709 = vrot.lane.b32.xlu0 %v3199_v26, %s2273_s19 }
 0x347   :  { %1368 = vrot.lane.b32.xlu1 %v3192_v9, %s2284_s30  ;;  %1266 = vrot.lane.b32.xlu0 %v3237_v58, %s2258_s29 }
 0x34b   :  { %1386 = vrot.lane.b32.xlu1 %v3192_v9, %s2285_s7  ;;  %1287 = vrot.lane.b32.xlu0 %v3237_v58, %s2265_s2 }
 0x34f   :  { %1455 = vrot.lane.b32.xlu1 %v3192_v9, %s2256_s6  ;;  %1305 = vrot.lane.b32.xlu0 %v3237_v58, %s2266_s13 }
 0x353   :  { %1482 = vrot.lane.b32.xlu1 %v3237_v58, %s2268_s15  ;;  %1323 = vrot.lane.b32.xlu0 %v3237_v58, %s2267_s14 }
 0x357   :  { %1500 = vrot.lane.b32.xlu1 %v3237_v58, %s2269_s16  ;;  %1341 = vrot.lane.b32.xlu0 %v3237_v58, %s2283_s4 }
 0x35b   :  { %1518 = vrot.lane.b32.xlu1 %v3237_v58, %s2270_s1  ;;  %1359 = vrot.lane.b32.xlu0 %v3237_v58, %s2284_s30 }
 0x35d   :  { %v1283_v5 = vpop.permute.xlu1 %1282 }
 0x35f   :  { %1536 = vrot.lane.b32.xlu1 %v3237_v58, %s2271_s17  ;;  %1377 = vrot.lane.b32.xlu0 %v3237_v58, %s2285_s7 }
 0x361   :  { %v1301_v25 = vpop.permute.xlu1 %1300 }
 0x363   :  { %1554 = vrot.lane.b32.xlu1 %v3237_v58, %s2286_s9  ;;  %1395 = vrot.lane.b32.xlu0 %v3237_v58, %s2256_s6 }
 0x365   :  { %v1319_v48 = vpop.permute.xlu1 %1318 }
 0x367   :  { %1572 = vrot.lane.b32.xlu1 %v3237_v58, %s2287_s10  ;;  %1473 = vrot.lane.b32.xlu0 %v3192_v9, %s2280_s27 }
 0x369   :  { %v1337_v11 = vpop.permute.xlu1 %1336 }
 0x36b   :  { %1590 = vrot.lane.b32.xlu1 %v3237_v58, %s2288_s11  ;;  %1491 = vrot.lane.b32.xlu0 %v3192_v9, %s2268_s15 }
 0x36d   :  { %v1355_v49 = vpop.permute.xlu1 %1354  ;;  %v1271_v15 = vpop.permute.xlu0 %1270 }
 0x36e   :  { %v1406_v44 = vsel %vm73_vm0, %v3136_v56, %v1271_v15 }
 0x36f   :  { %1608 = vrot.lane.b32.xlu1 %v3237_v58, %s2259_s3  ;;  %1509 = vrot.lane.b32.xlu0 %v3192_v9, %s2269_s16  ;;  %v1409_v12 = vsel %vm3941_vm11, %v1406_v44, %v1283_v5 }
 0x371   :  { %v1373_v61 = vpop.permute.xlu1 %1372  ;;  %v1292_v53 = vpop.permute.xlu0 %1291 }
 0x372   :  { %v1412_v62 = vsel %vm3940_vm12, %v1409_v12, %v1292_v53 }
 0x373   :  { %1678 = vrot.lane.b32.xlu1 %v3192_v9, %s2281_s28  ;;  %1527 = vrot.lane.b32.xlu0 %v3192_v9, %s2270_s1  ;;  %v1415_v41 = vsel %vm3942_vm13, %v1412_v62, %v1301_v25 }
 0x375   :  { %v1391_v34 = vpop.permute.xlu1 %1390  ;;  %v1310_v21 = vpop.permute.xlu0 %1309 }
 0x376   :  { %v1418_v59 = vsel %vm3939_vm14, %v1415_v41, %v1310_v21 }
 0x377   :  { %1696 = vrot.lane.b32.xlu1 %v3192_v9, %s2272_s18  ;;  %1545 = vrot.lane.b32.xlu0 %v3192_v9, %s2271_s17  ;;  %v1421_v7 = vsel %vm3953_vm6, %v1418_v59, %v1319_v48  ;;  %vm3938_vm6 = vcmask 131072  }
 0x379   :  { %v1460_v6 = vpop.permute.xlu1 %1459  ;;  %v1328_v40 = vpop.permute.xlu0 %1327 }
 0x37a   :  { %v1424_v2 = vsel %vm3954_vm7, %v1421_v7, %v1328_v40  ;;  %vm3957_vm7 = vcmask 48128  }
 0x37b   :  { %1714 = vrot.lane.b32.xlu1 %v3192_v9, %s2273_s19  ;;  %1563 = vrot.lane.b32.xlu0 %v3192_v9, %s2286_s9  ;;  %v1427_v43 = vsel %vm3955_vm8, %v1424_v2, %v1337_v11  ;;  %vm3958_vm8 = vcmask 56320  }
 0x37d   :  { %v1487_v20 = vpop.permute.xlu1 %1486  ;;  %v1346_v38 = vpop.permute.xlu0 %1345 }
 0x37e   :  { %v1430_v52 = vsel %vm3956_vm9, %v1427_v43, %v1346_v38  ;;  %vm3959_vm9 = vcmask 64512  }
 0x37f   :  { %1268 = vrot.lane.b32.xlu1 %v3240_v28, %s2258_s29  ;;  %1581 = vrot.lane.b32.xlu0 %v3192_v9, %s2287_s10  ;;  %v1434_v27 = vsel %vm1431_vm10, %v1430_v52, %v1355_v49 }
 0x381   :  { %v1505_v16 = vpop.permute.xlu1 %1504  ;;  %v1364_v32 = vpop.permute.xlu0 %1363 }
 0x382   :  { %v1438_v35 = vsel %vm1435_vm15, %v1434_v27, %v1364_v32 }
 0x383   :  { %1289 = vrot.lane.b32.xlu1 %v3240_v28, %s2265_s2  ;;  %1599 = vrot.lane.b32.xlu0 %v3192_v9, %s2288_s11  ;;  %v1442_v0 = vsel %vm1439_vm1, %v1438_v35, %v1373_v61 }
 0x385   :  { %v1523_v37 = vpop.permute.xlu1 %1522  ;;  %v1382_v29 = vpop.permute.xlu0 %1381 }
 0x386   :  { %v1446_v23 = vsel %vm1443_vm2, %v1442_v0, %v1382_v29 }
 0x387   :  { %1307 = vrot.lane.b32.xlu1 %v3240_v28, %s2266_s13  ;;  %1662 = vrot.lane.b32.xlu0 %v3192_v9, %s2259_s3  ;;  %v1450_v24 = vsel %vm1447_vm3, %v1446_v23, %v1391_v34 }
 0x389   :  { %v1541_v10 = vpop.permute.xlu1 %1540  ;;  %v1400_v14 = vpop.permute.xlu0 %1399 }
 0x38a   :  { %v1454_v8 = vsel %vm1451_vm4, %v1450_v24, %v1400_v14 }
 0x38b   :  { %1325 = vrot.lane.b32.xlu1 %v3240_v28, %s2267_s14  ;;  %v1467_v55 = vsel %vm3944_vm5, %v1454_v8, %v1460_v6  ;;  %1687 = vrot.lane.b32.xlu0 %v3237_v58, %s2272_s18 }
 0x38c   :  { %1472 = vst.msk [vmem:[%s3931_s5 + $0x10] sm:$0x1] %vm3938_vm6, %v1467_v55 }
 0x38d   :  { %v1559_v19 = vpop.permute.xlu1 %1558  ;;  %v1478_v4 = vpop.permute.xlu0 %1477 }
 0x38e   :  { %v1619_v13 = vsel %vm73_vm0, %v1478_v4, %v1487_v20 }
 0x38f   :  { %1343 = vrot.lane.b32.xlu1 %v3240_v28, %s2283_s4  ;;  %1705 = vrot.lane.b32.xlu0 %v3237_v58, %s2273_s19 }
 0x391   :  { %v1577_v57 = vpop.permute.xlu1 %1576  ;;  %v1496_v36 = vpop.permute.xlu0 %1495 }
 0x392   :  { %v1622_v22 = vsel %vm3941_vm11, %v1619_v13, %v1496_v36 }
 0x393   :  { %1361 = vrot.lane.b32.xlu1 %v3240_v28, %s2284_s30  ;;  %1280 = vrot.lane.b32.xlu0 %v3195_v17, %s2258_s29  ;;  %v1625_v30 = vsel %vm3940_vm12, %v1622_v22, %v1505_v16 }
 0x395   :  { %v1595_v47 = vpop.permute.xlu1 %1594  ;;  %v1514_v60 = vpop.permute.xlu0 %1513 }
 0x396   :  { %v1628_v54 = vsel %vm3942_vm13, %v1625_v30, %v1514_v60 }
 0x397   :  { %1379 = vrot.lane.b32.xlu1 %v3240_v28, %s2285_s7  ;;  %1298 = vrot.lane.b32.xlu0 %v3195_v17, %s2265_s2  ;;  %v1631_v31 = vsel %vm3939_vm14, %v1628_v54, %v1523_v37 }
 0x399   :  { %v1613_v45 = vpop.permute.xlu1 %1612  ;;  %v1532_v51 = vpop.permute.xlu0 %1531 }
 0x39a   :  { %v1634_v33 = vsel %vm3957_vm7, %v1631_v31, %v1532_v51  ;;  %vm3960_vm7 = vcmask 72704  }
 0x39b   :  { %1397 = vrot.lane.b32.xlu1 %v3240_v28, %s2256_s6  ;;  %1316 = vrot.lane.b32.xlu0 %v3195_v17, %s2266_s13  ;;  %v1637_v50 = vsel %vm3958_vm8, %v1634_v33, %v1541_v10  ;;  %vm3961_vm8 = vcmask 48128   ;;  %s2289_s13 = smov 115  }
 0x39d   :  { %v3417_v3 = vpop.permute.xlu1 %1682  ;;  %v1550_v42 = vpop.permute.xlu0 %1549 }
 0x39e   :  { %v1640_v63 = vsel %vm3959_vm9, %v1637_v50, %v1550_v42  ;;  %vm3962_vm9 = vcmask 56320  }
 0x39f   :  { %1475 = vrot.lane.b32.xlu1 %v3195_v17, %s2280_s27  ;;  %1334 = vrot.lane.b32.xlu0 %v3195_v17, %s2267_s14  ;;  %v1643_v39 = vsel %vm3960_vm7, %v1640_v63, %v1559_v19  ;;  %vm3963_vm7 = vcmask 64512   ;;  %s2290_s14 = smov 116  }
 0x3a1   :  { %v3425_v18 = vpop.permute.xlu1 %1700  ;;  %v1568_v1 = vpop.permute.xlu0 %1567 }
 0x3a2   :  { %v1646_v46 = vsel %vm1431_vm10, %v1643_v39, %v1568_v1 }
 0x3a3   :  { %1493 = vrot.lane.b32.xlu1 %v3195_v17, %s2268_s15  ;;  %1352 = vrot.lane.b32.xlu0 %v3195_v17, %s2283_s4  ;;  %v1649_v25 = vsel %vm1435_vm15, %v1646_v46, %v1577_v57 }
 0x3a5   :  { %v1279_v5 = vpop.permute.xlu1 %1278  ;;  %v1586_v48 = vpop.permute.xlu0 %1585 }
 0x3a6   :  { %v1652_v11 = vsel %vm1439_vm1, %v1649_v25, %v1586_v48 }
 0x3a7   :  { %1511 = vrot.lane.b32.xlu1 %v3195_v17, %s2269_s16  ;;  %1370 = vrot.lane.b32.xlu0 %v3195_v17, %s2284_s30  ;;  %v1655_v15 = vsel %vm1443_vm2, %v1652_v11, %v1595_v47 }
 0x3a9   :  { %v1297_v49 = vpop.permute.xlu1 %1296  ;;  %v1604_v44 = vpop.permute.xlu0 %1603 }
 0x3aa   :  { %v1658_v61 = vsel %vm1447_vm3, %v1655_v15, %v1604_v44 }
 0x3ab   :  { %1529 = vrot.lane.b32.xlu1 %v3195_v17, %s2270_s1  ;;  %1388 = vrot.lane.b32.xlu0 %v3195_v17, %s2285_s7  ;;  %v1661_v53 = vsel %vm1451_vm4, %v1658_v61, %v1613_v45 }
 0x3ad   :  { %v1315_v12 = vpop.permute.xlu1 %1314  ;;  %v1667_v62 = vpop.permute.xlu0 %1666 }
 0x3ae   :  { %v1673_v34 = vsel %vm3944_vm5, %v1661_v53, %v1667_v62 }
 0x3af   :  { %1547 = vrot.lane.b32.xlu1 %v3195_v17, %s2271_s17  ;;  %2132 = vst.msk [vmem:[%s3931_s5 + $0x28] sm:$0x1] %vm3938_vm6, %v1673_v34  ;;  %1457 = vrot.lane.b32.xlu0 %v3195_v17, %s2256_s6  ;;  %vm3964_vm6 = vcmask 72704  }
 0x3b1   :  { %v1333_v41 = vpop.permute.xlu1 %1332  ;;  %v3455_v21 = vpop.permute.xlu0 %1691 }
 0x3b3   :  { %1565 = vrot.lane.b32.xlu1 %v3195_v17, %s2286_s9  ;;  %1484 = vrot.lane.b32.xlu0 %v3240_v28, %s2268_s15 }
 0x3b5   :  { %v1351_v59 = vpop.permute.xlu1 %1350  ;;  %v3461_v6 = vpop.permute.xlu0 %1709 }
 0x3b7   :  { %1583 = vrot.lane.b32.xlu1 %v3195_v17, %s2287_s10  ;;  %1502 = vrot.lane.b32.xlu0 %v3240_v28, %s2269_s16 }
 0x3b9   :  { %v1369_v7 = vpop.permute.xlu1 %1368  ;;  %v1267_v40 = vpop.permute.xlu0 %1266 }
 0x3ba   :  { %v1404_v2 = vsel %vm73_vm0, %v3192_v9, %v1267_v40 }
 0x3bb   :  { %1601 = vrot.lane.b32.xlu1 %v3195_v17, %s2288_s11  ;;  %1520 = vrot.lane.b32.xlu0 %v3240_v28, %s2270_s1  ;;  %v1407_v43 = vsel %vm3941_vm11, %v1404_v2, %v1279_v5  ;;  %s2291_s1 = smov 117  }
 0x3bd   :  { %v1387_v20 = vpop.permute.xlu1 %1386  ;;  %v1288_v38 = vpop.permute.xlu0 %1287 }
 0x3be   :  { %v1410_v52 = vsel %vm3940_vm12, %v1407_v43, %v1288_v38 }
 0x3bf   :  { %1664 = vrot.lane.b32.xlu1 %v3195_v17, %s2259_s3  ;;  %1538 = vrot.lane.b32.xlu0 %v3240_v28, %s2271_s17  ;;  %v1413_v27 = vsel %vm3942_vm13, %v1410_v52, %v1297_v49  ;;  %s2292_s17 = smov 118  }
 0x3c1   :  { %v1456_v16 = vpop.permute.xlu1 %1455  ;;  %v1306_v32 = vpop.permute.xlu0 %1305 }
 0x3c2   :  { %v1416_v35 = vsel %vm3939_vm14, %v1413_v27, %v1306_v32 }
 0x3c3   :  { %1689 = vrot.lane.b32.xlu1 %v3240_v28, %s2272_s18  ;;  %1556 = vrot.lane.b32.xlu0 %v3240_v28, %s2286_s9  ;;  %v1419_v0 = vsel %vm3961_vm8, %v1416_v35, %v1315_v12 }
 0x3c5   :  { %v1483_v37 = vpop.permute.xlu1 %1482  ;;  %v1324_v29 = vpop.permute.xlu0 %1323 }
 0x3c6   :  { %v1422_v23 = vsel %vm3962_vm9, %v1419_v0, %v1324_v29 }
 0x3c7   :  { %1707 = vrot.lane.b32.xlu1 %v3240_v28, %s2273_s19  ;;  %1574 = vrot.lane.b32.xlu0 %v3240_v28, %s2287_s10  ;;  %v1425_v24 = vsel %vm3963_vm7, %v1422_v23, %v1333_v41 }
 0x3c9   :  { %v1501_v10 = vpop.permute.xlu1 %1500  ;;  %v1342_v14 = vpop.permute.xlu0 %1341 }
 0x3ca   :  { %v1428_v8 = vsel %vm3964_vm6, %v1425_v24, %v1342_v14  ;;  %vm3943_vm6 = vcmask 138240  }
 0x3cb   :  { %1718 = vrot.lane.b32.xlu1 %v3136_v56, %s2273_s19  ;;  %1592 = vrot.lane.b32.xlu0 %v3240_v28, %s2288_s11  ;;  %v1432_v19 = vsel %vm1431_vm10, %v1428_v8, %v1351_v59 }
 0x3cd   :  { %v1519_v55 = vpop.permute.xlu1 %1518  ;;  %v1360_v4 = vpop.permute.xlu0 %1359 }
 0x3ce   :  { %v1436_v57 = vsel %vm1435_vm15, %v1432_v19, %v1360_v4 }
 0x3cf   :  { %1725 = vrot.lane.b32.xlu1 %v3240_v28, %s2274_s20  ;;  %1610 = vrot.lane.b32.xlu0 %v3240_v28, %s2259_s3  ;;  %v1440_v36 = vsel %vm1439_vm1, %v1436_v57, %v1369_v7 }
 0x3d1   :  { %v1537_v13 = vpop.permute.xlu1 %1536  ;;  %v1378_v22 = vpop.permute.xlu0 %1377 }
 0x3d2   :  { %v1444_v47 = vsel %vm1443_vm2, %v1440_v36, %v1378_v22 }
 0x3d3   :  { %1732 = vrot.lane.b32.xlu1 %v3192_v9, %s2274_s20  ;;  %1680 = vrot.lane.b32.xlu0 %v3195_v17, %s2281_s28  ;;  %v1448_v60 = vsel %vm1447_vm3, %v1444_v47, %v1387_v20 }
 0x3d5   :  { %v1555_v30 = vpop.permute.xlu1 %1554  ;;  %v1396_v54 = vpop.permute.xlu0 %1395 }
 0x3d6   :  { %v1452_v45 = vsel %vm1451_vm4, %v1448_v60, %v1396_v54 }
 0x3d7   :  { %1736 = vrot.lane.b32.xlu1 %v3136_v56, %s2274_s20  ;;  %v1465_v31 = vsel %vm3944_vm5, %v1452_v45, %v1456_v16  ;;  %1698 = vrot.lane.b32.xlu0 %v3195_v17, %s2272_s18 }
 0x3d8   :  { %1469 = vst.msk [vmem:[%s3931_s5] sm:$0xff] %vm3943_vm6, %v1465_v31 }
 0x3d9   :  { %v1573_v51 = vpop.permute.xlu1 %1572  ;;  %v1474_v33 = vpop.permute.xlu0 %1473 }
 0x3da   :  { %v1617_v42 = vsel %vm73_vm0, %v1474_v33, %v1483_v37 }
 0x3db   :  { %1743 = vrot.lane.b32.xlu1 %v3240_v28, %s2275_s22  ;;  %1716 = vrot.lane.b32.xlu0 %v3195_v17, %s2273_s19 }
 0x3dd   :  { %v1591_v50 = vpop.permute.xlu1 %1590  ;;  %v1492_v63 = vpop.permute.xlu0 %1491 }
 0x3de   :  { %v1620_v39 = vsel %vm3941_vm11, %v1617_v42, %v1492_v63 }
 0x3df   :  { %1750 = vrot.lane.b32.xlu1 %v3192_v9, %s2275_s22  ;;  %1723 = vrot.lane.b32.xlu0 %v3237_v58, %s2274_s20  ;;  %v1623_v46 = vsel %vm3940_vm12, %v1620_v39, %v1501_v10 }
 0x3e1   :  { %v1609_v1 = vpop.permute.xlu1 %1608  ;;  %v1510_v5 = vpop.permute.xlu0 %1509 }
 0x3e2   :  { %v1626_v25 = vsel %vm3942_vm13, %v1623_v46, %v1510_v5 }
 0x3e3   :  { %1754 = vrot.lane.b32.xlu1 %v3136_v56, %s2275_s22  ;;  %1727 = vrot.lane.b32.xlu0 %v3199_v26, %s2274_s20  ;;  %v1629_v11 = vsel %vm3939_vm14, %v1626_v25, %v1519_v55 }
 0x3e5   :  { %v3536_v48 = vpop.permute.xlu1 %1678  ;;  %v1528_v49 = vpop.permute.xlu0 %1527 }
 0x3e6   :  { %v1632_v15 = vsel %vm3961_vm8, %v1629_v11, %v1528_v49  ;;  %vm3965_vm8 = vcmask 72704  }
 0x3e7   :  { %1761 = vrot.lane.b32.xlu1 %v3240_v28, %s2289_s13  ;;  %1734 = vrot.lane.b32.xlu0 %v3195_v17, %s2274_s20  ;;  %v1635_v61 = vsel %vm3962_vm9, %v1632_v15, %v1537_v13  ;;  %vm3966_vm9 = vcmask 48128  }
 0x3e9   :  { %v3544_v44 = vpop.permute.xlu1 %1696  ;;  %v1546_v12 = vpop.permute.xlu0 %1545 }
 0x3ea   :  { %v1638_v53 = vsel %vm3963_vm7, %v1635_v61, %v1546_v12  ;;  %vm3967_vm7 = vcmask 56320  }
 0x3eb   :  { %1768 = vrot.lane.b32.xlu1 %v3192_v9, %s2289_s13  ;;  %1741 = vrot.lane.b32.xlu0 %v3237_v58, %s2275_s22  ;;  %v1641_v34 = vsel %vm3965_vm8, %v1638_v53, %v1555_v30  ;;  %vm3968_vm8 = vcmask 64512  }
 0x3ed   :  { %v3552_v62 = vpop.permute.xlu1 %1714  ;;  %v1564_v41 = vpop.permute.xlu0 %1563 }
 0x3ee   :  { %v1644_v59 = vsel %vm1431_vm10, %v1641_v34, %v1564_v41 }
 0x3ef   :  { %1772 = vrot.lane.b32.xlu1 %v3136_v56, %s2289_s13  ;;  %1745 = vrot.lane.b32.xlu0 %v3199_v26, %s2275_s22  ;;  %v1647_v40 = vsel %vm1435_vm15, %v1644_v59, %v1573_v51 }
 0x3f1   :  { %v1269_v7 = vpop.permute.xlu1 %1268  ;;  %v1582_v2 = vpop.permute.xlu0 %1581 }
 0x3f2   :  { %v1650_v20 = vsel %vm1439_vm1, %v1647_v40, %v1582_v2  ;;  %v1405_v14 = vsel %vm73_vm0, %v3195_v17, %v1269_v7 }
 0x3f3   :  { %1779 = vrot.lane.b32.xlu1 %v3240_v28, %s2290_s14  ;;  %1752 = vrot.lane.b32.xlu0 %v3195_v17, %s2275_s22  ;;  %v1653_v38 = vsel %vm1443_vm2, %v1650_v20, %v1591_v50 }
 0x3f5   :  { %v1290_v43 = vpop.permute.xlu1 %1289  ;;  %v1600_v52 = vpop.permute.xlu0 %1599 }
 0x3f6   :  { %v1656_v16 = vsel %vm1447_vm3, %v1653_v38, %v1600_v52 }
 0x3f7   :  { %1786 = vrot.lane.b32.xlu1 %v3192_v9, %s2290_s14  ;;  %1759 = vrot.lane.b32.xlu0 %v3237_v58, %s2289_s13  ;;  %v1659_v32 = vsel %vm1451_vm4, %v1656_v16, %v1609_v1 }
 0x3f9   :  { %v1308_v27 = vpop.permute.xlu1 %1307  ;;  %v1663_v35 = vpop.permute.xlu0 %1662 }
 0x3fa   :  { %v1671_v37 = vsel %vm3944_vm5, %v1659_v32, %v1663_v35 }
 0x3fb   :  { %1790 = vrot.lane.b32.xlu1 %v3136_v56, %s2290_s14  ;;  %2130 = vst.msk [vmem:[%s3931_s5 + $0x18] sm:$0xff] %vm3943_vm6, %v1671_v37  ;;  %1763 = vrot.lane.b32.xlu0 %v3199_v26, %s2289_s13 }
 0x3fd   :  { %v1326_v0 = vpop.permute.xlu1 %1325  ;;  %v3582_v29 = vpop.permute.xlu0 %1687 }
 0x3ff   :  { %1797 = vrot.lane.b32.xlu1 %v3240_v28, %s2291_s1  ;;  %1770 = vrot.lane.b32.xlu0 %v3195_v17, %s2289_s13 }
 0x401   :  { %v1344_v23 = vpop.permute.xlu1 %1343  ;;  %v3588_v10 = vpop.permute.xlu0 %1705 }
 0x403   :  { %1804 = vrot.lane.b32.xlu1 %v3192_v9, %s2291_s1  ;;  %1777 = vrot.lane.b32.xlu0 %v3237_v58, %s2290_s14 }
 0x405   :  { %v1362_v24 = vpop.permute.xlu1 %1361  ;;  %v1281_v8 = vpop.permute.xlu0 %1280 }
 0x406   :  { %v1408_v55 = vsel %vm3941_vm11, %v1405_v14, %v1281_v8 }
 0x407   :  { %1808 = vrot.lane.b32.xlu1 %v3136_v56, %s2291_s1  ;;  %1781 = vrot.lane.b32.xlu0 %v3199_v26, %s2290_s14  ;;  %v1411_v4 = vsel %vm3940_vm12, %v1408_v55, %v1290_v43 }
 0x409   :  { %v1380_v19 = vpop.permute.xlu1 %1379  ;;  %v1299_v57 = vpop.permute.xlu0 %1298 }
 0x40a   :  { %v1414_v13 = vsel %vm3942_vm13, %v1411_v4, %v1299_v57 }
 0x40b   :  { %1815 = vrot.lane.b32.xlu1 %v3240_v28, %s2292_s17  ;;  %1788 = vrot.lane.b32.xlu0 %v3195_v17, %s2290_s14  ;;  %v1417_v22 = vsel %vm3939_vm14, %v1414_v13, %v1308_v27 }
 0x40d   :  { %v1398_v36 = vpop.permute.xlu1 %1397  ;;  %v1317_v47 = vpop.permute.xlu0 %1316 }
 0x40e   :  { %v1420_v30 = vsel %vm3966_vm9, %v1417_v22, %v1317_v47  ;;  %vm3969_vm9 = vcmask 72704  }
 0x40f   :  { %1867 = vrot.lane.b32.xlu1 %v3192_v9, %s2292_s17  ;;  %1795 = vrot.lane.b32.xlu0 %v3237_v58, %s2291_s1  ;;  %v1423_v54 = vsel %vm3967_vm7, %v1420_v30, %v1326_v0  ;;  %vm3970_vm7 = vcmask 48128  }
 0x411   :  { %v1476_v60 = vpop.permute.xlu1 %1475  ;;  %v1335_v45 = vpop.permute.xlu0 %1334 }
 0x412   :  { %v1426_v31 = vsel %vm3968_vm8, %v1423_v54, %v1335_v45  ;;  %vm3971_vm8 = vcmask 56320  }
 0x413   :  { %1871 = vrot.lane.b32.xlu1 %v3136_v56, %s2292_s17  ;;  %1799 = vrot.lane.b32.xlu0 %v3199_v26, %s2291_s1  ;;  %v1429_v33 = vsel %vm3969_vm9, %v1426_v31, %v1344_v23  ;;  %vm3972_vm9 = vcmask 64512  }
 0x415   :  { %v1494_v51 = vpop.permute.xlu1 %1493  ;;  %v1353_v50 = vpop.permute.xlu0 %1352 }
 0x416   :  { %v1433_v42 = vsel %vm1431_vm10, %v1429_v33, %v1353_v50 }
 0x417   :  { %1885 = vrot.lane.b32.xlu1 %v3195_v17, %s2282_s0  ;;  %1806 = vrot.lane.b32.xlu0 %v3195_v17, %s2291_s1  ;;  %v1437_v39 = vsel %vm1435_vm15, %v1433_v42, %v1362_v24 }
 0x419   :  { %v1512_v63 = vpop.permute.xlu1 %1511  ;;  %v1371_v1 = vpop.permute.xlu0 %1370 }
 0x41a   :  { %v1441_v46 = vsel %vm1439_vm1, %v1437_v39, %v1371_v1 }
 0x41b   :  { %1892 = vrot.lane.b32.xlu1 %v3237_v58, %s2276_s23  ;;  %1813 = vrot.lane.b32.xlu0 %v3237_v58, %s2292_s17  ;;  %v1445_v25 = vsel %vm1443_vm2, %v1441_v46, %v1380_v19 }
 0x41d   :  { %v1530_v5 = vpop.permute.xlu1 %1529  ;;  %v1389_v11 = vpop.permute.xlu0 %1388 }
 0x41e   :  { %v1449_v49 = vsel %vm1447_vm3, %v1445_v25, %v1389_v11 }
 0x41f   :  { %1896 = vrot.lane.b32.xlu1 %v3199_v26, %s2276_s23  ;;  %1817 = vrot.lane.b32.xlu0 %v3199_v26, %s2292_s17  ;;  %v1453_v61 = vsel %vm1451_vm4, %v1449_v49, %v1398_v36 }
 0x421   :  { %v1548_v15 = vpop.permute.xlu1 %1547  ;;  %v1458_v12 = vpop.permute.xlu0 %1457 }
 0x422   :  { %v1466_v53 = vsel %vm3944_vm5, %v1453_v61, %v1458_v12 }
 0x423   :  { %1903 = vrot.lane.b32.xlu1 %v3195_v17, %s2276_s23  ;;  %1470 = vst.msk [vmem:[%s3931_s5 + $0x8] sm:$0xff] %vm3943_vm6, %v1466_v53  ;;  %1869 = vrot.lane.b32.xlu0 %v3195_v17, %s2292_s17 }
 0x425   :  { %v1566_v34 = vpop.permute.xlu1 %1565  ;;  %v1485_v41 = vpop.permute.xlu0 %1484 }
 0x426   :  { %v1618_v59 = vsel %vm73_vm0, %v1476_v60, %v1485_v41 }
 0x427   :  { %1910 = vrot.lane.b32.xlu1 %v3237_v58, %s2277_s24  ;;  %1883 = vrot.lane.b32.xlu0 %v3192_v9, %s2282_s0  ;;  %v1621_v40 = vsel %vm3941_vm11, %v1618_v59, %v1494_v51 }
 0x429   :  { %v1584_v7 = vpop.permute.xlu1 %1583  ;;  %v1503_v2 = vpop.permute.xlu0 %1502 }
 0x42a   :  { %v1624_v20 = vsel %vm3940_vm12, %v1621_v40, %v1503_v2 }
 0x42b   :  { %1914 = vrot.lane.b32.xlu1 %v3199_v26, %s2277_s24  ;;  %1887 = vrot.lane.b32.xlu0 %v3136_v56, %s2282_s0  ;;  %v1627_v38 = vsel %vm3942_vm13, %v1624_v20, %v1512_v63 }
 0x42d   :  { %v1602_v43 = vpop.permute.xlu1 %1601  ;;  %v1521_v52 = vpop.permute.xlu0 %1520 }
 0x42e   :  { %v1630_v16 = vsel %vm3939_vm14, %v1627_v38, %v1521_v52  ;;  %vm3973_vm14 = vcmask 72704  }
 0x42f   :  { %1921 = vrot.lane.b32.xlu1 %v3195_v17, %s2277_s24  ;;  %1894 = vrot.lane.b32.xlu0 %v3240_v28, %s2276_s23  ;;  %v1633_v32 = vsel %vm3970_vm7, %v1630_v16, %v1530_v5  ;;  %v1822_v16 = vsel %vm73_vm0, %v3536_v48, %v3582_v29 }
 0x431   :  { %v1665_v27 = vpop.permute.xlu1 %1664  ;;  %v1539_v35 = vpop.permute.xlu0 %1538 }
 0x432   :  { %v1636_v37 = vsel %vm3971_vm8, %v1633_v32, %v1539_v35 }
 0x433   :  { %1928 = vrot.lane.b32.xlu1 %v3237_v58, %s2278_s25  ;;  %1901 = vrot.lane.b32.xlu0 %v3192_v9, %s2276_s23  ;;  %v1639_v23 = vsel %vm3972_vm9, %v1636_v37, %v1548_v15  ;;  %vm3976_vm9 = vcmask 56320  }
 0x435   :  { %v1690_v0 = vpop.permute.xlu1 %1689  ;;  %v1557_v24 = vpop.permute.xlu0 %1556 }
 0x436   :  { %v1642_v14 = vsel %vm3973_vm14, %v1639_v23, %v1557_v24  ;;  %vm3974_vm14 = vcmask 39936  }
 0x437   :  { %1932 = vrot.lane.b32.xlu1 %v3199_v26, %s2278_s25  ;;  %1905 = vrot.lane.b32.xlu0 %v3136_v56, %s2276_s23  ;;  %v1645_v55 = vsel %vm1431_vm10, %v1642_v14, %v1566_v34  ;;  %s2293_s23 = smov 106   ;;  %vm3975_vm8 = vmmov %vm3974_vm14 }
 0x439   :  { %v1708_v8 = vpop.permute.xlu1 %1707  ;;  %v1575_v19 = vpop.permute.xlu0 %1574 }
 0x43a   :  { %v1648_v4 = vsel %vm1435_vm15, %v1645_v55, %v1575_v19 }
 0x43b   :  { %1939 = vrot.lane.b32.xlu1 %v3195_v17, %s2278_s25  ;;  %1912 = vrot.lane.b32.xlu0 %v3240_v28, %s2277_s24  ;;  %v1651_v13 = vsel %vm1439_vm1, %v1648_v4, %v1584_v7 }
 0x43d   :  { %v3682_v57 = vpop.permute.xlu1 %1718  ;;  %v1593_v36 = vpop.permute.xlu0 %1592 }
 0x43e   :  { %v1654_v22 = vsel %vm1443_vm2, %v1651_v13, %v1593_v36 }
 0x43f   :  { %1946 = vrot.lane.b32.xlu1 %v3237_v58, %s2279_s26  ;;  %1919 = vrot.lane.b32.xlu0 %v3192_v9, %s2277_s24  ;;  %v1657_v30 = vsel %vm1447_vm3, %v1654_v22, %v1602_v43 }
 0x441   :  { %v3690_v47 = vpop.permute.xlu1 %1725  ;;  %v1611_v60 = vpop.permute.xlu0 %1610 }
 0x442   :  { %v1660_v54 = vsel %vm1451_vm4, %v1657_v30, %v1611_v60 }
 0x443   :  { %1950 = vrot.lane.b32.xlu1 %v3199_v26, %s2279_s26  ;;  %v1672_v45 = vsel %vm3944_vm5, %v1660_v54, %v1665_v27  ;;  %1923 = vrot.lane.b32.xlu0 %v3136_v56, %s2277_s24  ;;  %s2294_s24 = smov 107  }
 0x444   :  { %2131 = vst.msk [vmem:[%s3931_s5 + $0x20] sm:$0xff] %vm3943_vm6, %v1672_v45 }
 0x445   :  { %v3703_v31 = vpop.permute.xlu1 %1732  ;;  %v1681_v51 = vpop.permute.xlu0 %1680 }
 0x446   :  { %v1823_v33 = vsel %vm73_vm0, %v1681_v51, %v1690_v0 }
 0x447   :  { %1957 = vrot.lane.b32.xlu1 %v3195_v17, %s2279_s26  ;;  %1930 = vrot.lane.b32.xlu0 %v3240_v28, %s2278_s25 }
 0x449   :  { %v3710_v50 = vpop.permute.xlu1 %1736  ;;  %v1699_v42 = vpop.permute.xlu0 %1698 }
 0x44a   :  { %v1826_v63 = vsel %vm3941_vm11, %v1823_v33, %v1699_v42 }
 0x44b   :  { %1964 = vrot.lane.b32.xlu1 %v3237_v58, %s2293_s23  ;;  %1937 = vrot.lane.b32.xlu0 %v3192_v9, %s2278_s25  ;;  %v3718_v39 = vsel %vm3940_vm12, %v1826_v63, %v1708_v8 }
 0x44d   :  { %v3720_v1 = vpop.permute.xlu1 %1743  ;;  %v1717_v46 = vpop.permute.xlu0 %1716 }
 0x44e   :  { %v1832_v23 = vsel %vm3942_vm13, %v3718_v39, %v1717_v46 }
 0x44f   :  { %1968 = vrot.lane.b32.xlu1 %v3199_v26, %s2293_s23  ;;  %1941 = vrot.lane.b32.xlu0 %v3136_v56, %s2278_s25  ;;  %s2295_s25 = smov 108  }
 0x451   :  { %v3726_v5 = vpop.permute.xlu1 %1750  ;;  %v1724_v25 = vpop.permute.xlu0 %1723 }
 0x453   :  { %1975 = vrot.lane.b32.xlu1 %v3195_v17, %s2293_s23  ;;  %1948 = vrot.lane.b32.xlu0 %v3240_v28, %s2279_s26 }
 0x455   :  { %v3732_v11 = vpop.permute.xlu1 %1754  ;;  %v1728_v49 = vpop.permute.xlu0 %1727 }
 0x457   :  { %1982 = vrot.lane.b32.xlu1 %v3237_v58, %s2294_s24  ;;  %1955 = vrot.lane.b32.xlu0 %v3192_v9, %s2279_s26 }
 0x459   :  { %v3738_v15 = vpop.permute.xlu1 %1761  ;;  %v1735_v61 = vpop.permute.xlu0 %1734 }
 0x45b   :  { %1986 = vrot.lane.b32.xlu1 %v3199_v26, %s2294_s24  ;;  %1959 = vrot.lane.b32.xlu0 %v3136_v56, %s2279_s26  ;;  %s2296_s26 = smov 109  }
 0x45d   :  { %v1769_v12 = vpop.permute.xlu1 %1768  ;;  %v1742_v53 = vpop.permute.xlu0 %1741 }
 0x45f   :  { %1993 = vrot.lane.b32.xlu1 %v3195_v17, %s2294_s24  ;;  %1966 = vrot.lane.b32.xlu0 %v3240_v28, %s2293_s23 }
 0x461   :  { %v3748_v34 = vpop.permute.xlu1 %1772  ;;  %v1746_v41 = vpop.permute.xlu0 %1745 }
 0x463   :  { %2000 = vrot.lane.b32.xlu1 %v3237_v58, %s2295_s25  ;;  %1973 = vrot.lane.b32.xlu0 %v3192_v9, %s2293_s23 }
 0x465   :  { %v3754_v59 = vpop.permute.xlu1 %1779  ;;  %v1753_v7 = vpop.permute.xlu0 %1752 }
 0x467   :  { %2004 = vrot.lane.b32.xlu1 %v3199_v26, %s2295_s25  ;;  %1977 = vrot.lane.b32.xlu0 %v3136_v56, %s2293_s23 }
 0x469   :  { %v1787_v40 = vpop.permute.xlu1 %1786  ;;  %v1760_v2 = vpop.permute.xlu0 %1759 }
 0x46b   :  { %2011 = vrot.lane.b32.xlu1 %v3195_v17, %s2295_s25  ;;  %1984 = vrot.lane.b32.xlu0 %v3240_v28, %s2294_s24 }
 0x46d   :  { %v1791_v20 = vpop.permute.xlu1 %1790  ;;  %v1764_v43 = vpop.permute.xlu0 %1763 }
 0x46f   :  { %2018 = vrot.lane.b32.xlu1 %v3237_v58, %s2296_s26  ;;  %1991 = vrot.lane.b32.xlu0 %v3192_v9, %s2294_s24  ;;  %v1825_v58 = vsel %vm3941_vm11, %v1822_v16, %v3544_v44 }
 0x470   :  { %v1828_v35 = vsel %vm3940_vm12, %v1825_v58, %v3588_v10 }
 0x471   :  { %v3768_v38 = vpop.permute.xlu1 %1797  ;;  %v1771_v52 = vpop.permute.xlu0 %1770  ;;  %v1831_v29 = vsel %vm3942_vm13, %v1828_v35, %v3552_v62 }
 0x472   :  { %v1834_v44 = vsel %vm3974_vm14, %v1831_v29, %v1724_v25  ;;  %vm3977_vm14 = vmmov %vm3975_vm8 }
 0x473   :  { %2022 = vrot.lane.b32.xlu1 %v3199_v26, %s2296_s26  ;;  %1995 = vrot.lane.b32.xlu0 %v3136_v56, %s2294_s24  ;;  %v1824_v26 = vsel %vm73_vm0, %v3417_v3, %v3455_v21  ;;  %v1837_v21 = vsel %vm3970_vm7, %v1834_v44, %v3703_v31 }
 0x474   :  { %v1827_v10 = vsel %vm3941_vm11, %v1824_v26, %v3425_v18  ;;  %v1840_v18 = vsel %vm3976_vm9, %v1837_v21, %v1742_v53 }
 0x475   :  { %v1805_v27 = vpop.permute.xlu1 %1804  ;;  %v1778_v32 = vpop.permute.xlu0 %1777 }
 0x477   :  { %2074 = vrot.lane.b32.xlu1 %v3195_v17, %s2296_s26  ;;  %2002 = vrot.lane.b32.xlu0 %v3240_v28, %s2295_s25  ;;  %v1830_v17 = vsel %vm3940_vm12, %v1827_v10, %v3461_v6  ;;  %v1835_v6 = vsel %vm3977_vm14, %v1832_v23, %v3690_v47  ;;  %vm3978_vm12 = vmmov %vm3970_vm7  ;;  %vm3979_vm7 = vcmask 64512  }
 0x478   :  { %v1833_v3 = vsel %vm3942_vm13, %v1830_v17, %v3682_v57  ;;  %v1843_v55 = vsel %vm3979_vm7, %v1840_v18, %v3726_v5  ;;  %vm3980_vm11 = vmmov %vm3978_vm12 }
 0x479   :  { %v1809_v48 = vpop.permute.xlu1 %1808  ;;  %v1782_v37 = vpop.permute.xlu0 %1781  ;;  %v1836_v24 = vsel %vm3975_vm8, %v1833_v3, %v1728_v49  ;;  %v1838_v4 = vsel %vm3980_vm11, %v1835_v6, %v1735_v61  ;;  %vm3981_vm13 = vmmov %vm3976_vm9  ;;  %vm3982_vm8 = vcmask 72704  }
 0x47a   :  { %v1839_v8 = vsel %vm3978_vm12, %v1836_v24, %v3710_v50  ;;  %v1846_v13 = vsel %vm3982_vm8, %v1843_v55, %v1760_v2  ;;  %v1841_v22 = vsel %vm3976_vm9, %v1838_v4, %v3720_v1  ;;  %vm3983_vm14 = vmmov %vm3979_vm7 }
 0x47b   :  { %2009 = vrot.lane.b32.xlu0 %v3192_v9, %s2295_s25  ;;  %v1842_v57 = vsel %vm3981_vm13, %v1839_v8, %v1746_v41  ;;  %v1849_v30 = vsel %vm1431_vm10, %v1846_v13, %v1769_v12  ;;  %vm3984_vm12 = vmmov %vm3979_vm7  ;;  %vm3987_vm7 = vcmask 131072  }
 0x47c   :  { %v1845_v47 = vsel %vm3983_vm14, %v1842_v57, %v3732_v11  ;;  %v1844_v54 = vsel %vm3984_vm12, %v1841_v22, %v1753_v7  ;;  %vm3985_vm11 = vmmov %vm3982_vm8  ;;  %v1852_v31 = vsel %vm1435_vm15, %v1849_v30, %v1778_v32  ;;  %vm3990_vm14 = vcmask 23552  }
 0x47d   :  { %v1816_v0 = vpop.permute.xlu1 %1815  ;;  %v1789_v62 = vpop.permute.xlu0 %1788  ;;  %v1848_v45 = vsel %vm3985_vm11, %v1845_v47, %v1764_v43  ;;  %vm3986_vm13 = vmmov %vm3982_vm8  ;;  %v1855_v50 = vsel %vm1439_vm1, %v1852_v31, %v1787_v40  ;;  %vm3988_vm8 = vcmask 15360  }
 0x47e   :  { %v1847_v51 = vsel %vm3986_vm13, %v1844_v54, %v3738_v15  ;;  %v1851_v33 = vsel %vm1431_vm10, %v1848_v45, %v3748_v34  ;;  %vm3989_vm9 = vmmov %vm3988_vm8  ;;  %vm3994_vm13 = vcmask 31744  }
 0x47f   :  { %2013 = vrot.lane.b32.xlu0 %v3136_v56, %s2295_s25  ;;  %v1850_v63 = vsel %vm1431_vm10, %v1847_v51, %v1771_v52  ;;  %v1854_v39 = vsel %vm1435_vm15, %v1851_v33, %v1782_v37  ;;  %vm3991_vm12 = vmmov %vm3988_vm8 }
 0x480   :  { %v1853_v46 = vsel %vm1435_vm15, %v1850_v63, %v3754_v59  ;;  %v1857_v5 = vsel %vm1439_vm1, %v1854_v39, %v1791_v20  ;;  %vm3992_vm11 = vmmov %vm3990_vm14 }
 0x481   :  { %v1868_v14 = vpop.permute.xlu1 %1867  ;;  %v1796_v19 = vpop.permute.xlu0 %1795  ;;  %v1856_v49 = vsel %vm1439_vm1, %v1853_v46, %v1789_v62 }
 0x482   :  { %v1858_v1 = vsel %vm1443_vm2, %v1855_v50, %v1796_v19  ;;  %v1859_v53 = vsel %vm1443_vm2, %v1856_v49, %v3768_v38 }
 0x483   :  { %2020 = vrot.lane.b32.xlu0 %v3240_v28, %s2296_s26  ;;  %v1861_v25 = vsel %vm1447_vm3, %v1858_v1, %v1805_v27 }
 0x485   :  { %v1872_v36 = vpop.permute.xlu1 %1871  ;;  %v1800_v60 = vpop.permute.xlu0 %1799 }
 0x486   :  { %v1860_v15 = vsel %vm1443_vm2, %v1857_v5, %v1800_v60 }
 0x487   :  { %2072 = vrot.lane.b32.xlu0 %v3192_v9, %s2296_s26  ;;  %v1863_v34 = vsel %vm1447_vm3, %v1860_v15, %v1809_v48 }
 0x489   :  { %v1886_v28 = vpop.permute.xlu1 %1885  ;;  %v1807_v42 = vpop.permute.xlu0 %1806 }
 0x48a   :  { %v1862_v59 = vsel %vm1447_vm3, %v1859_v53, %v1807_v42 }
 0x48b   :  { %2076 = vrot.lane.b32.xlu0 %v3136_v56, %s2296_s26  ;;  %v1865_v20 = vsel %vm1451_vm4, %v1862_v59, %v1816_v0 }
 0x48d   :  { %v1893_v9 = vpop.permute.xlu1 %1892  ;;  %v1814_v11 = vpop.permute.xlu0 %1813 }
 0x48e   :  { %v1864_v61 = vsel %vm1451_vm4, %v1861_v25, %v1814_v11 }
 0x48f   :  { %v1876_v12 = vsel %vm3944_vm5, %v1864_v61, %v1868_v14 }
 0x490   :  { %2133 = vst.msk [vmem:[%s3931_s5 + $0x30] sm:$0xff] %vm3943_vm6, %v1876_v12 }
 0x491   :  { %v1897_v56 = vpop.permute.xlu1 %1896  ;;  %v1818_v41 = vpop.permute.xlu0 %1817 }
 0x492   :  { %v1866_v7 = vsel %vm1451_vm4, %v1863_v34, %v1818_v41 }
 0x493   :  { %v1878_v40 = vsel %vm3944_vm5, %v1866_v7, %v1872_v36 }
 0x494   :  { %2135 = vst.msk [vmem:[%s3931_s5 + $0x40] sm:$0x1] %vm3987_vm7, %v1878_v40  ;;  %vm3995_vm7 = vmmov %vm3994_vm13 }
 0x495   :  { %v1904_v2 = vpop.permute.xlu1 %1903  ;;  %v1870_v43 = vpop.permute.xlu0 %1869 }
 0x496   :  { %v1877_v38 = vsel %vm3944_vm5, %v1865_v20, %v1870_v43  ;;  %vm4004_vm5 = vcmask 64512  }
 0x497   :  { %2134 = vst.msk [vmem:[%s3931_s5 + $0x38] sm:$0xff] %vm3943_vm6, %v1877_v38  ;;  %vm4001_vm6 = vcmask 56320  }
 0x499   :  { %v1911_v52 = vpop.permute.xlu1 %1910  ;;  %v1884_v16 = vpop.permute.xlu0 %1883 }
 0x49a   :  { %v2027_v27 = vsel %vm73_vm0, %v1884_v16, %v1893_v9 }
 0x49d   :  { %v1915_v58 = vpop.permute.xlu1 %1914  ;;  %v1888_v32 = vpop.permute.xlu0 %1887 }
 0x49e   :  { %v2029_v35 = vsel %vm73_vm0, %v1888_v32, %v1897_v56 }
 0x4a1   :  { %v1922_v26 = vpop.permute.xlu1 %1921  ;;  %v1895_v48 = vpop.permute.xlu0 %1894 }
 0x4a2   :  { %v2028_v29 = vsel %vm73_vm0, %v1886_v28, %v1895_v48  ;;  %vm3993_vm0 = vmmov %vm3992_vm11 }
 0x4a3   :  { %v2031_v37 = vsel %vm3988_vm8, %v2028_v29, %v1904_v2  ;;  %vm3996_vm8 = vcmask 39936  }
 0x4a5   :  { %v1929_v44 = vpop.permute.xlu1 %1928  ;;  %v1902_v10 = vpop.permute.xlu0 %1901 }
 0x4a6   :  { %v2030_v17 = vsel %vm3989_vm9, %v2027_v27, %v1902_v10  ;;  %vm3997_vm9 = vmmov %vm3996_vm8 }
 0x4a7   :  { %v2033_v0 = vsel %vm3990_vm14, %v2030_v17, %v1911_v52  ;;  %vm3998_vm14 = vcmask 48128  }
 0x4a9   :  { %v1933_v3 = vpop.permute.xlu1 %1932  ;;  %v1906_v21 = vpop.permute.xlu0 %1905 }
 0x4aa   :  { %v2032_v62 = vsel %vm3991_vm12, %v2029_v35, %v1906_v21  ;;  %vm3999_vm12 = vmmov %vm3995_vm7 }
 0x4ab   :  { %v2035_v23 = vsel %vm3992_vm11, %v2032_v62, %v1915_v58  ;;  %vm4000_vm11 = vmmov %vm3998_vm14 }
 0x4ad   :  { %v1940_v24 = vpop.permute.xlu1 %1939  ;;  %v1913_v18 = vpop.permute.xlu0 %1912 }
 0x4ae   :  { %v2034_v39 = vsel %vm3993_vm0, %v2031_v37, %v1913_v18  ;;  %vm4002_vm0 = vmmov %vm3996_vm8 }
 0x4af   :  { %v2037_v9 = vsel %vm3994_vm13, %v2034_v39, %v1922_v26  ;;  %vm4003_vm13 = vmmov %vm4001_vm6 }
 0x4b1   :  { %v1947_v14 = vpop.permute.xlu1 %1946  ;;  %v1920_v6 = vpop.permute.xlu0 %1919 }
 0x4b2   :  { %v2036_v5 = vsel %vm3995_vm7, %v2033_v0, %v1920_v6  ;;  %vm4005_vm7 = vmmov %vm4000_vm11 }
 0x4b3   :  { %v2039_v49 = vsel %vm3997_vm9, %v2036_v5, %v1929_v44  ;;  %vm4007_vm9 = vcmask 72704  }
 0x4b5   :  { %v1951_v8 = vpop.permute.xlu1 %1950  ;;  %v1924_v55 = vpop.permute.xlu0 %1923 }
 0x4b6   :  { %v2038_v12 = vsel %vm3999_vm12, %v2035_v23, %v1924_v55  ;;  %vm4009_vm12 = vmmov %vm4007_vm9 }
 0x4b7   :  { %v2041_v34 = vsel %vm4002_vm0, %v2038_v12, %v1933_v3 }
 0x4b9   :  { %v1958_v19 = vpop.permute.xlu1 %1957  ;;  %v1931_v4 = vpop.permute.xlu0 %1930 }
 0x4ba   :  { %v2040_v25 = vsel %vm3996_vm8, %v2037_v9, %v1931_v4  ;;  %vm4006_vm8 = vmmov %vm4004_vm5 }
 0x4bb   :  { %v2043_v15 = vsel %vm3998_vm14, %v2040_v25, %v1940_v24  ;;  %vm4008_vm14 = vmmov %vm4001_vm6 }
 0x4bd   :  { %v1965_v57 = vpop.permute.xlu1 %1964  ;;  %v1938_v13 = vpop.permute.xlu0 %1937 }
 0x4be   :  { %v2042_v56 = vsel %vm4000_vm11, %v2039_v49, %v1938_v13  ;;  %vm4012_vm11 = vcmask 130048  }
 0x4bf   :  { %v2045_v41 = vsel %vm4003_vm13, %v2042_v56, %v1947_v14  ;;  %vm4016_vm0 = vmmov %vm4012_vm11  ;;  %vm4017_vm13 = vcmask 131072  }
 0x4c1   :  { %v1969_v36 = vpop.permute.xlu1 %1968  ;;  %v1942_v22 = vpop.permute.xlu0 %1941 }
 0x4c2   :  { %v2044_v40 = vsel %vm4005_vm7, %v2041_v34, %v1942_v22 }
 0x4c3   :  { %v2047_v38 = vsel %vm4008_vm14, %v2044_v40, %v1951_v8 }
 0x4c5   :  { %v1976_v47 = vpop.permute.xlu1 %1975  ;;  %v1949_v30 = vpop.permute.xlu0 %1948 }
 0x4c6   :  { %v2046_v53 = vsel %vm4001_vm6, %v2043_v15, %v1949_v30  ;;  %vm4010_vm6 = vmmov %vm4004_vm5 }
 0x4c7   :  { %v2049_v59 = vsel %vm4004_vm5, %v2046_v53, %v1958_v19  ;;  %vm4011_vm5 = vmmov %vm4007_vm9 }
 0x4c9   :  { %v1983_v60 = vpop.permute.xlu1 %1982  ;;  %v1956_v54 = vpop.permute.xlu0 %1955 }
 0x4ca   :  { %v2048_v2 = vsel %vm4006_vm8, %v2045_v41, %v1956_v54 }
 0x4cb   :  { %v2051_v52 = vsel %vm4009_vm12, %v2048_v2, %v1965_v57 }
 0x4cd   :  { %v1987_v45 = vpop.permute.xlu1 %1986  ;;  %v1960_v31 = vpop.permute.xlu0 %1959 }
 0x4ce   :  { %v2050_v58 = vsel %vm4010_vm6, %v2047_v38, %v1960_v31 }
 0x4cf   :  { %v2053_v48 = vsel %vm4011_vm5, %v2050_v58, %v1969_v36 }
 0x4d1   :  { %v1967_v28 = vpop.permute.xlu0 %1966  ;;  %v1994_v51 = vpop.permute.xlu1 %1993 }
 0x4d2   :  { %v2052_v20 = vsel %vm4007_vm9, %v2049_v59, %v1967_v28 }
 0x4d3   :  { %v2055_v16 = vsel %vm1431_vm10, %v2052_v20, %v1976_v47 }
 0x4d5   :  { %v1974_v33 = vpop.permute.xlu0 %1973  ;;  %v2001_v50 = vpop.permute.xlu1 %2000 }
 0x4d6   :  { %v2054_v32 = vsel %vm1431_vm10, %v2051_v52, %v1974_v33 }
 0x4d7   :  { %v2057_v29 = vsel %vm1435_vm15, %v2054_v32, %v1983_v60 }
 0x4d9   :  { %v1978_v42 = vpop.permute.xlu0 %1977  ;;  %v2005_v1 = vpop.permute.xlu1 %2004 }
 0x4da   :  { %v2056_v10 = vsel %vm1431_vm10, %v2053_v48, %v1978_v42  ;;  %vm4013_vm10 = vcmask 138240  }
 0x4db   :  { %v2059_v3 = vsel %vm1435_vm15, %v2056_v10, %v1987_v45 }
 0x4dd   :  { %v1985_v63 = vpop.permute.xlu0 %1984  ;;  %v2012_v11 = vpop.permute.xlu1 %2011 }
 0x4de   :  { %v2058_v35 = vsel %vm1435_vm15, %v2055_v16, %v1985_v63  ;;  %vm4014_vm15 = vmmov %vm4012_vm11 }
 0x4df   :  { %v2061_v37 = vsel %vm1439_vm1, %v2058_v35, %v1994_v51 }
 0x4e1   :  { %v1992_v46 = vpop.permute.xlu0 %1991  ;;  %v2019_v43 = vpop.permute.xlu1 %2018 }
 0x4e2   :  { %v2060_v17 = vsel %vm1439_vm1, %v2057_v29, %v1992_v46 }
 0x4e3   :  { %v2063_v21 = vsel %vm1443_vm2, %v2060_v17, %v2001_v50 }
 0x4e5   :  { %v1996_v61 = vpop.permute.xlu0 %1995  ;;  %v2023_v26 = vpop.permute.xlu1 %2022 }
 0x4e6   :  { %v2062_v24 = vsel %vm1439_vm1, %v2059_v3, %v1996_v61  ;;  %vm4015_vm1 = vmmov %vm4013_vm10 }
 0x4e7   :  { %v2065_v55 = vsel %vm1443_vm2, %v2062_v24, %v2005_v1 }
 0x4e9   :  { %v2003_v7 = vpop.permute.xlu0 %2002  ;;  %v2075_v18 = vpop.permute.xlu1 %2074 }
 0x4ea   :  { %v2064_v0 = vsel %vm1443_vm2, %v2061_v37, %v2003_v7 }
 0x4eb   :  { %v2067_v62 = vsel %vm1447_vm3, %v2064_v0, %v2012_v11 }
 0x4ed   :  { %v2010_v27 = vpop.permute.xlu0 %2009 }
 0x4ee   :  { %v2066_v14 = vsel %vm1447_vm3, %v2063_v21, %v2010_v27 }
 0x4ef   :  { %v2069_v19 = vsel %vm1451_vm4, %v2066_v14, %v2019_v43 }
 0x4f1   :  { %v2014_v44 = vpop.permute.xlu0 %2013 }
 0x4f2   :  { %v2068_v57 = vsel %vm1447_vm3, %v2065_v55, %v2014_v44 }
 0x4f3   :  { %v2071_v36 = vsel %vm1451_vm4, %v2068_v57, %v2023_v26 }
 0x4f5   :  { %v2021_v23 = vpop.permute.xlu0 %2020 }
 0x4f6   :  { %v2070_v6 = vsel %vm1451_vm4, %v2067_v62, %v2021_v23 }
 0x4f7   :  { %v2082_v8 = vsel %vm4012_vm11, %v2070_v6, %v2075_v18 }
 0x4f8   :  { %2137 = vst.msk [vmem:[%s3931_s5 + $0x50] sm:$0xff] %vm4013_vm10, %v2082_v8 }
 0x4f9   :  { %v2073_v4 = vpop.permute.xlu0 %2072 }
 0x4fa   :  { %v2081_v13 = vsel %vm4014_vm15, %v2069_v19, %v2073_v4 }
 0x4fb   :  { %2136 = vst.msk [vmem:[%s3931_s5 + $0x48] sm:$0xff] %vm4015_vm1, %v2081_v13 }
 0x4fd   :  { %v2077_v22 = vpop.permute.xlu0 %2076 }
 0x4fe   :  { %v2083_v47 = vsel %vm4016_vm0, %v2071_v36, %v2077_v22 }
 0x4ff   :  { %2138 = vst.msk [vmem:[%s3931_s5 + $0x58] sm:$0x1] %vm4017_vm13, %v2083_v47 }
 0x500   :  { %2092 = vsyncpa [#allocation3], 1 }
 0x501   :  { %2093 = vsyncpa [#allocation5], 1 }

</bundles_post_ra>
